<compile_context>
chip_gen: v7x
topology: tpu7x:2x2x1
jax: 0.10.0
libtpu: 0.0.40
codegen_flags: <defaults>
</compile_context>

<pallas_src>
import numpy as np
import jax
import jax.numpy as jnp
from jax.experimental import pallas as pl
from jax.experimental.pallas import tpu as pltpu

# ---------------- constants matching the PyTorch module ----------------
SAMPLE_RATE = 16000
N_FFT = 1024
HOP = 512
N_MELS = 128
N_FREQ = N_FFT // 2 + 1            # 513
N_FREQ_PAD = 640                   # 513 padded to 5*128 for lane density
PREEMPH = 0.97
ENC_OUT = 32                       # nOut of Hierarchical_WavEncoder
D_MODEL = 64
LEAKY_SLOPE = 0.2                  # TODO(synk): exact HA2G ConvNormRelu slope unknown
CPAD = 128                         # all channel dims padded to one lane-dense width
PAD = 8                            # sublane-aligned halo inside conv scratch


# =======================================================================
# Fused Pallas kernel (one batch element per grid step)
# =======================================================================
def _ha2g_fused_kernel(wchunks_ref, dftw_ref, fb_ref, wstk_ref, bstk_ref,
                       wp_ref, bp_ref,
                       out_low_ref, out_mid_ref, out_high_ref,
                       mel_pad, h1_pad, h2_pad, h3_pad):
    F = out_low_ref.shape[1]
    F2 = out_mid_ref.shape[1]
    F3 = out_high_ref.shape[1]

    # Zero only the halo rows (the valid regions are fully overwritten below;
    # halo rows act as the k=3 convs' zero padding).
    zeros_halo = jnp.zeros((PAD, CPAD), jnp.float32)
    for buf, length in ((mel_pad, F), (h1_pad, F), (h2_pad, F2), (h3_pad, F3)):
        buf[pl.ds(0, PAD), :] = zeros_halo
        buf[pl.ds(length + PAD, PAD), :] = zeros_halo

    # ---- mel spectrogram: frames built in-kernel from 512-sample chunks ----
    # frame f = [chunk f | chunk f+1]  =>  spec = w_lo @ dftw[0] + w_hi @ dftw[1]
    w_lo = wchunks_ref[0, pl.ds(0, F), :]                                # bf16 [F, 512]
    w_hi = wchunks_ref[0, pl.ds(1, F), :]
    spec = jnp.dot(w_lo, dftw_ref[0], preferred_element_type=jnp.float32)
    spec = spec + jnp.dot(w_hi, dftw_ref[1], preferred_element_type=jnp.float32)
    re = spec[:, :N_FREQ_PAD]
    im = spec[:, N_FREQ_PAD:]
    power = (re * re + im * im).astype(jnp.bfloat16)                     # power=2.0
    mel = jnp.dot(power, fb_ref[...], preferred_element_type=jnp.float32) + 1e-6
    # InstanceNorm1d(128): per-channel over time, eps=1e-5, no affine (f32).
    mean = jnp.mean(mel, axis=0, keepdims=True)
    var = jnp.mean((mel - mean) ** 2, axis=0, keepdims=True)
    mel_pad[pl.ds(PAD, F), :] = (mel - mean) * jax.lax.rsqrt(var + 1e-5)

    def conv3(src_ref, out_len, widx, stride=1):
        """k=3/pad=1 Conv1d (+bias, LeakyReLU) as three MXU dots on (optionally
        strided) VMEM views.  bf16 operands, f32 accumulation.  stride=2 reads
        the taps directly with strided slices (no selection matmul)."""
        def tap(off):
            if stride == 1:
                idx = pl.ds(PAD + off, out_len)
            else:
                idx = pl.ds(PAD + off, out_len, stride=stride)
            return src_ref[idx, :].astype(jnp.bfloat16)
        acc = jnp.dot(tap(-1), wstk_ref[widx, 0], preferred_element_type=jnp.float32)
        acc = acc + jnp.dot(tap(0), wstk_ref[widx, 1], preferred_element_type=jnp.float32)
        acc = acc + jnp.dot(tap(1), wstk_ref[widx, 2], preferred_element_type=jnp.float32)
        acc = acc + bstk_ref[widx]                                       # [1, 128]
        return jnp.where(acc >= 0.0, acc, LEAKY_SLOPE * acc)             # LeakyReLU

    def project(feat, out_ref):
        """Shared Linear(32 -> d_model), fused; 128-lane-dense store (host
        slices the real d_model columns).  Dropout is an eval no-op."""
        out_ref[0, :, :] = jnp.dot(feat.astype(jnp.bfloat16), wp_ref[...],
                                   preferred_element_type=jnp.float32) + bp_ref[...]

    # level 0 (full time resolution)
    h1_pad[pl.ds(PAD, F), :] = conv3(mel_pad, F, 0)                      # [F, 64→128]
    project(conv3(h1_pad, F, 1), out_low_ref)                            # feat_low, stored early
    # direct stride-2 down conv (strided taps)
    h2_pad[pl.ds(PAD, F2), :] = conv3(h1_pad, F2, 2, stride=2)           # [F2, 64→128]

    # level 1 (half resolution) — projected at F2 rows, upsampled on host
    project(conv3(h2_pad, F2, 3), out_mid_ref)                           # feat_mid
    h3_pad[pl.ds(PAD, F3), :] = conv3(h2_pad, F3, 4, stride=2)           # [F3, 64→128]

    # level 2 (quarter resolution) — projected at F3 rows, upsampled on host
    project(conv3(h3_pad, F3, 5), out_high_ref)                          # feat_high


def _fused_forward(wchunks, dftw, fb, wstk, bstk, wp, bp, n_frames):
    N = wchunks.shape[0]
    F = n_frames
    F2 = (F - 1) // 2 + 1
    F3 = (F2 - 1) // 2 + 1

    def const_spec(shape):
        return pl.BlockSpec(shape, lambda n, _r=len(shape): (0,) * _r)

    return pl.pallas_call(
        _ha2g_fused_kernel,
        out_shape=(jax.ShapeDtypeStruct((N, F, CPAD), jnp.float32),
                   jax.ShapeDtypeStruct((N, F2, CPAD), jnp.float32),
                   jax.ShapeDtypeStruct((N, F3, CPAD), jnp.float32)),
        grid=(N,),
        in_specs=[
            pl.BlockSpec((1, F + 1, HOP), lambda n: (n, 0, 0)),   # waveform chunks (bf16)
            const_spec((2, HOP, 2 * N_FREQ_PAD)),                 # windowed cos|sin DFT (bf16)
            const_spec((N_FREQ_PAD, N_MELS)),                     # mel filterbank (bf16)
            const_spec((6, 3, CPAD, CPAD)),                       # stacked conv weights (bf16)
            const_spec((6, 1, CPAD)),                             # stacked conv biases (f32)
            const_spec((CPAD, CPAD)),                             # projection weight (bf16)
            const_spec((1, CPAD)),                                # projection bias (f32)
        ],
        out_specs=[
            pl.BlockSpec((1, F, CPAD), lambda n: (n, 0, 0)),      # feat_low  (full res)
            pl.BlockSpec((1, F2, CPAD), lambda n: (n, 0, 0)),     # feat_mid  (half res)
            pl.BlockSpec((1, F3, CPAD), lambda n: (n, 0, 0)),     # feat_high (quarter res)
        ],
        scratch_shapes=[
            pltpu.VMEM((F + 2 * PAD, CPAD), jnp.float32),         # padded mel
            pltpu.VMEM((F + 2 * PAD, CPAD), jnp.float32),         # padded h1
            pltpu.VMEM((F2 + 2 * PAD, CPAD), jnp.float32),        # padded h2
            pltpu.VMEM((F3 + 2 * PAD, CPAD), jnp.float32),        # padded h3
        ],
        compiler_params=pltpu.CompilerParams(
            dimension_semantics=("parallel",),                    # megacore / dual-TC
            vmem_limit_bytes=32 * 1024 * 1024),                   # bf16 constants fit easily
    )(wchunks, dftw, fb, wstk, bstk, wp, bp)


# =======================================================================
# Host glue: pre-emphasis, chunking, constants, params
# =======================================================================
def pre_emphasis(x, coef=PREEMPH):
    # PreEmphasis: reflect-pad 1 on the left, y[t] = x[t] - coef * x[t-1]
    xp = jnp.concatenate([x[:, 1:2], x], axis=1)
    return xp[:, 1:] - coef * xp[:, :-1]


def frame_chunks(x):
    """torchaudio MelSpectrogram framing (center=True, reflect pad n_fft//2,
    hop=512) expressed as non-overlapping 512-sample chunks; the kernel
    rebuilds frame f as [chunk f | chunk f+1].  Hann window is folded into the
    DFT matrices."""
    N, T = x.shape
    pad = N_FFT // 2
    xp = jnp.pad(x, ((0, 0), (pad, pad)), mode="reflect")
    n_frames = 1 + T // HOP
    xp = xp[:, :(n_frames + 1) * HOP]
    return xp.reshape(N, n_frames + 1, HOP).astype(jnp.bfloat16), n_frames


def build_dft_matrix():
    """[cos | sin] real-DFT matrix with the periodic Hann window folded in,
    frequency axis zero-padded 513 -> 640, split into the two 512-row halves
    used by the chunked in-kernel framing.  bf16 MXU operand."""
    n = np.arange(N_FFT)
    window = 0.5 - 0.5 * np.cos(2.0 * np.pi * n / N_FFT)
    ang = 2.0 * np.pi * n[:, None] * np.arange(N_FREQ)[None, :] / N_FFT
    dftw = np.zeros((N_FFT, 2 * N_FREQ_PAD), np.float32)
    dftw[:, :N_FREQ] = np.cos(ang) * window[:, None]
    dftw[:, N_FREQ_PAD:N_FREQ_PAD + N_FREQ] = np.sin(ang) * window[:, None]
    return jnp.asarray(dftw.reshape(2, HOP, 2 * N_FREQ_PAD), jnp.bfloat16)


def build_mel_filterbank():
    """torchaudio melscale_fbanks (HTK, norm=None), rows zero-padded 513 -> 640.
    bf16 MXU operand (power-spectrum inputs tolerate the precision)."""
    all_freqs = np.linspace(0.0, SAMPLE_RATE / 2.0, N_FREQ)
    hz2mel = lambda f: 2595.0 * np.log10(1.0 + f / 700.0)
    mel2hz = lambda m: 700.0 * (10.0 ** (m / 2595.0) - 1.0)
    m_pts = np.linspace(hz2mel(0.0), hz2mel(SAMPLE_RATE / 2.0), N_MELS + 2)
    f_pts = mel2hz(m_pts)
    f_diff = f_pts[1:] - f_pts[:-1]
    slopes = f_pts[None, :] - all_freqs[:, None]
    down = -slopes[:, :-2] / f_diff[:-1]
    up = slopes[:, 2:] / f_diff[1:]
    fb = np.maximum(0.0, np.minimum(down, up))          # [513, 128]
    fb_pad = np.zeros((N_FREQ_PAD, N_MELS), np.float32)
    fb_pad[:N_FREQ] = fb
    return jnp.asarray(fb_pad, jnp.bfloat16)


def init_params(key, d_model):
    """Conv/linear params in one zero-padded [6,3,128,128] stack (bf16 MXU
    operands, f32 biases).  Padded rows/cols are zero => padding is transparent."""
    assert d_model <= CPAD
    # TODO(synk): exact Hierarchical_WavEncoder layer config is external to the
    # provided source; faithful 3-level strided-conv hierarchy with nOut=32 each.
    cins = [N_MELS, 64, 64, 64, 64, 64]      # conv1, conv_low, down1, conv_mid, down2, conv_high
    couts = [64, ENC_OUT, 64, ENC_OUT, 64, ENC_OUT]
    wstk = np.zeros((6, 3, CPAD, CPAD), np.float32)
    bstk = np.zeros((6, 1, CPAD), np.float32)
    keys = jax.random.split(key, 2 * len(cins) + 2)
    for i, (ci, co) in enumerate(zip(cins, couts)):
        lim = 1.0 / np.sqrt(3 * ci)
        w = jax.random.uniform(keys[2 * i], (3, ci, co), jnp.float32, -lim, lim)
        b = jax.random.uniform(keys[2 * i + 1], (co,), jnp.float32, -lim, lim)
        wstk[i, :, :ci, :co] = np.asarray(w)
        bstk[i, 0, :co] = np.asarray(b)
    lim = 1.0 / np.sqrt(ENC_OUT)
    wp = np.zeros((CPAD, CPAD), np.float32)
    bp = np.zeros((1, CPAD), np.float32)
    wp[:ENC_OUT, :d_model] = np.asarray(
        jax.random.uniform(keys[-2], (ENC_OUT, d_model), jnp.float32, -lim, lim))
    bp[0, :d_model] = np.asarray(
        jax.random.uniform(keys[-1], (d_model,), jnp.float32, -lim, lim))
    return {
        "wstk": jnp.asarray(wstk, jnp.bfloat16),
        "bstk": jnp.asarray(bstk, jnp.float32),
        "wp": jnp.asarray(wp, jnp.bfloat16),
        "bp": jnp.asarray(bp, jnp.float32),
    }


# =======================================================================
# Forward pass
# =======================================================================
def ha2g_speech_encoder(wavform, params, dftw, fb, d_model=D_MODEL):
    x = pre_emphasis(wavform)
    wchunks, F = frame_chunks(x)                         # [N, F+1, 512] bf16
    low, mid, high = _fused_forward(wchunks, dftw, fb,
                                    params["wstk"], params["bstk"],
                                    params["wp"], params["bp"], F)
    F2, F3 = mid.shape[1], high.shape[1]
    rep2 = -(-F // F2)
    rep3 = -(-F // F3)
    # Project-then-upsample: mid/high were projected at F2/F3 rows in-kernel;
    # nearest-neighbor upsample to F rows happens here on the small tensors.
    # TODO(synk): HA2G likely uses F.interpolate (linear); nearest-neighbor used here.
    low = low[:, :, :d_model]
    mid = jnp.repeat(mid[:, :, :d_model], rep2, axis=1)[:, :F]
    high = jnp.repeat(high[:, :, :d_model], rep3, axis=1)[:, :F]
    return low, mid, high


if __name__ == "__main__":
    key = jax.random.PRNGKey(0)
    kw, kp = jax.random.split(key)

    N, T = 2, 8192                                      # small waveform [N, T]
    wav = 0.1 * jax.random.normal(kw, (N, T), jnp.float32)
    params = init_params(kp, D_MODEL)
    dftw = build_dft_matrix()
    fb = build_mel_filterbank()

    fwd = jax.jit(lambda w: ha2g_speech_encoder(w, params, dftw, fb))
    outs = jax.block_until_ready(fwd(wav))

    n_frames = 1 + T // HOP
    for o in outs:
        assert o.shape == (N, n_frames, D_MODEL), o.shape
        assert o.dtype == jnp.float32
        assert bool(jnp.all(jnp.isfinite(o)))
    print("KERNEL_OK")
</pallas_src>

<mosaic_0001>
module attributes {stable_mosaic.version = 11 : i64} {
  func.func @_ha2g_fused_kernel(%arg0: i32, %arg1: memref<1x18x512xbf16, #tpu.memory_space<vmem>>, %arg2: memref<2x512x1280xbf16, #tpu.memory_space<vmem>>, %arg3: memref<640x128xbf16, #tpu.memory_space<vmem>>, %arg4: memref<6x3x128x128xbf16, #tpu.memory_space<vmem>>, %arg5: memref<6x1x128xf32, #tpu.memory_space<vmem>>, %arg6: memref<128x128xbf16, #tpu.memory_space<vmem>>, %arg7: memref<1x128xf32, #tpu.memory_space<vmem>>, %arg8: memref<1x17x128xf32, #tpu.memory_space<vmem>>, %arg9: memref<1x9x128xf32, #tpu.memory_space<vmem>>, %arg10: memref<1x5x128xf32, #tpu.memory_space<vmem>>, %arg11: memref<33x128xf32, #tpu.memory_space<vmem>>, %arg12: memref<33x128xf32, #tpu.memory_space<vmem>>, %arg13: memref<25x128xf32, #tpu.memory_space<vmem>>, %arg14: memref<21x128xf32, #tpu.memory_space<vmem>>) attributes {dimension_semantics = [#tpu.dimension_semantics<parallel>], iteration_bounds = array<i64: 2>, scalar_prefetch = 0 : i64, scratch_operands = 4 : i64, tpu.core_type = #tpu.core_type<tc>, window_params = [{transform_indices = @transform_0, window_bounds = array<i64: 1, 18, 512>}, {pipeline_mode = #tpu.pipeline_mode<synchronous>, transform_indices = @transform_1, window_bounds = array<i64: 2, 512, 1280>}, {pipeline_mode = #tpu.pipeline_mode<synchronous>, transform_indices = @transform_2, window_bounds = array<i64: 640, 128>}, {pipeline_mode = #tpu.pipeline_mode<synchronous>, transform_indices = @transform_3, window_bounds = array<i64: 6, 3, 128, 128>}, {pipeline_mode = #tpu.pipeline_mode<synchronous>, transform_indices = @transform_4, window_bounds = array<i64: 6, 1, 128>}, {pipeline_mode = #tpu.pipeline_mode<synchronous>, transform_indices = @transform_5, window_bounds = array<i64: 128, 128>}, {pipeline_mode = #tpu.pipeline_mode<synchronous>, transform_indices = @transform_6, window_bounds = array<i64: 1, 128>}, {transform_indices = @transform_7, window_bounds = array<i64: 1, 17, 128>}, {transform_indices = @transform_8, window_bounds = array<i64: 1, 9, 128>}, {transform_indices = @transform_9, window_bounds = array<i64: 1, 5, 128>}]} {
    %cst = arith.constant 0.000000e+00 : f32
    %0 = vector.broadcast %cst : f32 to vector<8x128xf32>
    %c0 = arith.constant 0 : index
    %c0_0 = arith.constant 0 : index
    %1 = vector.load %arg11[%c0, %c0_0] : memref<33x128xf32, #tpu.memory_space<vmem>>, vector<8x128xf32>
    tpu.vector_store %arg11[%c0, %c0_0], %0 {strides = array<i32>} : memref<33x128xf32, #tpu.memory_space<vmem>>, vector<8x128xf32>,
    %c25 = arith.constant 25 : index
    %c0_1 = arith.constant 0 : index
    %2 = vector.load %arg11[%c25, %c0_1] : memref<33x128xf32, #tpu.memory_space<vmem>>, vector<8x128xf32>
    tpu.vector_store %arg11[%c25, %c0_1], %0 {strides = array<i32>} : memref<33x128xf32, #tpu.memory_space<vmem>>, vector<8x128xf32>,
    %c0_2 = arith.constant 0 : index
    %c0_3 = arith.constant 0 : index
    %3 = vector.load %arg12[%c0_2, %c0_3] : memref<33x128xf32, #tpu.memory_space<vmem>>, vector<8x128xf32>
    tpu.vector_store %arg12[%c0_2, %c0_3], %0 {strides = array<i32>} : memref<33x128xf32, #tpu.memory_space<vmem>>, vector<8x128xf32>,
    %c25_4 = arith.constant 25 : index
    %c0_5 = arith.constant 0 : index
    %4 = vector.load %arg12[%c25_4, %c0_5] : memref<33x128xf32, #tpu.memory_space<vmem>>, vector<8x128xf32>
    tpu.vector_store %arg12[%c25_4, %c0_5], %0 {strides = array<i32>} : memref<33x128xf32, #tpu.memory_space<vmem>>, vector<8x128xf32>,
    %c0_6 = arith.constant 0 : index
    %c0_7 = arith.constant 0 : index
    %5 = vector.load %arg13[%c0_6, %c0_7] : memref<25x128xf32, #tpu.memory_space<vmem>>, vector<8x128xf32>
    tpu.vector_store %arg13[%c0_6, %c0_7], %0 {strides = array<i32>} : memref<25x128xf32, #tpu.memory_space<vmem>>, vector<8x128xf32>,
    %c17 = arith.constant 17 : index
    %c0_8 = arith.constant 0 : index
    %6 = vector.load %arg13[%c17, %c0_8] : memref<25x128xf32, #tpu.memory_space<vmem>>, vector<8x128xf32>
    tpu.vector_store %arg13[%c17, %c0_8], %0 {strides = array<i32>} : memref<25x128xf32, #tpu.memory_space<vmem>>, vector<8x128xf32>,
    %c0_9 = arith.constant 0 : index
    %c0_10 = arith.constant 0 : index
    %7 = vector.load %arg14[%c0_9, %c0_10] : memref<21x128xf32, #tpu.memory_space<vmem>>, vector<8x128xf32>
    tpu.vector_store %arg14[%c0_9, %c0_10], %0 {strides = array<i32>} : memref<21x128xf32, #tpu.memory_space<vmem>>, vector<8x128xf32>,
    %c13 = arith.constant 13 : index
    %c0_11 = arith.constant 0 : index
    %8 = vector.load %arg14[%c13, %c0_11] : memref<21x128xf32, #tpu.memory_space<vmem>>, vector<8x128xf32>
    tpu.vector_store %arg14[%c13, %c0_11], %0 {strides = array<i32>} : memref<21x128xf32, #tpu.memory_space<vmem>>, vector<8x128xf32>,
    %c0_12 = arith.constant 0 : index
    %c0_13 = arith.constant 0 : index
    %c0_14 = arith.constant 0 : index
    %9 = vector.load %arg1[%c0_12, %c0_13, %c0_14] : memref<1x18x512xbf16, #tpu.memory_space<vmem>>, vector<1x17x512xbf16>
    %10 = vector.shape_cast %9 : vector<1x17x512xbf16> to vector<17x512xbf16>
    %c0_15 = arith.constant 0 : index
    %c1 = arith.constant 1 : index
    %c0_16 = arith.constant 0 : index
    %11 = vector.load %arg1[%c0_15, %c1, %c0_16] : memref<1x18x512xbf16, #tpu.memory_space<vmem>>, vector<1x17x512xbf16>
    %12 = vector.shape_cast %11 : vector<1x17x512xbf16> to vector<17x512xbf16>
    %c0_17 = arith.constant 0 : index
    %c0_18 = arith.constant 0 : index
    %c0_19 = arith.constant 0 : index
    %13 = vector.load %arg2[%c0_17, %c0_18, %c0_19] : memref<2x512x1280xbf16, #tpu.memory_space<vmem>>, vector<1x512x1280xbf16>
    %14 = vector.shape_cast %13 : vector<1x512x1280xbf16> to vector<512x1280xbf16>
    %cst_20 = arith.constant dense<0.000000e+00> : vector<17x1280xf32>
    %15 = tpu.matmul %10, %14, %cst_20 {dimension_numbers = #tpu.dot_dimension_numbers<[1], [0], [0], [1], [0, 0, 1, 1], [], []>} : vector<17x512xbf16>, vector<512x1280xbf16>, vector<17x1280xf32> -> vector<17x1280xf32>
    %c1_21 = arith.constant 1 : index
    %c0_22 = arith.constant 0 : index
    %c0_23 = arith.constant 0 : index
    %16 = vector.load %arg2[%c1_21, %c0_22, %c0_23] : memref<2x512x1280xbf16, #tpu.memory_space<vmem>>, vector<1x512x1280xbf16>
    %17 = vector.shape_cast %16 : vector<1x512x1280xbf16> to vector<512x1280xbf16>
    %cst_24 = arith.constant dense<0.000000e+00> : vector<17x1280xf32>
    %18 = tpu.matmul %12, %17, %cst_24 {dimension_numbers = #tpu.dot_dimension_numbers<[1], [0], [0], [1], [0, 0, 1, 1], [], []>} : vector<17x512xbf16>, vector<512x1280xbf16>, vector<17x1280xf32> -> vector<17x1280xf32>
    %19 = arith.addf %15, %18 : vector<17x1280xf32>
    %20 = vector.extract_strided_slice %19 {offsets = [0, 0], sizes = [17, 640], strides = [1, 1]} : vector<17x1280xf32> to vector<17x640xf32>
    %21 = vector.extract_strided_slice %19 {offsets = [0, 640], sizes = [17, 640], strides = [1, 1]} : vector<17x1280xf32> to vector<17x640xf32>
    %22 = arith.mulf %20, %20 : vector<17x640xf32>
    %23 = arith.mulf %21, %21 : vector<17x640xf32>
    %24 = arith.addf %22, %23 : vector<17x640xf32>
    %25 = arith.truncf %24 : vector<17x640xf32> to vector<17x640xbf16>
    %c0_25 = arith.constant 0 : index
    %c0_26 = arith.constant 0 : index
    %26 = vector.load %arg3[%c0_25, %c0_26] : memref<640x128xbf16, #tpu.memory_space<vmem>>, vector<640x128xbf16>
    %cst_27 = arith.constant dense<0.000000e+00> : vector<17x128xf32>
    %27 = tpu.matmul %25, %26, %cst_27 {dimension_numbers = #tpu.dot_dimension_numbers<[1], [0], [0], [1], [0, 0, 1, 1], [], []>} : vector<17x640xbf16>, vector<640x128xbf16>, vector<17x128xf32> -> vector<17x128xf32>
    %cst_28 = arith.constant 9.99999997E-7 : f32
    %28 = vector.broadcast %cst_28 : f32 to vector<17x128xf32>
    %29 = arith.addf %27, %28 : vector<17x128xf32>
    %cst_29 = arith.constant dense<0.000000e+00> : vector<128xf32>
    %30 = vector.multi_reduction <add>, %29, %cst_29 [0] : vector<17x128xf32> to vector<128xf32>
    %31 = vector.shape_cast %30 : vector<128xf32> to vector<1x128xf32>
    %cst_30 = arith.constant 1.700000e+01 : f32
    %32 = vector.broadcast %cst_30 : f32 to vector<1x128xf32>
    %33 = arith.divf %31, %32 : vector<1x128xf32>
    %34 = vector.broadcast %33 : vector<1x128xf32> to vector<17x128xf32>
    %35 = arith.subf %29, %34 : vector<17x128xf32>
    %36 = arith.mulf %35, %35 : vector<17x128xf32>
    %cst_31 = arith.constant dense<0.000000e+00> : vector<128xf32>
    %37 = vector.multi_reduction <add>, %36, %cst_31 [0] : vector<17x128xf32> to vector<128xf32>
    %38 = vector.shape_cast %37 : vector<128xf32> to vector<1x128xf32>
    %cst_32 = arith.constant 1.700000e+01 : f32
    %39 = vector.broadcast %cst_32 : f32 to vector<1x128xf32>
    %40 = arith.divf %38, %39 : vector<1x128xf32>
    %41 = vector.broadcast %33 : vector<1x128xf32> to vector<17x128xf32>
    %42 = arith.subf %29, %41 : vector<17x128xf32>
    %cst_33 = arith.constant 9.99999974E-6 : f32
    %43 = vector.broadcast %cst_33 : f32 to vector<1x128xf32>
    %44 = arith.addf %40, %43 : vector<1x128xf32>
    %45 = math.rsqrt %44 : vector<1x128xf32>
    %46 = vector.broadcast %45 : vector<1x128xf32> to vector<17x128xf32>
    %47 = arith.mulf %42, %46 : vector<17x128xf32>
    %c8 = arith.constant 8 : index
    %c0_34 = arith.constant 0 : index
    %48 = vector.load %arg11[%c8, %c0_34] : memref<33x128xf32, #tpu.memory_space<vmem>>, vector<17x128xf32>
    tpu.vector_store %arg11[%c8, %c0_34], %47 {strides = array<i32>} : memref<33x128xf32, #tpu.memory_space<vmem>>, vector<17x128xf32>,
    %c7 = arith.constant 7 : index
    %c0_35 = arith.constant 0 : index
    %49 = vector.load %arg11[%c7, %c0_35] : memref<33x128xf32, #tpu.memory_space<vmem>>, vector<17x128xf32>
    %50 = arith.truncf %49 : vector<17x128xf32> to vector<17x128xbf16>
    %c0_36 = arith.constant 0 : index
    %c0_37 = arith.constant 0 : index
    %c0_38 = arith.constant 0 : index
    %c0_39 = arith.constant 0 : index
    %51 = vector.load %arg4[%c0_36, %c0_37, %c0_38, %c0_39] : memref<6x3x128x128xbf16, #tpu.memory_space<vmem>>, vector<1x1x128x128xbf16>
    %52 = vector.shape_cast %51 : vector<1x1x128x128xbf16> to vector<128x128xbf16>
    %cst_40 = arith.constant dense<0.000000e+00> : vector<17x128xf32>
    %53 = tpu.matmul %50, %52, %cst_40 {dimension_numbers = #tpu.dot_dimension_numbers<[1], [0], [0], [1], [0, 0, 1, 1], [], []>} : vector<17x128xbf16>, vector<128x128xbf16>, vector<17x128xf32> -> vector<17x128xf32>
    %c8_41 = arith.constant 8 : index
    %c0_42 = arith.constant 0 : index
    %54 = vector.load %arg11[%c8_41, %c0_42] : memref<33x128xf32, #tpu.memory_space<vmem>>, vector<17x128xf32>
    %55 = arith.truncf %54 : vector<17x128xf32> to vector<17x128xbf16>
    %c0_43 = arith.constant 0 : index
    %c1_44 = arith.constant 1 : index
    %c0_45 = arith.constant 0 : index
    %c0_46 = arith.constant 0 : index
    %56 = vector.load %arg4[%c0_43, %c1_44, %c0_45, %c0_46] : memref<6x3x128x128xbf16, #tpu.memory_space<vmem>>, vector<1x1x128x128xbf16>
    %57 = vector.shape_cast %56 : vector<1x1x128x128xbf16> to vector<128x128xbf16>
    %cst_47 = arith.constant dense<0.000000e+00> : vector<17x128xf32>
    %58 = tpu.matmul %55, %57, %cst_47 {dimension_numbers = #tpu.dot_dimension_numbers<[1], [0], [0], [1], [0, 0, 1, 1], [], []>} : vector<17x128xbf16>, vector<128x128xbf16>, vector<17x128xf32> -> vector<17x128xf32>
    %59 = arith.addf %53, %58 : vector<17x128xf32>
    %c9 = arith.constant 9 : index
    %c0_48 = arith.constant 0 : index
    %60 = vector.load %arg11[%c9, %c0_48] : memref<33x128xf32, #tpu.memory_space<vmem>>, vector<17x128xf32>
    %61 = arith.truncf %60 : vector<17x128xf32> to vector<17x128xbf16>
    %c0_49 = arith.constant 0 : index
    %c2 = arith.constant 2 : index
    %c0_50 = arith.constant 0 : index
    %c0_51 = arith.constant 0 : index
    %62 = vector.load %arg4[%c0_49, %c2, %c0_50, %c0_51] : memref<6x3x128x128xbf16, #tpu.memory_space<vmem>>, vector<1x1x128x128xbf16>
    %63 = vector.shape_cast %62 : vector<1x1x128x128xbf16> to vector<128x128xbf16>
    %cst_52 = arith.constant dense<0.000000e+00> : vector<17x128xf32>
    %64 = tpu.matmul %61, %63, %cst_52 {dimension_numbers = #tpu.dot_dimension_numbers<[1], [0], [0], [1], [0, 0, 1, 1], [], []>} : vector<17x128xbf16>, vector<128x128xbf16>, vector<17x128xf32> -> vector<17x128xf32>
    %65 = arith.addf %59, %64 : vector<17x128xf32>
    %c0_53 = arith.constant 0 : index
    %c0_54 = arith.constant 0 : index
    %c0_55 = arith.constant 0 : index
    %66 = vector.load %arg5[%c0_53, %c0_54, %c0_55] : memref<6x1x128xf32, #tpu.memory_space<vmem>>, vector<1x1x128xf32>
    %67 = vector.shape_cast %66 : vector<1x1x128xf32> to vector<1x128xf32>
    %68 = vector.broadcast %67 : vector<1x128xf32> to vector<17x128xf32>
    %69 = arith.addf %65, %68 : vector<17x128xf32>
    %cst_56 = arith.constant 0.000000e+00 : f32
    %70 = vector.broadcast %cst_56 : f32 to vector<17x128xf32>
    %71 = arith.cmpf oge, %69, %70 : vector<17x128xf32>
    %cst_57 = arith.constant 2.000000e-01 : f32
    %72 = vector.broadcast %cst_57 : f32 to vector<17x128xf32>
    %73 = arith.mulf %72, %69 : vector<17x128xf32>
    %74 = arith.select %71, %69, %73 : vector<17x128xi1>, vector<17x128xf32>
    %c8_58 = arith.constant 8 : index
    %c0_59 = arith.constant 0 : index
    %75 = vector.load %arg12[%c8_58, %c0_59] : memref<33x128xf32, #tpu.memory_space<vmem>>, vector<17x128xf32>
    tpu.vector_store %arg12[%c8_58, %c0_59], %74 {strides = array<i32>} : memref<33x128xf32, #tpu.memory_space<vmem>>, vector<17x128xf32>,
    %c7_60 = arith.constant 7 : index
    %c0_61 = arith.constant 0 : index
    %76 = vector.load %arg12[%c7_60, %c0_61] : memref<33x128xf32, #tpu.memory_space<vmem>>, vector<17x128xf32>
    %77 = arith.truncf %76 : vector<17x128xf32> to vector<17x128xbf16>
    %c1_62 = arith.constant 1 : index
    %c0_63 = arith.constant 0 : index
    %c0_64 = arith.constant 0 : index
    %c0_65 = arith.constant 0 : index
    %78 = vector.load %arg4[%c1_62, %c0_63, %c0_64, %c0_65] : memref<6x3x128x128xbf16, #tpu.memory_space<vmem>>, vector<1x1x128x128xbf16>
    %79 = vector.shape_cast %78 : vector<1x1x128x128xbf16> to vector<128x128xbf16>
    %cst_66 = arith.constant dense<0.000000e+00> : vector<17x128xf32>
    %80 = tpu.matmul %77, %79, %cst_66 {dimension_numbers = #tpu.dot_dimension_numbers<[1], [0], [0], [1], [0, 0, 1, 1], [], []>} : vector<17x128xbf16>, vector<128x128xbf16>, vector<17x128xf32> -> vector<17x128xf32>
    %c8_67 = arith.constant 8 : index
    %c0_68 = arith.constant 0 : index
    %81 = vector.load %arg12[%c8_67, %c0_68] : memref<33x128xf32, #tpu.memory_space<vmem>>, vector<17x128xf32>
    %82 = arith.truncf %81 : vector<17x128xf32> to vector<17x128xbf16>
    %c1_69 = arith.constant 1 : index
    %c1_70 = arith.constant 1 : index
    %c0_71 = arith.constant 0 : index
    %c0_72 = arith.constant 0 : index
    %83 = vector.load %arg4[%c1_69, %c1_70, %c0_71, %c0_72] : memref<6x3x128x128xbf16, #tpu.memory_space<vmem>>, vector<1x1x128x128xbf16>
    %84 = vector.shape_cast %83 : vector<1x1x128x128xbf16> to vector<128x128xbf16>
    %cst_73 = arith.constant dense<0.000000e+00> : vector<17x128xf32>
    %85 = tpu.matmul %82, %84, %cst_73 {dimension_numbers = #tpu.dot_dimension_numbers<[1], [0], [0], [1], [0, 0, 1, 1], [], []>} : vector<17x128xbf16>, vector<128x128xbf16>, vector<17x128xf32> -> vector<17x128xf32>
    %86 = arith.addf %80, %85 : vector<17x128xf32>
    %c9_74 = arith.constant 9 : index
    %c0_75 = arith.constant 0 : index
    %87 = vector.load %arg12[%c9_74, %c0_75] : memref<33x128xf32, #tpu.memory_space<vmem>>, vector<17x128xf32>
    %88 = arith.truncf %87 : vector<17x128xf32> to vector<17x128xbf16>
    %c1_76 = arith.constant 1 : index
    %c2_77 = arith.constant 2 : index
    %c0_78 = arith.constant 0 : index
    %c0_79 = arith.constant 0 : index
    %89 = vector.load %arg4[%c1_76, %c2_77, %c0_78, %c0_79] : memref<6x3x128x128xbf16, #tpu.memory_space<vmem>>, vector<1x1x128x128xbf16>
    %90 = vector.shape_cast %89 : vector<1x1x128x128xbf16> to vector<128x128xbf16>
    %cst_80 = arith.constant dense<0.000000e+00> : vector<17x128xf32>
    %91 = tpu.matmul %88, %90, %cst_80 {dimension_numbers = #tpu.dot_dimension_numbers<[1], [0], [0], [1], [0, 0, 1, 1], [], []>} : vector<17x128xbf16>, vector<128x128xbf16>, vector<17x128xf32> -> vector<17x128xf32>
    %92 = arith.addf %86, %91 : vector<17x128xf32>
    %c1_81 = arith.constant 1 : index
    %c0_82 = arith.constant 0 : index
    %c0_83 = arith.constant 0 : index
    %93 = vector.load %arg5[%c1_81, %c0_82, %c0_83] : memref<6x1x128xf32, #tpu.memory_space<vmem>>, vector<1x1x128xf32>
    %94 = vector.shape_cast %93 : vector<1x1x128xf32> to vector<1x128xf32>
    %95 = vector.broadcast %94 : vector<1x128xf32> to vector<17x128xf32>
    %96 = arith.addf %92, %95 : vector<17x128xf32>
    %cst_84 = arith.constant 0.000000e+00 : f32
    %97 = vector.broadcast %cst_84 : f32 to vector<17x128xf32>
    %98 = arith.cmpf oge, %96, %97 : vector<17x128xf32>
    %cst_85 = arith.constant 2.000000e-01 : f32
    %99 = vector.broadcast %cst_85 : f32 to vector<17x128xf32>
    %100 = arith.mulf %99, %96 : vector<17x128xf32>
    %101 = arith.select %98, %96, %100 : vector<17x128xi1>, vector<17x128xf32>
    %102 = arith.truncf %101 : vector<17x128xf32> to vector<17x128xbf16>
    %c0_86 = arith.constant 0 : index
    %c0_87 = arith.constant 0 : index
    %103 = vector.load %arg6[%c0_86, %c0_87] : memref<128x128xbf16, #tpu.memory_space<vmem>>, vector<128x128xbf16>
    %cst_88 = arith.constant dense<0.000000e+00> : vector<17x128xf32>
    %104 = tpu.matmul %102, %103, %cst_88 {dimension_numbers = #tpu.dot_dimension_numbers<[1], [0], [0], [1], [0, 0, 1, 1], [], []>} : vector<17x128xbf16>, vector<128x128xbf16>, vector<17x128xf32> -> vector<17x128xf32>
    %c0_89 = arith.constant 0 : index
    %c0_90 = arith.constant 0 : index
    %105 = vector.load %arg7[%c0_89, %c0_90] : memref<1x128xf32, #tpu.memory_space<vmem>>, vector<1x128xf32>
    %106 = vector.broadcast %105 : vector<1x128xf32> to vector<17x128xf32>
    %107 = arith.addf %104, %106 : vector<17x128xf32>
    %c0_91 = arith.constant 0 : index
    %c0_92 = arith.constant 0 : index
    %c0_93 = arith.constant 0 : index
    %108 = vector.load %arg8[%c0_91, %c0_92, %c0_93] : memref<1x17x128xf32, #tpu.memory_space<vmem>>, vector<1x17x128xf32>
    %109 = vector.shape_cast %108 : vector<1x17x128xf32> to vector<17x128xf32>
    %110 = vector.shape_cast %107 : vector<17x128xf32> to vector<1x17x128xf32>
    tpu.vector_store %arg8[%c0_91, %c0_92, %c0_93], %110 {strides = array<i32>} : memref<1x17x128xf32, #tpu.memory_space<vmem>>, vector<1x17x128xf32>,
    %c7_94 = arith.constant 7 : index
    %c0_95 = arith.constant 0 : index
    %111 = tpu.strided_load %arg12[%c7_94, %c0_95] {strides = array<i32: 2, 1>} : memref<33x128xf32, #tpu.memory_space<vmem>>, vector<9x128xf32>
    %112 = arith.truncf %111 : vector<9x128xf32> to vector<9x128xbf16>
    %c2_96 = arith.constant 2 : index
    %c0_97 = arith.constant 0 : index
    %c0_98 = arith.constant 0 : index
    %c0_99 = arith.constant 0 : index
    %113 = vector.load %arg4[%c2_96, %c0_97, %c0_98, %c0_99] : memref<6x3x128x128xbf16, #tpu.memory_space<vmem>>, vector<1x1x128x128xbf16>
    %114 = vector.shape_cast %113 : vector<1x1x128x128xbf16> to vector<128x128xbf16>
    %cst_100 = arith.constant dense<0.000000e+00> : vector<9x128xf32>
    %115 = tpu.matmul %112, %114, %cst_100 {dimension_numbers = #tpu.dot_dimension_numbers<[1], [0], [0], [1], [0, 0, 1, 1], [], []>} : vector<9x128xbf16>, vector<128x128xbf16>, vector<9x128xf32> -> vector<9x128xf32>
    %c8_101 = arith.constant 8 : index
    %c0_102 = arith.constant 0 : index
    %116 = tpu.strided_load %arg12[%c8_101, %c0_102] {strides = array<i32: 2, 1>} : memref<33x128xf32, #tpu.memory_space<vmem>>, vector<9x128xf32>
    %117 = arith.truncf %116 : vector<9x128xf32> to vector<9x128xbf16>
    %c2_103 = arith.constant 2 : index
    %c1_104 = arith.constant 1 : index
    %c0_105 = arith.constant 0 : index
    %c0_106 = arith.constant 0 : index
    %118 = vector.load %arg4[%c2_103, %c1_104, %c0_105, %c0_106] : memref<6x3x128x128xbf16, #tpu.memory_space<vmem>>, vector<1x1x128x128xbf16>
    %119 = vector.shape_cast %118 : vector<1x1x128x128xbf16> to vector<128x128xbf16>
    %cst_107 = arith.constant dense<0.000000e+00> : vector<9x128xf32>
    %120 = tpu.matmul %117, %119, %cst_107 {dimension_numbers = #tpu.dot_dimension_numbers<[1], [0], [0], [1], [0, 0, 1, 1], [], []>} : vector<9x128xbf16>, vector<128x128xbf16>, vector<9x128xf32> -> vector<9x128xf32>
    %121 = arith.addf %115, %120 : vector<9x128xf32>
    %c9_108 = arith.constant 9 : index
    %c0_109 = arith.constant 0 : index
    %122 = tpu.strided_load %arg12[%c9_108, %c0_109] {strides = array<i32: 2, 1>} : memref<33x128xf32, #tpu.memory_space<vmem>>, vector<9x128xf32>
    %123 = arith.truncf %122 : vector<9x128xf32> to vector<9x128xbf16>
    %c2_110 = arith.constant 2 : index
    %c2_111 = arith.constant 2 : index
    %c0_112 = arith.constant 0 : index
    %c0_113 = arith.constant 0 : index
    %124 = vector.load %arg4[%c2_110, %c2_111, %c0_112, %c0_113] : memref<6x3x128x128xbf16, #tpu.memory_space<vmem>>, vector<1x1x128x128xbf16>
    %125 = vector.shape_cast %124 : vector<1x1x128x128xbf16> to vector<128x128xbf16>
    %cst_114 = arith.constant dense<0.000000e+00> : vector<9x128xf32>
    %126 = tpu.matmul %123, %125, %cst_114 {dimension_numbers = #tpu.dot_dimension_numbers<[1], [0], [0], [1], [0, 0, 1, 1], [], []>} : vector<9x128xbf16>, vector<128x128xbf16>, vector<9x128xf32> -> vector<9x128xf32>
    %127 = arith.addf %121, %126 : vector<9x128xf32>
    %c2_115 = arith.constant 2 : index
    %c0_116 = arith.constant 0 : index
    %c0_117 = arith.constant 0 : index
    %128 = vector.load %arg5[%c2_115, %c0_116, %c0_117] : memref<6x1x128xf32, #tpu.memory_space<vmem>>, vector<1x1x128xf32>
    %129 = vector.shape_cast %128 : vector<1x1x128xf32> to vector<1x128xf32>
    %130 = vector.broadcast %129 : vector<1x128xf32> to vector<9x128xf32>
    %131 = arith.addf %127, %130 : vector<9x128xf32>
    %cst_118 = arith.constant 0.000000e+00 : f32
    %132 = vector.broadcast %cst_118 : f32 to vector<9x128xf32>
    %133 = arith.cmpf oge, %131, %132 : vector<9x128xf32>
    %cst_119 = arith.constant 2.000000e-01 : f32
    %134 = vector.broadcast %cst_119 : f32 to vector<9x128xf32>
    %135 = arith.mulf %134, %131 : vector<9x128xf32>
    %136 = arith.select %133, %131, %135 : vector<9x128xi1>, vector<9x128xf32>
    %c8_120 = arith.constant 8 : index
    %c0_121 = arith.constant 0 : index
    %137 = vector.load %arg13[%c8_120, %c0_121] : memref<25x128xf32, #tpu.memory_space<vmem>>, vector<9x128xf32>
    tpu.vector_store %arg13[%c8_120, %c0_121], %136 {strides = array<i32>} : memref<25x128xf32, #tpu.memory_space<vmem>>, vector<9x128xf32>,
    %c7_122 = arith.constant 7 : index
    %c0_123 = arith.constant 0 : index
    %138 = vector.load %arg13[%c7_122, %c0_123] : memref<25x128xf32, #tpu.memory_space<vmem>>, vector<9x128xf32>
    %139 = arith.truncf %138 : vector<9x128xf32> to vector<9x128xbf16>
    %c3 = arith.constant 3 : index
    %c0_124 = arith.constant 0 : index
    %c0_125 = arith.constant 0 : index
    %c0_126 = arith.constant 0 : index
    %140 = vector.load %arg4[%c3, %c0_124, %c0_125, %c0_126] : memref<6x3x128x128xbf16, #tpu.memory_space<vmem>>, vector<1x1x128x128xbf16>
    %141 = vector.shape_cast %140 : vector<1x1x128x128xbf16> to vector<128x128xbf16>
    %cst_127 = arith.constant dense<0.000000e+00> : vector<9x128xf32>
    %142 = tpu.matmul %139, %141, %cst_127 {dimension_numbers = #tpu.dot_dimension_numbers<[1], [0], [0], [1], [0, 0, 1, 1], [], []>} : vector<9x128xbf16>, vector<128x128xbf16>, vector<9x128xf32> -> vector<9x128xf32>
    %c8_128 = arith.constant 8 : index
    %c0_129 = arith.constant 0 : index
    %143 = vector.load %arg13[%c8_128, %c0_129] : memref<25x128xf32, #tpu.memory_space<vmem>>, vector<9x128xf32>
    %144 = arith.truncf %143 : vector<9x128xf32> to vector<9x128xbf16>
    %c3_130 = arith.constant 3 : index
    %c1_131 = arith.constant 1 : index
    %c0_132 = arith.constant 0 : index
    %c0_133 = arith.constant 0 : index
    %145 = vector.load %arg4[%c3_130, %c1_131, %c0_132, %c0_133] : memref<6x3x128x128xbf16, #tpu.memory_space<vmem>>, vector<1x1x128x128xbf16>
    %146 = vector.shape_cast %145 : vector<1x1x128x128xbf16> to vector<128x128xbf16>
    %cst_134 = arith.constant dense<0.000000e+00> : vector<9x128xf32>
    %147 = tpu.matmul %144, %146, %cst_134 {dimension_numbers = #tpu.dot_dimension_numbers<[1], [0], [0], [1], [0, 0, 1, 1], [], []>} : vector<9x128xbf16>, vector<128x128xbf16>, vector<9x128xf32> -> vector<9x128xf32>
    %148 = arith.addf %142, %147 : vector<9x128xf32>
    %c9_135 = arith.constant 9 : index
    %c0_136 = arith.constant 0 : index
    %149 = vector.load %arg13[%c9_135, %c0_136] : memref<25x128xf32, #tpu.memory_space<vmem>>, vector<9x128xf32>
    %150 = arith.truncf %149 : vector<9x128xf32> to vector<9x128xbf16>
    %c3_137 = arith.constant 3 : index
    %c2_138 = arith.constant 2 : index
    %c0_139 = arith.constant 0 : index
    %c0_140 = arith.constant 0 : index
    %151 = vector.load %arg4[%c3_137, %c2_138, %c0_139, %c0_140] : memref<6x3x128x128xbf16, #tpu.memory_space<vmem>>, vector<1x1x128x128xbf16>
    %152 = vector.shape_cast %151 : vector<1x1x128x128xbf16> to vector<128x128xbf16>
    %cst_141 = arith.constant dense<0.000000e+00> : vector<9x128xf32>
    %153 = tpu.matmul %150, %152, %cst_141 {dimension_numbers = #tpu.dot_dimension_numbers<[1], [0], [0], [1], [0, 0, 1, 1], [], []>} : vector<9x128xbf16>, vector<128x128xbf16>, vector<9x128xf32> -> vector<9x128xf32>
    %154 = arith.addf %148, %153 : vector<9x128xf32>
    %c3_142 = arith.constant 3 : index
    %c0_143 = arith.constant 0 : index
    %c0_144 = arith.constant 0 : index
    %155 = vector.load %arg5[%c3_142, %c0_143, %c0_144] : memref<6x1x128xf32, #tpu.memory_space<vmem>>, vector<1x1x128xf32>
    %156 = vector.shape_cast %155 : vector<1x1x128xf32> to vector<1x128xf32>
    %157 = vector.broadcast %156 : vector<1x128xf32> to vector<9x128xf32>
    %158 = arith.addf %154, %157 : vector<9x128xf32>
    %cst_145 = arith.constant 0.000000e+00 : f32
    %159 = vector.broadcast %cst_145 : f32 to vector<9x128xf32>
    %160 = arith.cmpf oge, %158, %159 : vector<9x128xf32>
    %cst_146 = arith.constant 2.000000e-01 : f32
    %161 = vector.broadcast %cst_146 : f32 to vector<9x128xf32>
    %162 = arith.mulf %161, %158 : vector<9x128xf32>
    %163 = arith.select %160, %158, %162 : vector<9x128xi1>, vector<9x128xf32>
    %164 = arith.truncf %163 : vector<9x128xf32> to vector<9x128xbf16>
    %c0_147 = arith.constant 0 : index
    %c0_148 = arith.constant 0 : index
    %165 = vector.load %arg6[%c0_147, %c0_148] : memref<128x128xbf16, #tpu.memory_space<vmem>>, vector<128x128xbf16>
    %cst_149 = arith.constant dense<0.000000e+00> : vector<9x128xf32>
    %166 = tpu.matmul %164, %165, %cst_149 {dimension_numbers = #tpu.dot_dimension_numbers<[1], [0], [0], [1], [0, 0, 1, 1], [], []>} : vector<9x128xbf16>, vector<128x128xbf16>, vector<9x128xf32> -> vector<9x128xf32>
    %c0_150 = arith.constant 0 : index
    %c0_151 = arith.constant 0 : index
    %167 = vector.load %arg7[%c0_150, %c0_151] : memref<1x128xf32, #tpu.memory_space<vmem>>, vector<1x128xf32>
    %168 = vector.broadcast %167 : vector<1x128xf32> to vector<9x128xf32>
    %169 = arith.addf %166, %168 : vector<9x128xf32>
    %c0_152 = arith.constant 0 : index
    %c0_153 = arith.constant 0 : index
    %c0_154 = arith.constant 0 : index
    %170 = vector.load %arg9[%c0_152, %c0_153, %c0_154] : memref<1x9x128xf32, #tpu.memory_space<vmem>>, vector<1x9x128xf32>
    %171 = vector.shape_cast %170 : vector<1x9x128xf32> to vector<9x128xf32>
    %172 = vector.shape_cast %169 : vector<9x128xf32> to vector<1x9x128xf32>
    tpu.vector_store %arg9[%c0_152, %c0_153, %c0_154], %172 {strides = array<i32>} : memref<1x9x128xf32, #tpu.memory_space<vmem>>, vector<1x9x128xf32>,
    %c7_155 = arith.constant 7 : index
    %c0_156 = arith.constant 0 : index
    %173 = tpu.strided_load %arg13[%c7_155, %c0_156] {strides = array<i32: 2, 1>} : memref<25x128xf32, #tpu.memory_space<vmem>>, vector<5x128xf32>
    %174 = arith.truncf %173 : vector<5x128xf32> to vector<5x128xbf16>
    %c4 = arith.constant 4 : index
    %c0_157 = arith.constant 0 : index
    %c0_158 = arith.constant 0 : index
    %c0_159 = arith.constant 0 : index
    %175 = vector.load %arg4[%c4, %c0_157, %c0_158, %c0_159] : memref<6x3x128x128xbf16, #tpu.memory_space<vmem>>, vector<1x1x128x128xbf16>
    %176 = vector.shape_cast %175 : vector<1x1x128x128xbf16> to vector<128x128xbf16>
    %cst_160 = arith.constant dense<0.000000e+00> : vector<5x128xf32>
    %177 = tpu.matmul %174, %176, %cst_160 {dimension_numbers = #tpu.dot_dimension_numbers<[1], [0], [0], [1], [0, 0, 1, 1], [], []>} : vector<5x128xbf16>, vector<128x128xbf16>, vector<5x128xf32> -> vector<5x128xf32>
    %c8_161 = arith.constant 8 : index
    %c0_162 = arith.constant 0 : index
    %178 = tpu.strided_load %arg13[%c8_161, %c0_162] {strides = array<i32: 2, 1>} : memref<25x128xf32, #tpu.memory_space<vmem>>, vector<5x128xf32>
    %179 = arith.truncf %178 : vector<5x128xf32> to vector<5x128xbf16>
    %c4_163 = arith.constant 4 : index
    %c1_164 = arith.constant 1 : index
    %c0_165 = arith.constant 0 : index
    %c0_166 = arith.constant 0 : index
    %180 = vector.load %arg4[%c4_163, %c1_164, %c0_165, %c0_166] : memref<6x3x128x128xbf16, #tpu.memory_space<vmem>>, vector<1x1x128x128xbf16>
    %181 = vector.shape_cast %180 : vector<1x1x128x128xbf16> to vector<128x128xbf16>
    %cst_167 = arith.constant dense<0.000000e+00> : vector<5x128xf32>
    %182 = tpu.matmul %179, %181, %cst_167 {dimension_numbers = #tpu.dot_dimension_numbers<[1], [0], [0], [1], [0, 0, 1, 1], [], []>} : vector<5x128xbf16>, vector<128x128xbf16>, vector<5x128xf32> -> vector<5x128xf32>
    %183 = arith.addf %177, %182 : vector<5x128xf32>
    %c9_168 = arith.constant 9 : index
    %c0_169 = arith.constant 0 : index
    %184 = tpu.strided_load %arg13[%c9_168, %c0_169] {strides = array<i32: 2, 1>} : memref<25x128xf32, #tpu.memory_space<vmem>>, vector<5x128xf32>
    %185 = arith.truncf %184 : vector<5x128xf32> to vector<5x128xbf16>
    %c4_170 = arith.constant 4 : index
    %c2_171 = arith.constant 2 : index
    %c0_172 = arith.constant 0 : index
    %c0_173 = arith.constant 0 : index
    %186 = vector.load %arg4[%c4_170, %c2_171, %c0_172, %c0_173] : memref<6x3x128x128xbf16, #tpu.memory_space<vmem>>, vector<1x1x128x128xbf16>
    %187 = vector.shape_cast %186 : vector<1x1x128x128xbf16> to vector<128x128xbf16>
    %cst_174 = arith.constant dense<0.000000e+00> : vector<5x128xf32>
    %188 = tpu.matmul %185, %187, %cst_174 {dimension_numbers = #tpu.dot_dimension_numbers<[1], [0], [0], [1], [0, 0, 1, 1], [], []>} : vector<5x128xbf16>, vector<128x128xbf16>, vector<5x128xf32> -> vector<5x128xf32>
    %189 = arith.addf %183, %188 : vector<5x128xf32>
    %c4_175 = arith.constant 4 : index
    %c0_176 = arith.constant 0 : index
    %c0_177 = arith.constant 0 : index
    %190 = vector.load %arg5[%c4_175, %c0_176, %c0_177] : memref<6x1x128xf32, #tpu.memory_space<vmem>>, vector<1x1x128xf32>
    %191 = vector.shape_cast %190 : vector<1x1x128xf32> to vector<1x128xf32>
    %192 = vector.broadcast %191 : vector<1x128xf32> to vector<5x128xf32>
    %193 = arith.addf %189, %192 : vector<5x128xf32>
    %cst_178 = arith.constant 0.000000e+00 : f32
    %194 = vector.broadcast %cst_178 : f32 to vector<5x128xf32>
    %195 = arith.cmpf oge, %193, %194 : vector<5x128xf32>
    %cst_179 = arith.constant 2.000000e-01 : f32
    %196 = vector.broadcast %cst_179 : f32 to vector<5x128xf32>
    %197 = arith.mulf %196, %193 : vector<5x128xf32>
    %198 = arith.select %195, %193, %197 : vector<5x128xi1>, vector<5x128xf32>
    %c8_180 = arith.constant 8 : index
    %c0_181 = arith.constant 0 : index
    %199 = vector.load %arg14[%c8_180, %c0_181] : memref<21x128xf32, #tpu.memory_space<vmem>>, vector<5x128xf32>
    tpu.vector_store %arg14[%c8_180, %c0_181], %198 {strides = array<i32>} : memref<21x128xf32, #tpu.memory_space<vmem>>, vector<5x128xf32>,
    %c7_182 = arith.constant 7 : index
    %c0_183 = arith.constant 0 : index
    %200 = vector.load %arg14[%c7_182, %c0_183] : memref<21x128xf32, #tpu.memory_space<vmem>>, vector<5x128xf32>
    %201 = arith.truncf %200 : vector<5x128xf32> to vector<5x128xbf16>
    %c5 = arith.constant 5 : index
    %c0_184 = arith.constant 0 : index
    %c0_185 = arith.constant 0 : index
    %c0_186 = arith.constant 0 : index
    %202 = vector.load %arg4[%c5, %c0_184, %c0_185, %c0_186] : memref<6x3x128x128xbf16, #tpu.memory_space<vmem>>, vector<1x1x128x128xbf16>
    %203 = vector.shape_cast %202 : vector<1x1x128x128xbf16> to vector<128x128xbf16>
    %cst_187 = arith.constant dense<0.000000e+00> : vector<5x128xf32>
    %204 = tpu.matmul %201, %203, %cst_187 {dimension_numbers = #tpu.dot_dimension_numbers<[1], [0], [0], [1], [0, 0, 1, 1], [], []>} : vector<5x128xbf16>, vector<128x128xbf16>, vector<5x128xf32> -> vector<5x128xf32>
    %c8_188 = arith.constant 8 : index
    %c0_189 = arith.constant 0 : index
    %205 = vector.load %arg14[%c8_188, %c0_189] : memref<21x128xf32, #tpu.memory_space<vmem>>, vector<5x128xf32>
    %206 = arith.truncf %205 : vector<5x128xf32> to vector<5x128xbf16>
    %c5_190 = arith.constant 5 : index
    %c1_191 = arith.constant 1 : index
    %c0_192 = arith.constant 0 : index
    %c0_193 = arith.constant 0 : index
    %207 = vector.load %arg4[%c5_190, %c1_191, %c0_192, %c0_193] : memref<6x3x128x128xbf16, #tpu.memory_space<vmem>>, vector<1x1x128x128xbf16>
    %208 = vector.shape_cast %207 : vector<1x1x128x128xbf16> to vector<128x128xbf16>
    %cst_194 = arith.constant dense<0.000000e+00> : vector<5x128xf32>
    %209 = tpu.matmul %206, %208, %cst_194 {dimension_numbers = #tpu.dot_dimension_numbers<[1], [0], [0], [1], [0, 0, 1, 1], [], []>} : vector<5x128xbf16>, vector<128x128xbf16>, vector<5x128xf32> -> vector<5x128xf32>
    %210 = arith.addf %204, %209 : vector<5x128xf32>
    %c9_195 = arith.constant 9 : index
    %c0_196 = arith.constant 0 : index
    %211 = vector.load %arg14[%c9_195, %c0_196] : memref<21x128xf32, #tpu.memory_space<vmem>>, vector<5x128xf32>
    %212 = arith.truncf %211 : vector<5x128xf32> to vector<5x128xbf16>
    %c5_197 = arith.constant 5 : index
    %c2_198 = arith.constant 2 : index
    %c0_199 = arith.constant 0 : index
    %c0_200 = arith.constant 0 : index
    %213 = vector.load %arg4[%c5_197, %c2_198, %c0_199, %c0_200] : memref<6x3x128x128xbf16, #tpu.memory_space<vmem>>, vector<1x1x128x128xbf16>
    %214 = vector.shape_cast %213 : vector<1x1x128x128xbf16> to vector<128x128xbf16>
    %cst_201 = arith.constant dense<0.000000e+00> : vector<5x128xf32>
    %215 = tpu.matmul %212, %214, %cst_201 {dimension_numbers = #tpu.dot_dimension_numbers<[1], [0], [0], [1], [0, 0, 1, 1], [], []>} : vector<5x128xbf16>, vector<128x128xbf16>, vector<5x128xf32> -> vector<5x128xf32>
    %216 = arith.addf %210, %215 : vector<5x128xf32>
    %c5_202 = arith.constant 5 : index
    %c0_203 = arith.constant 0 : index
    %c0_204 = arith.constant 0 : index
    %217 = vector.load %arg5[%c5_202, %c0_203, %c0_204] : memref<6x1x128xf32, #tpu.memory_space<vmem>>, vector<1x1x128xf32>
    %218 = vector.shape_cast %217 : vector<1x1x128xf32> to vector<1x128xf32>
    %219 = vector.broadcast %218 : vector<1x128xf32> to vector<5x128xf32>
    %220 = arith.addf %216, %219 : vector<5x128xf32>
    %cst_205 = arith.constant 0.000000e+00 : f32
    %221 = vector.broadcast %cst_205 : f32 to vector<5x128xf32>
    %222 = arith.cmpf oge, %220, %221 : vector<5x128xf32>
    %cst_206 = arith.constant 2.000000e-01 : f32
    %223 = vector.broadcast %cst_206 : f32 to vector<5x128xf32>
    %224 = arith.mulf %223, %220 : vector<5x128xf32>
    %225 = arith.select %222, %220, %224 : vector<5x128xi1>, vector<5x128xf32>
    %226 = arith.truncf %225 : vector<5x128xf32> to vector<5x128xbf16>
    %c0_207 = arith.constant 0 : index
    %c0_208 = arith.constant 0 : index
    %227 = vector.load %arg6[%c0_207, %c0_208] : memref<128x128xbf16, #tpu.memory_space<vmem>>, vector<128x128xbf16>
    %cst_209 = arith.constant dense<0.000000e+00> : vector<5x128xf32>
    %228 = tpu.matmul %226, %227, %cst_209 {dimension_numbers = #tpu.dot_dimension_numbers<[1], [0], [0], [1], [0, 0, 1, 1], [], []>} : vector<5x128xbf16>, vector<128x128xbf16>, vector<5x128xf32> -> vector<5x128xf32>
    %c0_210 = arith.constant 0 : index
    %c0_211 = arith.constant 0 : index
    %229 = vector.load %arg7[%c0_210, %c0_211] : memref<1x128xf32, #tpu.memory_space<vmem>>, vector<1x128xf32>
    %230 = vector.broadcast %229 : vector<1x128xf32> to vector<5x128xf32>
    %231 = arith.addf %228, %230 : vector<5x128xf32>
    %c0_212 = arith.constant 0 : index
    %c0_213 = arith.constant 0 : index
    %c0_214 = arith.constant 0 : index
    %232 = vector.load %arg10[%c0_212, %c0_213, %c0_214] : memref<1x5x128xf32, #tpu.memory_space<vmem>>, vector<1x5x128xf32>
    %233 = vector.shape_cast %232 : vector<1x5x128xf32> to vector<5x128xf32>
    %234 = vector.shape_cast %231 : vector<5x128xf32> to vector<1x5x128xf32>
    tpu.vector_store %arg10[%c0_212, %c0_213, %c0_214], %234 {strides = array<i32>} : memref<1x5x128xf32, #tpu.memory_space<vmem>>, vector<1x5x128xf32>,
    return
  }
  func.func @transform_0(%arg0: i32) -> (i32, i32, i32) {
    %c0_i32 = arith.constant 0 : i32
    %c0_i32_0 = arith.constant 0 : i32
    %c0_i32_1 = arith.constant 0 : i32
    return %arg0, %c0_i32, %c0_i32_0 : i32, i32, i32
  }
  func.func @transform_1(%arg0: i32) -> (i32, i32, i32) {
    %c0_i32 = arith.constant 0 : i32
    %c0_i32_0 = arith.constant 0 : i32
    %c0_i32_1 = arith.constant 0 : i32
    %c0_i32_2 = arith.constant 0 : i32
    return %c0_i32, %c0_i32_0, %c0_i32_1 : i32, i32, i32
  }
  func.func @transform_2(%arg0: i32) -> (i32, i32) {
    %c0_i32 = arith.constant 0 : i32
    %c0_i32_0 = arith.constant 0 : i32
    %c0_i32_1 = arith.constant 0 : i32
    return %c0_i32, %c0_i32_0 : i32, i32
  }
  func.func @transform_3(%arg0: i32) -> (i32, i32, i32, i32) {
    %c0_i32 = arith.constant 0 : i32
    %c0_i32_0 = arith.constant 0 : i32
    %c0_i32_1 = arith.constant 0 : i32
    %c0_i32_2 = arith.constant 0 : i32
    %c0_i32_3 = arith.constant 0 : i32
    return %c0_i32, %c0_i32_0, %c0_i32_1, %c0_i32_2 : i32, i32, i32, i32
  }
  func.func @transform_4(%arg0: i32) -> (i32, i32, i32) {
    %c0_i32 = arith.constant 0 : i32
    %c0_i32_0 = arith.constant 0 : i32
    %c0_i32_1 = arith.constant 0 : i32
    %c0_i32_2 = arith.constant 0 : i32
    return %c0_i32, %c0_i32_0, %c0_i32_1 : i32, i32, i32
  }
  func.func @transform_5(%arg0: i32) -> (i32, i32) {
    %c0_i32 = arith.constant 0 : i32
    %c0_i32_0 = arith.constant 0 : i32
    %c0_i32_1 = arith.constant 0 : i32
    return %c0_i32, %c0_i32_0 : i32, i32
  }
  func.func @transform_6(%arg0: i32) -> (i32, i32) {
    %c0_i32 = arith.constant 0 : i32
    %c0_i32_0 = arith.constant 0 : i32
    %c0_i32_1 = arith.constant 0 : i32
    return %c0_i32, %c0_i32_0 : i32, i32
  }
  func.func @transform_7(%arg0: i32) -> (i32, i32, i32) {
    %c0_i32 = arith.constant 0 : i32
    %c0_i32_0 = arith.constant 0 : i32
    %c0_i32_1 = arith.constant 0 : i32
    return %arg0, %c0_i32, %c0_i32_0 : i32, i32, i32
  }
  func.func @transform_8(%arg0: i32) -> (i32, i32, i32) {
    %c0_i32 = arith.constant 0 : i32
    %c0_i32_0 = arith.constant 0 : i32
    %c0_i32_1 = arith.constant 0 : i32
    return %arg0, %c0_i32, %c0_i32_0 : i32, i32, i32
  }
  func.func @transform_9(%arg0: i32) -> (i32, i32, i32) {
    %c0_i32 = arith.constant 0 : i32
    %c0_i32_0 = arith.constant 0 : i32
    %c0_i32_1 = arith.constant 0 : i32
    return %arg0, %c0_i32, %c0_i32_0 : i32, i32, i32
  }
}

</mosaic_0001>

<bundles_post_ra>
// kernel: _lambda_.1
= control target key start
LH: loop header
LB: loop body
LE: loop exit
PB: predicated region body
PF: predicated region fallthrough
CT: control target
= control target key end

     0   :  { %s12043_s30 = smov 0   ;;  %s15019_s0 = inlined_call_operand.vmem [shape: bf16[2,18,512], index: 0, kind: input, shape index: {}]   ;;  %s15020_s1 = inlined_call_operand.vmem [shape: bf16[2,512,1280], index: 1, kind: input, shape index: {}]   ;;  %s15021_s2 = inlined_call_operand.vmem [shape: bf16[640,128], index: 2, kind: input, shape index: {}]   ;;  %s15022_s3 = inlined_call_operand.vmem [shape: bf16[6,3,128,128], index: 3, kind: input, shape index: {}]   ;;  %s15023_s4 = inlined_call_operand.vmem [shape: f32[6,1,128], index: 4, kind: input, shape index: {}]   ;;  %s15024_s5 = inlined_call_operand.vmem [shape: bf16[128,128], index: 5, kind: input, shape index: {}]   ;;  %s15025_s6 = inlined_call_operand.vmem [shape: f32[1,128], index: 6, kind: input, shape index: {}]   ;;  %s15026_s7 = inlined_call_operand.vmem [shape: f32[2,17,128], index: 7, kind: output, shape index: {0}]   ;;  %s15027_s8 = inlined_call_operand.vmem [shape: f32[2,9,128], index: 8, kind: output, shape index: {1}]   ;;  %s15028_s9 = inlined_call_operand.vmem [shape: f32[2,5,128], index: 9, kind: output, shape index: {2}]  }
   0x1 LB: > { %s8482_s10 = sadd.s32 4294967295, %s11989_s30   ;;  %p8486_p0 = scmp.ge.s32.totalorder %s11989_s30, 1  ;;  %s11989_s30 = sphi %s12043_s30, %s20_s30  }
   0x2   : > { %p292_p1 = scmp.lt.s32.totalorder %s11989_s30, 3 }
   0x4   : > { %p293_p2 = pnand %p8486_p0, %p292_p1 }
   0x5   : > { %v10791_v0 = vld [vmem:[%s15020_s1 + $0xa04] ss:$40 sps:$4 sm:$0xff] (!%p293_p2)   ;;  %v10795_v2 = vld [vmem:[%s15020_s1 + $0xa00] ss:$40 sps:$4 sm:$0xff] (!%p293_p2)   ;;  %v10797_v4 = vld [vmem:[%s15020_s1 + $0xa54] ss:$40 sps:$4 sm:$0xff] (!%p293_p2)  }
   0x6   : > { %296 = sbr.rel (%p293_p2) target bundleno = 3113 (0xc29), region = 48  ;;  %v10793_v1 = vld [vmem:[%s15020_s1 + $0xa0c] ss:$40 sps:$4 sm:$0xff] (!%p293_p2)   ;;  %2703 = vmatprep.subr.bf16.mxu0 (!%p293_p2), %v10791_v0  ;;  %v10796_v3 = vld [vmem:[%s15020_s1 + $0xa08] ss:$40 sps:$4 sm:$0xff] (!%p293_p2)   ;;  %p337_p3 = scmp.lt.s32.totalorder (!%p293_p2), %s8482_s10, 1 }
   0x7   : > { %2805 = vmatprep.subr.bf16.mxu1 (!%p293_p2), %v10793_v1  ;;  %2704 = vmatpush1.bf16.msra.mxu0 (!%p293_p2), %v10795_v2  ;;  %v10799_v5 = vld [vmem:[%s15020_s1 + $0xa5c] ss:$40 sps:$4 sm:$0xff] (!%p293_p2)   ;;  %v10801_v6 = vld [vmem:[%s15020_s1 + $0xa50] ss:$40 sps:$4 sm:$0xff] (!%p293_p2)   ;;  %v10805_v9 = vld [vmem:[%s15020_s1 + $0xaac] ss:$40 sps:$4 sm:$0xff] (!%p293_p2)  }
   0x8   : > { %2806 = vmatpush1.bf16.msra.mxu1 (!%p293_p2), %v10796_v3  ;;  %2705 = vmatprep.subr.bf16.mxu0 (!%p293_p2), %v10797_v4  ;;  %v10802_v7 = vld [vmem:[%s15020_s1 + $0xa58] ss:$40 sps:$4 sm:$0xff] (!%p293_p2)   ;;  %v10803_v8 = vld [vmem:[%s15020_s1 + $0xaa4] ss:$40 sps:$4 sm:$0xff] (!%p293_p2)   ;;  %v10808_v11 = vld [vmem:[%s15020_s1 + $0xaa8] ss:$40 sps:$4 sm:$0xff] (!%p293_p2)  }
   0x9   : > { %2807 = vmatprep.subr.bf16.mxu1 (!%p293_p2), %v10799_v5  ;;  %v10807_v10 = vld [vmem:[%s15020_s1 + $0xaa0] ss:$40 sps:$4 sm:$0xff] (!%p293_p2)   ;;  %v10809_v12 = vld [vmem:[%s15020_s1 + $0xaf4] ss:$40 sps:$4 sm:$0xff] (!%p293_p2)   ;;  %v10813_v14 = vld [vmem:[%s15020_s1 + $0xaf0] ss:$40 sps:$4 sm:$0xff] (!%p293_p2)  }
   0xa   : > { %v10811_v13 = vld [vmem:[%s15020_s1 + $0xafc] ss:$40 sps:$4 sm:$0xff] (!%p293_p2)   ;;  %v10814_v15 = vld [vmem:[%s15020_s1 + $0xaf8] ss:$40 sps:$4 sm:$0xff] (!%p293_p2)   ;;  %v10817_v17 = vld [vmem:[%s15020_s1 + $0xb4c] ss:$40 sps:$4 sm:$0xff] (!%p293_p2)  }
   0xb   : > { %2706 = vmatpush1.bf16.msra.mxu0 (!%p293_p2), %v10801_v6  ;;  %v10815_v16 = vld [vmem:[%s15020_s1 + $0xb44] ss:$40 sps:$4 sm:$0xff] (!%p293_p2)   ;;  %v10819_v18 = vld [vmem:[%s15020_s1 + $0xb40] ss:$40 sps:$4 sm:$0xff] (!%p293_p2)   ;;  %v10821_v20 = vld [vmem:[%s15020_s1 + $0xb94] ss:$40 sps:$4 sm:$0xff] (!%p293_p2)  }
   0xc   : > { %2808 = vmatpush1.bf16.msra.mxu1 (!%p293_p2), %v10802_v7  ;;  %2707 = vmatprep.subr.bf16.mxu0 (!%p293_p2), %v10803_v8  ;;  %v10820_v19 = vld [vmem:[%s15020_s1 + $0xb48] ss:$40 sps:$4 sm:$0xff] (!%p293_p2)   ;;  %v10823_v21 = vld [vmem:[%s15020_s1 + $0xb9c] ss:$40 sps:$4 sm:$0xff] (!%p293_p2)   ;;  %v10826_v23 = vld [vmem:[%s15020_s1 + $0xb98] ss:$40 sps:$4 sm:$0xff] (!%p293_p2)  }
   0xd   : > { %2809 = vmatprep.subr.bf16.mxu1 %v10805_v9  ;;  %v10825_v22 = vld [vmem:[%s15020_s1 + $0xb90] ss:$40 sps:$4 sm:$0xff]   ;;  %v10827_v24 = vld [vmem:[%s15020_s1 + $0xbe4] ss:$40 sps:$4 sm:$0xff]   ;;  %v10831_v26 = vld [vmem:[%s15020_s1 + $0xbe0] ss:$40 sps:$4 sm:$0xff]  }
   0xe   : > { %v10829_v25 = vld [vmem:[%s15020_s1 + $0xbec] ss:$40 sps:$4 sm:$0xff]   ;;  %v10832_v27 = vld [vmem:[%s15020_s1 + $0xbe8] ss:$40 sps:$4 sm:$0xff]   ;;  %v10835_v29 = vld [vmem:[%s15020_s1 + $0xc3c] ss:$40 sps:$4 sm:$0xff]  }
   0xf   : > { %2708 = vmatpush1.bf16.msra.mxu0 %v10807_v10  ;;  %v10833_v28 = vld [vmem:[%s15020_s1 + $0xc34] ss:$40 sps:$4 sm:$0xff]   ;;  %v10837_v30 = vld [vmem:[%s15020_s1 + $0xc30] ss:$40 sps:$4 sm:$0xff]   ;;  %v10839_v32 = vld [vmem:[%s15020_s1 + $0xc84] ss:$40 sps:$4 sm:$0xff]  }
  0x10   : > { %2810 = vmatpush1.bf16.msra.mxu1 %v10808_v11  ;;  %2709 = vmatprep.subr.bf16.mxu0 %v10809_v12  ;;  %v10838_v31 = vld [vmem:[%s15020_s1 + $0xc38] ss:$40 sps:$4 sm:$0xff]   ;;  %v10841_v33 = vld [vmem:[%s15020_s1 + $0xc8c] ss:$40 sps:$4 sm:$0xff]   ;;  %v10844_v35 = vld [vmem:[%s15020_s1 + $0xc88] ss:$40 sps:$4 sm:$0xff]  }
  0x11   : > { %2811 = vmatprep.subr.bf16.mxu1 %v10811_v13  ;;  %v10843_v34 = vld [vmem:[%s15020_s1 + $0xc80] ss:$40 sps:$4 sm:$0xff]   ;;  %v10845_v36 = vld [vmem:[%s15020_s1 + $0xcd4] ss:$40 sps:$4 sm:$0xff]   ;;  %s15030_s10 = smov (!%p337_p3, %s8482_s10), 1  ;;  %vm5851_vm1 = vcmask 1040384  }
  0x12   : > { %v10847_v37 = vld [vmem:[%s15020_s1 + $0xcdc] ss:$40 sps:$4 sm:$0xff]   ;;  %v10849_v38 = vld [vmem:[%s15020_s1 + $0xcd0] ss:$40 sps:$4 sm:$0xff]   ;;  %s10779_s17 = smul.u32 48, %s15030_s10  ;;  %vm11992_vm5 = vmmov 0  }
  0x13   : > { %2710 = vmatpush1.bf16.msra.mxu0 %v10813_v14  ;;  %v10850_v39 = vld [vmem:[%s15020_s1 + $0xcd8] ss:$40 sps:$4 sm:$0xff]   ;;  %v10851_v40 = vld [vmem:[%s15020_s1 + $0xd24] ss:$40 sps:$4 sm:$0xff]   ;;  %v10856_v43 = vld [vmem:[%s15020_s1 + $0xd28] ss:$40 sps:$4 sm:$0xff]  }
  0x14   : > { %2812 = vmatpush1.bf16.msra.mxu1 %v10814_v15  ;;  %2711 = vmatprep.subr.bf16.mxu0 %v10815_v16  ;;  %v10853_v41 = vld [vmem:[%s15020_s1 + $0xd2c] ss:$40 sps:$4 sm:$0xff]   ;;  %v10855_v42 = vld [vmem:[%s15020_s1 + $0xd20] ss:$40 sps:$4 sm:$0xff]   ;;  %s12196_s28 = scalar_lea.vmem %s15019_s0, %s10779_s17  ;;  %v10859_v45 = vld [vmem:[%s15020_s1 + $0xd7c] ss:$40 sps:$4 sm:$0xff]  }
  0x15   : > { %2813 = vmatprep.subr.bf16.mxu1 %v10817_v17  ;;  %v10857_v44 = vld [vmem:[%s15020_s1 + $0xd74] ss:$40 sps:$4 sm:$0xff]   ;;  %v10861_v46 = vld [vmem:[%s15020_s1 + $0xd70] ss:$40 sps:$4 sm:$0xff]   ;;  %v369_v48 = vld [vmem:[%s12196_s28 + $0x20] sm:$0x11] }
  0x16   : > { %v10862_v47 = vld [vmem:[%s15020_s1 + $0xd78] ss:$40 sps:$4 sm:$0xff]   ;;  %v10887_v49 = vld [vmem:[%s12196_s28 + $0x4] ss:$16 sps:$4 sm:$0xff]   ;;  %v12212_v51 = vcombine.high %v369_v48, %v369_v48  ;;  %vm1038_vm0 = vsmask.f32 7424  ;;  %v12243_v4 = vcombine.low %v369_v48, %v369_v48 }
  0x17   : > { %2712 = vmatpush1.bf16.msra.mxu0 %v10819_v18  ;;  %v10863_v50 = vld [vmem:[%s15020_s1 + $0xdc4] ss:$40 sps:$4 sm:$0xff]   ;;  %v1052_v53 = vshrl.u32 %v10887_v49, 16  ;;  %v1054_v54 = vshll.u32 %v10887_v49, 16  ;;  %v10867_v55 = vld [vmem:[%s15020_s1 + $0xdc0] ss:$40 sps:$4 sm:$0xff]  }
  0x18   : > { %2814 = vmatpush1.bf16.msra.mxu1 %v10820_v19  ;;  %2713 = vmatprep.subr.bf16.mxu0 %v10821_v20  ;;  %v10865_v52 = vld [vmem:[%s15020_s1 + $0xdcc] ss:$40 sps:$4 sm:$0xff]   ;;  %v1059_v56 = vshll.u32 %v12212_v51, 16  ;;  %v10868_v57 = vld [vmem:[%s15020_s1 + $0xdc8] ss:$40 sps:$4 sm:$0xff]   ;;  %v1047_v12 = vshll.u32 %v12243_v4, 16 }
  0x19   : > { %2815 = vmatprep.subr.bf16.mxu1 %v10823_v21  ;;  %v1056_v58 = vrot.slane %v1054_v54, 1  ;;  %v10869_v59 = vld [vmem:[%s15020_s1 + $0xe14] ss:$40 sps:$4 sm:$0xff]   ;;  %v10896_v61 = vld [vmem:[%s12196_s28] ss:$16 sps:$4 sm:$0xff]   ;;  %s10780_s20 = smul.u32 24, %s15030_s10 }
  0x1a   : > { %v1061_v60 = vrot.slane %v1059_v56, 1  ;;  %v10871_v62 = vld [vmem:[%s15020_s1 + $0xe1c] ss:$40 sps:$4 sm:$0xff]   ;;  %v10873_v0 = vld [vmem:[%s15020_s1 + $0xe10] ss:$40 sps:$4 sm:$0xff]   ;;  %v1042_v5 = vshll.u32 %v10896_v61, 16 }
  0x1b   : > { %2714 = vmatpush1.bf16.msra.mxu0 %v10825_v22  ;;  %v1057_v63 = vor.u32 %v1056_v58, %v1052_v53  ;;  %v10874_v2 = vld [vmem:[%s15020_s1 + $0xe18] ss:$40 sps:$4 sm:$0xff]   ;;  %v10875_v3 = vld [vmem:[%s15020_s1 + $0xe64] ss:$40 sps:$4 sm:$0xff]   ;;  %v10880_v8 = vld [vmem:[%s15020_s1 + $0xe68] ss:$40 sps:$4 sm:$0xff]   ;;  %s346_s25 = scalar_lea.vmem %s15026_s7, %s10780_s20 }
  0x1c   : > { %2816 = vmatpush1.bf16.msra.mxu1 %v10826_v23  ;;  %2715 = vmatprep.subr.bf16.mxu0 %v10827_v24  ;;  %v10877_v6 = vld [vmem:[%s15020_s1 + $0xe6c] ss:$40 sps:$4 sm:$0xff]   ;;  %v10879_v7 = vld [vmem:[%s15020_s1 + $0xe60] ss:$40 sps:$4 sm:$0xff]   ;;  %v1040_v10 = vshrl.u32 %v10896_v61, 16  ;;  %v1044_v11 = vrot.slane %v1042_v5, 1 }
  0x1d   : > { %2817 = vmatprep.subr.bf16.mxu1 %v10829_v25  ;;  %v12235_v1 = vsel %vm1038_vm0, %v1057_v63, %v1061_v60  ;;  %v10881_v9 = vld [vmem:[%s15020_s1 + $0xeb4] ss:$40 sps:$4 sm:$0xff]   ;;  %v10885_v14 = vld [vmem:[%s15020_s1 + $0xeb0] ss:$40 sps:$4 sm:$0xff]   ;;  %v10892_v16 = vld [vmem:[%s15020_s1 + $0xf04] ss:$40 sps:$4 sm:$0xff]  }
  0x1e   : > { %2735 = vmatprep.mubr.bf16.mxu0 %v12235_v1  ;;  %2837 = vmatprep.mubr.bf16.mxu1 %v12235_v1  ;;  %v10883_v13 = vld [vmem:[%s15020_s1 + $0xebc] ss:$40 sps:$4 sm:$0xff]   ;;  %v10886_v15 = vld [vmem:[%s15020_s1 + $0xeb8] ss:$40 sps:$4 sm:$0xff]   ;;  %v1045_v17 = vor.u32 %v1044_v11, %v1040_v10  ;;  %v1049_v18 = vrot.slane %v1047_v12, 1  ;;  %v12291_v25 = vshrl.u32 %v12212_v51, 16 }
  0x1f   : > { %2716 = vmatpush1.bf16.msra.mxu0 %v10831_v26  ;;  %v10895_v19 = vld [vmem:[%s15020_s1 + $0xf0c] ss:$40 sps:$4 sm:$0xff]   ;;  %v10890_v20 = vld [vmem:[%s15020_s1 + $0xf00] ss:$40 sps:$4 sm:$0xff]   ;;  %v10903_v24 = vld [vmem:[%s15020_s1 + $0xf5c] ss:$40 sps:$4 sm:$0xff]  }
  0x20   : > { %2818 = vmatpush1.bf16.msra.mxu1 %v10832_v27  ;;  %2717 = vmatprep.subr.bf16.mxu0 %v10833_v28  ;;  %v10893_v21 = vld [vmem:[%s15020_s1 + $0xf08] ss:$40 sps:$4 sm:$0xff]   ;;  %v12282_v22 = vsel %vm1038_vm0, %v1045_v17, %v1049_v18  ;;  %v10900_v23 = vld [vmem:[%s15020_s1 + $0xf54] ss:$40 sps:$4 sm:$0xff]   ;;  %v10901_v27 = vld [vmem:[%s15020_s1 + $0xf58] ss:$40 sps:$4 sm:$0xff]  }
  0x21   : > { %2819 = vmatprep.subr.bf16.mxu1 %v10835_v29  ;;  %v10898_v26 = vld [vmem:[%s15020_s1 + $0xf50] ss:$40 sps:$4 sm:$0xff]   ;;  %v10906_v28 = vld [vmem:[%s15020_s1 + $0xfa4] ss:$40 sps:$4 sm:$0xff]   ;;  %v10936_v49 = vld [vmem:[%s15020_s1 + $0x1134] ss:$40 sps:$4 sm:$0xff]  }
  0x22   : > { %v10909_v29 = vld [vmem:[%s15020_s1 + $0xfac] ss:$40 sps:$4 sm:$0xff]   ;;  %v10931_v48 = vld [vmem:[%s15020_s1 + $0x10e8] ss:$40 sps:$4 sm:$0xff]   ;;  %v10939_v53 = vld [vmem:[%s15020_s1 + $0x113c] ss:$40 sps:$4 sm:$0xff]  }
  0x23   : > { %2718 = vmatpush1.bf16.msra.mxu0 %v10837_v30  ;;  %v10904_v30 = vld [vmem:[%s15020_s1 + $0xfa0] ss:$40 sps:$4 sm:$0xff]   ;;  %v10942_v61 = vld [vmem:[%s15020_s1 + $0x1184] ss:$40 sps:$4 sm:$0xff]   ;;  %s9956_s29 = sshll.u32 %s15030_s10, 4  ;;  %s8491_s12 = sshll.u32 %s15030_s10, 3 }
  0x24   : > { %2820 = vmatpush1.bf16.msra.mxu1 %v10838_v31  ;;  %2719 = vmatprep.subr.bf16.mxu0 %v10839_v32  ;;  %v12313_v31 = vshrl.u32 %v12243_v4, 16  ;;  %v10907_v32 = vld [vmem:[%s15020_s1 + $0xfa8] ss:$40 sps:$4 sm:$0xff]   ;;  %v10954_v10 = vld [vmem:[%s15020_s1 + $0x1224] ss:$40 sps:$4 sm:$0xff]   ;;  %s351_s13 = scalar_lea.vmem %s15027_s8, %s9956_s29  ;;  %s355_s16 = scalar_lea.vmem %s15028_s9, %s8491_s12 }
  0x25   : > { %2821 = vmatprep.subr.bf16.mxu1 %v10841_v33  ;;  %v10912_v33 = vld [vmem:[%s15020_s1 + $0xff4] ss:$40 sps:$4 sm:$0xff]   ;;  %v10952_v12 = vld [vmem:[%s15020_s1 + $0x1220] ss:$40 sps:$4 sm:$0xff]   ;;  %v10966_v18 = vld [vmem:[%s15020_s1 + $0x12c4] ss:$40 sps:$4 sm:$0xff]  }
  0x26   : > { %v10957_v11 = vld [vmem:[%s15020_s1 + $0x122c] ss:$40 sps:$4 sm:$0xff]   ;;  %v10961_v17 = vld [vmem:[%s15020_s1 + $0x1278] ss:$40 sps:$4 sm:$0xff]  }
  0x27   : > { %2720 = vmatpush1.bf16.msra.mxu0 %v10843_v34  ;;  %v10915_v34 = vld [vmem:[%s15020_s1 + $0xffc] ss:$40 sps:$4 sm:$0xff]  }
  0x28   : > { %2822 = vmatpush1.bf16.msra.mxu1 %v10844_v35  ;;  %2721 = vmatprep.subr.bf16.mxu0 %v10845_v36  ;;  %v10910_v35 = vld [vmem:[%s15020_s1 + $0xff0] ss:$40 sps:$4 sm:$0xff]  }
  0x29   : > { %2823 = vmatprep.subr.bf16.mxu1 %v10847_v37  ;;  %v10913_v36 = vld [vmem:[%s15020_s1 + $0xff8] ss:$40 sps:$4 sm:$0xff]   ;;  %v10918_v37 = vld [vmem:[%s15020_s1 + $0x1044] ss:$40 sps:$4 sm:$0xff]  }
  0x2b   : > { %2722 = vmatpush1.bf16.msra.mxu0 %v10849_v38  ;;  %v10921_v38 = vld [vmem:[%s15020_s1 + $0x104c] ss:$40 sps:$4 sm:$0xff]  }
  0x2c   : > { %2824 = vmatpush1.bf16.msra.mxu1 %v10850_v39  ;;  %2723 = vmatprep.subr.bf16.mxu0 %v10851_v40  ;;  %v10916_v39 = vld [vmem:[%s15020_s1 + $0x1040] ss:$40 sps:$4 sm:$0xff]  }
  0x2d   : > { %2825 = vmatprep.subr.bf16.mxu1 %v10853_v41  ;;  %v10919_v40 = vld [vmem:[%s15020_s1 + $0x1048] ss:$40 sps:$4 sm:$0xff]   ;;  %v10924_v41 = vld [vmem:[%s15020_s1 + $0x1094] ss:$40 sps:$4 sm:$0xff]  }
  0x2f   : > { %2724 = vmatpush1.bf16.msra.mxu0 %v10855_v42  ;;  %v10927_v42 = vld [vmem:[%s15020_s1 + $0x109c] ss:$40 sps:$4 sm:$0xff]  }
  0x30   : > { %2826 = vmatpush1.bf16.msra.mxu1 %v10856_v43  ;;  %2725 = vmatprep.subr.bf16.mxu0 %v10857_v44  ;;  %v10922_v43 = vld [vmem:[%s15020_s1 + $0x1090] ss:$40 sps:$4 sm:$0xff]  }
  0x31   : > { %2827 = vmatprep.subr.bf16.mxu1 %v10859_v45  ;;  %v10925_v44 = vld [vmem:[%s15020_s1 + $0x1098] ss:$40 sps:$4 sm:$0xff]   ;;  %v10930_v45 = vld [vmem:[%s15020_s1 + $0x10e4] ss:$40 sps:$4 sm:$0xff]  }
  0x33   : > { %2726 = vmatpush1.bf16.msra.mxu0 %v10861_v46  ;;  %v10933_v46 = vld [vmem:[%s15020_s1 + $0x10ec] ss:$40 sps:$4 sm:$0xff]  }
  0x34   : > { %2828 = vmatpush1.bf16.msra.mxu1 %v10862_v47  ;;  %2727 = vmatprep.subr.bf16.mxu0 %v10863_v50  ;;  %v10928_v47 = vld [vmem:[%s15020_s1 + $0x10e0] ss:$40 sps:$4 sm:$0xff]  }
  0x35   : > { %2829 = vmatprep.subr.bf16.mxu1 %v10865_v52  ;;  %v12372_v50 = vld [vmem:[%s12196_s28 + $0x28] sm:$0x11] }
  0x36   : > { %v10988_v52 = vld [vmem:[%s12196_s28 + $0xc] ss:$16 sps:$4 sm:$0xff]   ;;  %v12380_v54 = vcombine.high %v12372_v50, %v12372_v50 }
  0x37   : > { %2728 = vmatpush1.bf16.msra.mxu0 %v10867_v55  ;;  %v1076_v55 = vshrl.u32 %v10988_v52, 16  ;;  %v1078_v56 = vshll.u32 %v10988_v52, 16  ;;  %v11004_v52 = vld [vmem:[%s15020_s1 + $0xa6c] ss:$40 sps:$4 sm:$0xff]  }
  0x38   : > { %2830 = vmatpush1.bf16.msra.mxu1 %v10868_v57  ;;  %2729 = vmatprep.subr.bf16.mxu0 %v10869_v59  ;;  %v10934_v57 = vld [vmem:[%s15020_s1 + $0x1130] ss:$40 sps:$4 sm:$0xff]   ;;  %v1083_v58 = vshll.u32 %v12380_v54, 16 }
  0x39   : > { %2831 = vmatprep.subr.bf16.mxu1 %v10871_v62  ;;  %v10937_v59 = vld [vmem:[%s15020_s1 + $0x1138] ss:$40 sps:$4 sm:$0xff]   ;;  %v1080_v60 = vrot.slane %v1078_v56, 1  ;;  %v10945_v62 = vld [vmem:[%s15020_s1 + $0x118c] ss:$40 sps:$4 sm:$0xff]  }
  0x3a   : > { %v1085_v63 = vrot.slane %v1083_v58, 1  ;;  %v11002_v56 = vld [vmem:[%s15020_s1 + $0xa68] ss:$40 sps:$4 sm:$0xff]   ;;  %v11010_v58 = vld [vmem:[%s15020_s1 + $0xabc] ss:$40 sps:$4 sm:$0xff]  }
  0x3b   : > { %2730 = vmatpush1.bf16.msra.mxu0 %v10873_v0  ;;  %v1081_v0 = vor.u32 %v1080_v60, %v1076_v55  ;;  %v10999_v55 = vld [vmem:[%s15020_s1 + $0xa60] ss:$40 sps:$4 sm:$0xff]   ;;  %v11005_v60 = vld [vmem:[%s15020_s1 + $0xab0] ss:$40 sps:$4 sm:$0xff]  }
  0x3c   : > { %2832 = vmatpush1.bf16.msra.mxu1 %v10874_v2  ;;  %2731 = vmatprep.subr.bf16.mxu0 %v10875_v3  ;;  %v10940_v2 = vld [vmem:[%s15020_s1 + $0x1180] ss:$40 sps:$4 sm:$0xff]  }
  0x3d   : > { %2833 = vmatprep.subr.bf16.mxu1 %v10877_v6  ;;  %v10943_v3 = vld [vmem:[%s15020_s1 + $0x1188] ss:$40 sps:$4 sm:$0xff]   ;;  %v12402_v5 = vsel %vm1038_vm0, %v1081_v0, %v1085_v63  ;;  %v10948_v6 = vld [vmem:[%s15020_s1 + $0x11d4] ss:$40 sps:$4 sm:$0xff]  }
  0x3e   : > { %v11016_v63 = vld [vmem:[%s15020_s1 + $0xb0c] ss:$40 sps:$4 sm:$0xff]   ;;  %v11011_v0 = vld [vmem:[%s15020_s1 + $0xb00] ss:$40 sps:$4 sm:$0xff]  }
  0x3f   : > { %2732 = vmatpush1.bf16.msra.mxu0 %v10879_v7  ;;  %v10951_v7 = vld [vmem:[%s15020_s1 + $0x11dc] ss:$40 sps:$4 sm:$0xff]  }
  0x40   : > { %2834 = vmatpush1.bf16.msra.mxu1 %v10880_v8  ;;  %2733 = vmatprep.subr.bf16.mxu0 %v10881_v9  ;;  %v10946_v8 = vld [vmem:[%s15020_s1 + $0x11d0] ss:$40 sps:$4 sm:$0xff]  }
  0x41   : > { %2835 = vmatprep.subr.bf16.mxu1 %v10883_v13  ;;  %v10949_v9 = vld [vmem:[%s15020_s1 + $0x11d8] ss:$40 sps:$4 sm:$0xff]   ;;  %v10955_v13 = vld [vmem:[%s15020_s1 + $0x1228] ss:$40 sps:$4 sm:$0xff]  }
  0x43   : > { %2734 = vmatpush1.bf16.msra.mxu0 %v10885_v14  ;;  %v10960_v14 = vld [vmem:[%s15020_s1 + $0x1274] ss:$40 sps:$4 sm:$0xff]  }
  0x44   : > { %2836 = vmatpush1.bf16.msra.mxu1 %v10886_v15  ;;  %2754 = vmatprep.subr.bf16.mxu0 %v10892_v16  ;;  %v10963_v15 = vld [vmem:[%s15020_s1 + $0x127c] ss:$40 sps:$4 sm:$0xff]   ;;  %v10958_v16 = vld [vmem:[%s15020_s1 + $0x1270] ss:$40 sps:$4 sm:$0xff]  }
  0x45   : > { %2856 = vmatprep.subr.bf16.mxu1 %v10895_v19  ;;  %v10969_v19 = vld [vmem:[%s15020_s1 + $0x12cc] ss:$40 sps:$4 sm:$0xff]  }
  0x46   : > { %2736 = vmatmul.mubr.bf16.vlgmr.msra.gmra.mrb[0].mxu0 %v12282_v22 }
  0x47   : > { %2838 = vmatmul.mubr.bf16.vlgmr.msra.gmra.mrb[0].mxu1 %v12282_v22  ;;  %2755 = vmatpush1.bf16.msra.mxu0 %v10890_v20  ;;  %v10964_v20 = vld [vmem:[%s15020_s1 + $0x12c0] ss:$40 sps:$4 sm:$0xff]  }
  0x48   : > { %2857 = vmatpush1.bf16.msra.mxu1 %v10893_v21  ;;  %2756 = vmatprep.subr.bf16.mxu0 %v10900_v23  ;;  %v10967_v21 = vld [vmem:[%s15020_s1 + $0x12c8] ss:$40 sps:$4 sm:$0xff]  }
  0x49   : > { %2858 = vmatprep.subr.bf16.mxu1 %v10903_v24  ;;  %2745 = vmatprep.mubr.bf16.mxu0 %v12291_v25  ;;  %v10997_v23 = vld [vmem:[%s12196_s28 + $0x8] ss:$16 sps:$4 sm:$0xff]   ;;  %v10972_v24 = vld [vmem:[%s15020_s1 + $0x1314] ss:$40 sps:$4 sm:$0xff]  }
  0x4a   : > { %2847 = vmatprep.mubr.bf16.mxu1 %v12291_v25 }
  0x4b   : > { %2757 = vmatpush1.bf16.msra.mxu0 %v10898_v26  ;;  %v10975_v26 = vld [vmem:[%s15020_s1 + $0x131c] ss:$40 sps:$4 sm:$0xff]  }
  0x4c   : > { %2859 = vmatpush1.bf16.msra.mxu1 %v10901_v27  ;;  %2758 = vmatprep.subr.bf16.mxu0 %v10906_v28  ;;  %v10970_v27 = vld [vmem:[%s15020_s1 + $0x1310] ss:$40 sps:$4 sm:$0xff]  }
  0x4d   : > { %2860 = vmatprep.subr.bf16.mxu1 %v10909_v29  ;;  %v10973_v28 = vld [vmem:[%s15020_s1 + $0x1318] ss:$40 sps:$4 sm:$0xff]   ;;  %v12469_v29 = vcombine.low %v12372_v50, %v12372_v50  ;;  %v11001_v50 = vld [vmem:[%s15020_s1 + $0xa64] ss:$40 sps:$4 sm:$0xff]  }
  0x4e   : > { %2746 = vmatmul.mubr.bf16.gmra.mrb[4].mxu0 %v12313_v31 }
  0x4f   : > { %2848 = vmatmul.mubr.bf16.gmra.mrb[4].mxu1 %v12313_v31  ;;  %2759 = vmatpush1.bf16.msra.mxu0 %v10904_v30  ;;  %v1066_v30 = vshll.u32 %v10997_v23, 16 }
  0x50   : > { %2861 = vmatpush1.bf16.msra.mxu1 %v10907_v32  ;;  %2760 = vmatprep.subr.bf16.mxu0 %v10912_v33  ;;  %v10978_v32 = vld [vmem:[%s15020_s1 + $0x1364] ss:$40 sps:$4 sm:$0xff]  }
  0x51   : > { %2862 = vmatprep.subr.bf16.mxu1 %v10915_v34  ;;  %2786 = vmatprep.mubr.bf16.mxu0 %v12402_v5  ;;  %v10981_v33 = vld [vmem:[%s15020_s1 + $0x136c] ss:$40 sps:$4 sm:$0xff]   ;;  %v10976_v34 = vld [vmem:[%s15020_s1 + $0x1360] ss:$40 sps:$4 sm:$0xff]  }
  0x52   : > { %2888 = vmatprep.mubr.bf16.mxu1 %v12402_v5 }
  0x53   : > { %2761 = vmatpush1.bf16.msra.mxu0 %v10910_v35  ;;  %v10979_v35 = vld [vmem:[%s15020_s1 + $0x1368] ss:$40 sps:$4 sm:$0xff]  }
  0x54   : > { %2863 = vmatpush1.bf16.msra.mxu1 %v10913_v36  ;;  %2762 = vmatprep.subr.bf16.mxu0 %v10918_v37  ;;  %v1064_v36 = vshrl.u32 %v10997_v23, 16  ;;  %v1068_v37 = vrot.slane %v1066_v30, 1  ;;  %v11046_v23 = vld [vmem:[%s15020_s1 + $0xc9c] ss:$40 sps:$4 sm:$0xff]   ;;  %v11047_v30 = vld [vmem:[%s15020_s1 + $0xce0] ss:$40 sps:$4 sm:$0xff]  }
  0x55   : > { %2864 = vmatprep.subr.bf16.mxu1 %v10921_v38  ;;  %v1071_v38 = vshll.u32 %v12469_v29, 16 }
  0x57   : > { %2763 = vmatpush1.bf16.msra.mxu0 %v10916_v39  ;;  %v10984_v39 = vld [vmem:[%s15020_s1 + $0x13b4] ss:$40 sps:$4 sm:$0xff]  }
  0x58   : > { %2865 = vmatpush1.bf16.msra.mxu1 %v10919_v40  ;;  %2764 = vmatprep.subr.bf16.mxu0 %v10924_v41  ;;  %v10987_v40 = vld [vmem:[%s15020_s1 + $0x13bc] ss:$40 sps:$4 sm:$0xff]   ;;  %v10982_v41 = vld [vmem:[%s15020_s1 + $0x13b0] ss:$40 sps:$4 sm:$0xff]  }
  0x59   : > { %2866 = vmatprep.subr.bf16.mxu1 %v10927_v42  ;;  %v10985_v42 = vld [vmem:[%s15020_s1 + $0x13b8] ss:$40 sps:$4 sm:$0xff]  }
  0x5b   : > { %2765 = vmatpush1.bf16.msra.mxu0 %v10922_v43  ;;  %v1069_v43 = vor.u32 %v1068_v37, %v1064_v36  ;;  %v11056_v36 = vld [vmem:[%s15020_s1 + $0xd38] ss:$40 sps:$4 sm:$0xff]   ;;  %v11061_v37 = vld [vmem:[%s15020_s1 + $0xd84] ss:$40 sps:$4 sm:$0xff]  }
  0x5c   : > { %2867 = vmatpush1.bf16.msra.mxu1 %v10925_v44  ;;  %2766 = vmatprep.subr.bf16.mxu0 %v10930_v45  ;;  %v1073_v44 = vrot.slane %v1071_v38, 1  ;;  %v10993_v45 = vld [vmem:[%s15020_s1 + $0xa14] ss:$40 sps:$4 sm:$0xff]  }
  0x5d   : > { %2868 = vmatprep.subr.bf16.mxu1 %v10933_v46  ;;  %v10996_v46 = vld [vmem:[%s15020_s1 + $0xa1c] ss:$40 sps:$4 sm:$0xff]   ;;  %v11064_v38 = vld [vmem:[%s15020_s1 + $0xd8c] ss:$40 sps:$4 sm:$0xff]  }
  0x5f   : > { %2767 = vmatpush1.bf16.msra.mxu0 %v10928_v47  ;;  %v10991_v47 = vld [vmem:[%s15020_s1 + $0xa10] ss:$40 sps:$4 sm:$0xff]  }
  0x60   : > { %2869 = vmatpush1.bf16.msra.mxu1 %v10931_v48  ;;  %2768 = vmatprep.subr.bf16.mxu0 %v10936_v49  ;;  %v10994_v48 = vld [vmem:[%s15020_s1 + $0xa18] ss:$40 sps:$4 sm:$0xff]   ;;  %v12509_v49 = vsel %vm1038_vm0, %v1069_v43, %v1073_v44 }
  0x61   : > { %2870 = vmatprep.subr.bf16.mxu1 %v10939_v53  ;;  %v12518_v53 = vshrl.u32 %v12380_v54, 16  ;;  %v11065_v43 = vld [vmem:[%s15020_s1 + $0xdd0] ss:$40 sps:$4 sm:$0xff]  }
  0x62   : > { %v11068_v44 = vld [vmem:[%s15020_s1 + $0xdd8] ss:$40 sps:$4 sm:$0xff]  }
  0x63   : > { %2769 = vmatpush1.bf16.msra.mxu0 %v10934_v57  ;;  %v11007_v57 = vld [vmem:[%s15020_s1 + $0xab4] ss:$40 sps:$4 sm:$0xff]  }
  0x64   : > { %2871 = vmatpush1.bf16.msra.mxu1 %v10937_v59  ;;  %2770 = vmatprep.subr.bf16.mxu0 %v10942_v61  ;;  %v12537_v59 = vshrl.u32 %v12469_v29, 16  ;;  %v11008_v61 = vld [vmem:[%s15020_s1 + $0xab8] ss:$40 sps:$4 sm:$0xff]  }
  0x65   : > { %2872 = vmatprep.subr.bf16.mxu1 %v10945_v62  ;;  %v11013_v62 = vld [vmem:[%s15020_s1 + $0xb04] ss:$40 sps:$4 sm:$0xff]  }
  0x67   : > { %2771 = vmatpush1.bf16.msra.mxu0 %v10940_v2  ;;  %v11014_v2 = vld [vmem:[%s15020_s1 + $0xb08] ss:$40 sps:$4 sm:$0xff]  }
  0x68   : > { %2873 = vmatpush1.bf16.msra.mxu1 %v10943_v3  ;;  %2772 = vmatprep.subr.bf16.mxu0 %v10948_v6  ;;  %v11019_v3 = vld [vmem:[%s15020_s1 + $0xb54] ss:$40 sps:$4 sm:$0xff]  }
  0x69   : > { %2874 = vmatprep.subr.bf16.mxu1 %v10951_v7  ;;  %v11022_v6 = vld [vmem:[%s15020_s1 + $0xb5c] ss:$40 sps:$4 sm:$0xff]   ;;  %v11017_v7 = vld [vmem:[%s15020_s1 + $0xb50] ss:$40 sps:$4 sm:$0xff]  }
  0x6b   : > { %2773 = vmatpush1.bf16.msra.mxu0 %v10946_v8  ;;  %v11020_v8 = vld [vmem:[%s15020_s1 + $0xb58] ss:$40 sps:$4 sm:$0xff]  }
  0x6c   : > { %2875 = vmatpush1.bf16.msra.mxu1 %v10949_v9  ;;  %2774 = vmatprep.subr.bf16.mxu0 %v10954_v10  ;;  %v11025_v9 = vld [vmem:[%s15020_s1 + $0xba4] ss:$40 sps:$4 sm:$0xff]  }
  0x6d   : > { %2876 = vmatprep.subr.bf16.mxu1 %v10957_v11  ;;  %v11028_v10 = vld [vmem:[%s15020_s1 + $0xbac] ss:$40 sps:$4 sm:$0xff]   ;;  %v11023_v11 = vld [vmem:[%s15020_s1 + $0xba0] ss:$40 sps:$4 sm:$0xff]  }
  0x6f   : > { %2775 = vmatpush1.bf16.msra.mxu0 %v10952_v12  ;;  %v11026_v12 = vld [vmem:[%s15020_s1 + $0xba8] ss:$40 sps:$4 sm:$0xff]  }
  0x70   : > { %2877 = vmatpush1.bf16.msra.mxu1 %v10955_v13  ;;  %2776 = vmatprep.subr.bf16.mxu0 %v10960_v14  ;;  %v11031_v13 = vld [vmem:[%s15020_s1 + $0xbf4] ss:$40 sps:$4 sm:$0xff]  }
  0x71   : > { %2878 = vmatprep.subr.bf16.mxu1 %v10963_v15  ;;  %v11034_v14 = vld [vmem:[%s15020_s1 + $0xbfc] ss:$40 sps:$4 sm:$0xff]   ;;  %v11029_v15 = vld [vmem:[%s15020_s1 + $0xbf0] ss:$40 sps:$4 sm:$0xff]  }
  0x73   : > { %2777 = vmatpush1.bf16.msra.mxu0 %v10958_v16  ;;  %v11032_v16 = vld [vmem:[%s15020_s1 + $0xbf8] ss:$40 sps:$4 sm:$0xff]  }
  0x74   : > { %2879 = vmatpush1.bf16.msra.mxu1 %v10961_v17  ;;  %2778 = vmatprep.subr.bf16.mxu0 %v10966_v18  ;;  %v11037_v17 = vld [vmem:[%s15020_s1 + $0xc44] ss:$40 sps:$4 sm:$0xff]  }
  0x75   : > { %2880 = vmatprep.subr.bf16.mxu1 %v10969_v19  ;;  %v11040_v18 = vld [vmem:[%s15020_s1 + $0xc4c] ss:$40 sps:$4 sm:$0xff]   ;;  %v11035_v19 = vld [vmem:[%s15020_s1 + $0xc40] ss:$40 sps:$4 sm:$0xff]  }
  0x77   : > { %2779 = vmatpush1.bf16.msra.mxu0 %v10964_v20  ;;  %v11038_v20 = vld [vmem:[%s15020_s1 + $0xc48] ss:$40 sps:$4 sm:$0xff]  }
  0x78   : > { %2881 = vmatpush1.bf16.msra.mxu1 %v10967_v21  ;;  %2780 = vmatprep.subr.bf16.mxu0 %v10972_v24  ;;  %v11043_v21 = vld [vmem:[%s15020_s1 + $0xc94] ss:$40 sps:$4 sm:$0xff]   ;;  %v11041_v24 = vld [vmem:[%s15020_s1 + $0xc90] ss:$40 sps:$4 sm:$0xff]  }
  0x79   : > { %2882 = vmatprep.subr.bf16.mxu1 %v10975_v26  ;;  %v11044_v26 = vld [vmem:[%s15020_s1 + $0xc98] ss:$40 sps:$4 sm:$0xff]  }
  0x7b   : > { %2781 = vmatpush1.bf16.msra.mxu0 %v10970_v27  ;;  %v11049_v27 = vld [vmem:[%s15020_s1 + $0xce4] ss:$40 sps:$4 sm:$0xff]  }
  0x7c   : > { %2883 = vmatpush1.bf16.msra.mxu1 %v10973_v28  ;;  %2782 = vmatprep.subr.bf16.mxu0 %v10978_v32  ;;  %v11052_v28 = vld [vmem:[%s15020_s1 + $0xcec] ss:$40 sps:$4 sm:$0xff]   ;;  %v11050_v32 = vld [vmem:[%s15020_s1 + $0xce8] ss:$40 sps:$4 sm:$0xff]  }
  0x7d   : > { %2884 = vmatprep.subr.bf16.mxu1 %v10981_v33  ;;  %v11055_v33 = vld [vmem:[%s15020_s1 + $0xd34] ss:$40 sps:$4 sm:$0xff]  }
  0x7f   : > { %2783 = vmatpush1.bf16.msra.mxu0 %v10976_v34  ;;  %v11058_v34 = vld [vmem:[%s15020_s1 + $0xd3c] ss:$40 sps:$4 sm:$0xff]  }
  0x80   : > { %2885 = vmatpush1.bf16.msra.mxu1 %v10979_v35  ;;  %2784 = vmatprep.subr.bf16.mxu0 %v10984_v39  ;;  %v11053_v35 = vld [vmem:[%s15020_s1 + $0xd30] ss:$40 sps:$4 sm:$0xff]   ;;  %v11059_v39 = vld [vmem:[%s15020_s1 + $0xd80] ss:$40 sps:$4 sm:$0xff]  }
  0x81   : > { %2886 = vmatprep.subr.bf16.mxu1 %v10987_v40  ;;  %v11062_v40 = vld [vmem:[%s15020_s1 + $0xd88] ss:$40 sps:$4 sm:$0xff]  }
  0x83   : > { %2785 = vmatpush1.bf16.msra.mxu0 %v10982_v41  ;;  %v11067_v41 = vld [vmem:[%s15020_s1 + $0xdd4] ss:$40 sps:$4 sm:$0xff]  }
  0x84   : > { %2887 = vmatpush1.bf16.msra.mxu1 %v10985_v42  ;;  %2907 = vmatprep.subr.bf16.mxu0 %v10993_v45  ;;  %v11070_v42 = vld [vmem:[%s15020_s1 + $0xddc] ss:$40 sps:$4 sm:$0xff]  }
  0x85   : > { %3009 = vmatprep.subr.bf16.mxu1 %v10996_v46  ;;  %v11073_v45 = vld [vmem:[%s15020_s1 + $0xe24] ss:$40 sps:$4 sm:$0xff]  }
  0x86   : > { %2787 = vmatmul.mubr.bf16.vlgmr.msra.gmra.mrb[0].mxu0 %v12509_v49  ;;  %v11076_v46 = vld [vmem:[%s15020_s1 + $0xe2c] ss:$40 sps:$4 sm:$0xff]  }
  0x87   : > { %2889 = vmatmul.mubr.bf16.vlgmr.msra.gmra.mrb[0].mxu1 %v12509_v49  ;;  %2908 = vmatpush1.bf16.msra.mxu0 %v10991_v47  ;;  %v11071_v47 = vld [vmem:[%s15020_s1 + $0xe20] ss:$40 sps:$4 sm:$0xff]  }
  0x88   : > { %3010 = vmatpush1.bf16.msra.mxu1 %v10994_v48  ;;  %2909 = vmatprep.subr.bf16.mxu0 %v11001_v50  ;;  %v11074_v48 = vld [vmem:[%s15020_s1 + $0xe28] ss:$40 sps:$4 sm:$0xff]   ;;  %v11079_v50 = vld [vmem:[%s15020_s1 + $0xe74] ss:$40 sps:$4 sm:$0xff]  }
  0x89   : > { %3011 = vmatprep.subr.bf16.mxu1 %v11004_v52  ;;  %2796 = vmatprep.mubr.bf16.mxu0 %v12518_v53  ;;  %v11082_v52 = vld [vmem:[%s15020_s1 + $0xe7c] ss:$40 sps:$4 sm:$0xff]  }
  0x8a   : > { %2898 = vmatprep.mubr.bf16.mxu1 %v12518_v53 }
  0x8b   : > { %2910 = vmatpush1.bf16.msra.mxu0 %v10999_v55  ;;  %v11077_v55 = vld [vmem:[%s15020_s1 + $0xe70] ss:$40 sps:$4 sm:$0xff]  }
  0x8c   : > { %3012 = vmatpush1.bf16.msra.mxu1 %v11002_v56  ;;  %2911 = vmatprep.subr.bf16.mxu0 %v11007_v57  ;;  %v11080_v56 = vld [vmem:[%s15020_s1 + $0xe78] ss:$40 sps:$4 sm:$0xff]   ;;  %v11085_v57 = vld [vmem:[%s15020_s1 + $0xec4] ss:$40 sps:$4 sm:$0xff]  }
  0x8d   : > { %3013 = vmatprep.subr.bf16.mxu1 %v11010_v58  ;;  %v11088_v58 = vld [vmem:[%s15020_s1 + $0xecc] ss:$40 sps:$4 sm:$0xff]  }
  0x8e   : > { %2797 = vmatmul.mubr.bf16.gmra.mrb[4].mxu0 %v12537_v59 }
  0x8f   : > { %2899 = vmatmul.mubr.bf16.gmra.mrb[4].mxu1 %v12537_v59  ;;  %2912 = vmatpush1.bf16.msra.mxu0 %v11005_v60  ;;  %v11083_v60 = vld [vmem:[%s15020_s1 + $0xec0] ss:$40 sps:$4 sm:$0xff]  }
  0x90   : > { %3014 = vmatpush1.bf16.msra.mxu1 %v11008_v61  ;;  %2913 = vmatprep.subr.bf16.mxu0 %v11013_v62  ;;  %v11086_v61 = vld [vmem:[%s15020_s1 + $0xec8] ss:$40 sps:$4 sm:$0xff]   ;;  %v11091_v62 = vld [vmem:[%s15020_s1 + $0xf14] ss:$40 sps:$4 sm:$0xff]  }
  0x91   : > { %3015 = vmatprep.subr.bf16.mxu1 %v11016_v63  ;;  %2939 = vmatprep.mubr.bf16.mxu0 %v12235_v1  ;;  %v11094_v63 = vld [vmem:[%s15020_s1 + $0xf1c] ss:$40 sps:$4 sm:$0xff]  }
  0x92   : > { %3041 = vmatprep.mubr.bf16.mxu1 %v12235_v1 }
  0x93   : > { %2914 = vmatpush1.bf16.msra.mxu0 %v11011_v0  ;;  %v11089_v0 = vld [vmem:[%s15020_s1 + $0xf10] ss:$40 sps:$4 sm:$0xff]  }
  0x94   : > { %3016 = vmatpush1.bf16.msra.mxu1 %v11014_v2  ;;  %2915 = vmatprep.subr.bf16.mxu0 %v11019_v3  ;;  %v11092_v2 = vld [vmem:[%s15020_s1 + $0xf18] ss:$40 sps:$4 sm:$0xff]   ;;  %v11097_v3 = vld [vmem:[%s15020_s1 + $0xf64] ss:$40 sps:$4 sm:$0xff]  }
  0x95   : > { %3017 = vmatprep.subr.bf16.mxu1 %v11022_v6  ;;  %v11100_v6 = vld [vmem:[%s15020_s1 + $0xf6c] ss:$40 sps:$4 sm:$0xff]  }
  0x97   : > { %2916 = vmatpush1.bf16.msra.mxu0 %v11017_v7  ;;  %v11095_v7 = vld [vmem:[%s15020_s1 + $0xf60] ss:$40 sps:$4 sm:$0xff]  }
  0x98   : > { %3018 = vmatpush1.bf16.msra.mxu1 %v11020_v8  ;;  %2917 = vmatprep.subr.bf16.mxu0 %v11025_v9  ;;  %v11098_v8 = vld [vmem:[%s15020_s1 + $0xf68] ss:$40 sps:$4 sm:$0xff]   ;;  %v11103_v9 = vld [vmem:[%s15020_s1 + $0xfb4] ss:$40 sps:$4 sm:$0xff]  }
  0x99   : > { %3019 = vmatprep.subr.bf16.mxu1 %v11028_v10  ;;  %v11106_v10 = vld [vmem:[%s15020_s1 + $0xfbc] ss:$40 sps:$4 sm:$0xff]  }
  0x9b   : > { %2918 = vmatpush1.bf16.msra.mxu0 %v11023_v11  ;;  %v11101_v11 = vld [vmem:[%s15020_s1 + $0xfb0] ss:$40 sps:$4 sm:$0xff]  }
  0x9c   : > { %3020 = vmatpush1.bf16.msra.mxu1 %v11026_v12  ;;  %2919 = vmatprep.subr.bf16.mxu0 %v11031_v13  ;;  %v11104_v12 = vld [vmem:[%s15020_s1 + $0xfb8] ss:$40 sps:$4 sm:$0xff]   ;;  %v11109_v13 = vld [vmem:[%s15020_s1 + $0x1004] ss:$40 sps:$4 sm:$0xff]  }
  0x9d   : > { %3021 = vmatprep.subr.bf16.mxu1 %v11034_v14  ;;  %v11112_v14 = vld [vmem:[%s15020_s1 + $0x100c] ss:$40 sps:$4 sm:$0xff]  }
  0x9f   : > { %2920 = vmatpush1.bf16.msra.mxu0 %v11029_v15  ;;  %v11107_v15 = vld [vmem:[%s15020_s1 + $0x1000] ss:$40 sps:$4 sm:$0xff]  }
  0xa0   : > { %3022 = vmatpush1.bf16.msra.mxu1 %v11032_v16  ;;  %2921 = vmatprep.subr.bf16.mxu0 %v11037_v17  ;;  %v11110_v16 = vld [vmem:[%s15020_s1 + $0x1008] ss:$40 sps:$4 sm:$0xff]   ;;  %v11115_v17 = vld [vmem:[%s15020_s1 + $0x1054] ss:$40 sps:$4 sm:$0xff]  }
  0xa1   : > { %3023 = vmatprep.subr.bf16.mxu1 %v11040_v18  ;;  %v11118_v18 = vld [vmem:[%s15020_s1 + $0x105c] ss:$40 sps:$4 sm:$0xff]  }
  0xa3   : > { %2922 = vmatpush1.bf16.msra.mxu0 %v11035_v19  ;;  %v11113_v19 = vld [vmem:[%s15020_s1 + $0x1050] ss:$40 sps:$4 sm:$0xff]  }
  0xa4   : > { %3024 = vmatpush1.bf16.msra.mxu1 %v11038_v20  ;;  %2923 = vmatprep.subr.bf16.mxu0 %v11043_v21  ;;  %v11116_v20 = vld [vmem:[%s15020_s1 + $0x1058] ss:$40 sps:$4 sm:$0xff]   ;;  %v11121_v21 = vld [vmem:[%s15020_s1 + $0x10a4] ss:$40 sps:$4 sm:$0xff]  }
  0xa5   : > { %3025 = vmatprep.subr.bf16.mxu1 %v11046_v23  ;;  %v11124_v23 = vld [vmem:[%s15020_s1 + $0x10ac] ss:$40 sps:$4 sm:$0xff]  }
  0xa7   : > { %2924 = vmatpush1.bf16.msra.mxu0 %v11041_v24  ;;  %v11119_v24 = vld [vmem:[%s15020_s1 + $0x10a0] ss:$40 sps:$4 sm:$0xff]  }
  0xa8   : > { %3026 = vmatpush1.bf16.msra.mxu1 %v11044_v26  ;;  %2925 = vmatprep.subr.bf16.mxu0 %v11049_v27  ;;  %v11122_v26 = vld [vmem:[%s15020_s1 + $0x10a8] ss:$40 sps:$4 sm:$0xff]   ;;  %v11127_v27 = vld [vmem:[%s15020_s1 + $0x10f4] ss:$40 sps:$4 sm:$0xff]  }
  0xa9   : > { %3027 = vmatprep.subr.bf16.mxu1 %v11052_v28  ;;  %v11130_v28 = vld [vmem:[%s15020_s1 + $0x10fc] ss:$40 sps:$4 sm:$0xff]  }
  0xab   : > { %2926 = vmatpush1.bf16.msra.mxu0 %v11047_v30  ;;  %v11125_v30 = vld [vmem:[%s15020_s1 + $0x10f0] ss:$40 sps:$4 sm:$0xff]  }
  0xac   : > { %3028 = vmatpush1.bf16.msra.mxu1 %v11050_v32  ;;  %2927 = vmatprep.subr.bf16.mxu0 %v11055_v33  ;;  %v11128_v32 = vld [vmem:[%s15020_s1 + $0x10f8] ss:$40 sps:$4 sm:$0xff]   ;;  %v11133_v33 = vld [vmem:[%s15020_s1 + $0x1144] ss:$40 sps:$4 sm:$0xff]  }
  0xad   : > { %3029 = vmatprep.subr.bf16.mxu1 %v11058_v34  ;;  %v11136_v34 = vld [vmem:[%s15020_s1 + $0x114c] ss:$40 sps:$4 sm:$0xff]  }
  0xaf   : > { %2928 = vmatpush1.bf16.msra.mxu0 %v11053_v35  ;;  %v11131_v35 = vld [vmem:[%s15020_s1 + $0x1140] ss:$40 sps:$4 sm:$0xff]  }
  0xb0   : > { %3030 = vmatpush1.bf16.msra.mxu1 %v11056_v36  ;;  %2929 = vmatprep.subr.bf16.mxu0 %v11061_v37  ;;  %v11134_v36 = vld [vmem:[%s15020_s1 + $0x1148] ss:$40 sps:$4 sm:$0xff]   ;;  %v11139_v37 = vld [vmem:[%s15020_s1 + $0x1194] ss:$40 sps:$4 sm:$0xff]  }
  0xb1   : > { %3031 = vmatprep.subr.bf16.mxu1 %v11064_v38  ;;  %v11142_v38 = vld [vmem:[%s15020_s1 + $0x119c] ss:$40 sps:$4 sm:$0xff]  }
  0xb3   : > { %2930 = vmatpush1.bf16.msra.mxu0 %v11059_v39  ;;  %v11137_v39 = vld [vmem:[%s15020_s1 + $0x1190] ss:$40 sps:$4 sm:$0xff]  }
  0xb4   : > { %3032 = vmatpush1.bf16.msra.mxu1 %v11062_v40  ;;  %2931 = vmatprep.subr.bf16.mxu0 %v11067_v41  ;;  %v11140_v40 = vld [vmem:[%s15020_s1 + $0x1198] ss:$40 sps:$4 sm:$0xff]   ;;  %v11145_v41 = vld [vmem:[%s15020_s1 + $0x11e4] ss:$40 sps:$4 sm:$0xff]  }
  0xb5   : > { %3033 = vmatprep.subr.bf16.mxu1 %v11070_v42  ;;  %v11148_v42 = vld [vmem:[%s15020_s1 + $0x11ec] ss:$40 sps:$4 sm:$0xff]  }
  0xb7   : > { %2932 = vmatpush1.bf16.msra.mxu0 %v11065_v43  ;;  %v11143_v43 = vld [vmem:[%s15020_s1 + $0x11e0] ss:$40 sps:$4 sm:$0xff]  }
  0xb8   : > { %3034 = vmatpush1.bf16.msra.mxu1 %v11068_v44  ;;  %2933 = vmatprep.subr.bf16.mxu0 %v11073_v45  ;;  %v11146_v44 = vld [vmem:[%s15020_s1 + $0x11e8] ss:$40 sps:$4 sm:$0xff]   ;;  %v11151_v45 = vld [vmem:[%s15020_s1 + $0x1234] ss:$40 sps:$4 sm:$0xff]  }
  0xb9   : > { %3035 = vmatprep.subr.bf16.mxu1 %v11076_v46  ;;  %v11154_v46 = vld [vmem:[%s15020_s1 + $0x123c] ss:$40 sps:$4 sm:$0xff]  }
  0xbb   : > { %2934 = vmatpush1.bf16.msra.mxu0 %v11071_v47  ;;  %v11149_v47 = vld [vmem:[%s15020_s1 + $0x1230] ss:$40 sps:$4 sm:$0xff]  }
  0xbc   : > { %3036 = vmatpush1.bf16.msra.mxu1 %v11074_v48  ;;  %2935 = vmatprep.subr.bf16.mxu0 %v11079_v50  ;;  %v11152_v48 = vld [vmem:[%s15020_s1 + $0x1238] ss:$40 sps:$4 sm:$0xff]   ;;  %v11157_v50 = vld [vmem:[%s15020_s1 + $0x1284] ss:$40 sps:$4 sm:$0xff]  }
  0xbd   : > { %3037 = vmatprep.subr.bf16.mxu1 %v11082_v52  ;;  %v11160_v52 = vld [vmem:[%s15020_s1 + $0x128c] ss:$40 sps:$4 sm:$0xff]  }
  0xbf   : > { %2936 = vmatpush1.bf16.msra.mxu0 %v11077_v55  ;;  %v11155_v55 = vld [vmem:[%s15020_s1 + $0x1280] ss:$40 sps:$4 sm:$0xff]  }
  0xc0   : > { %3038 = vmatpush1.bf16.msra.mxu1 %v11080_v56  ;;  %2937 = vmatprep.subr.bf16.mxu0 %v11085_v57  ;;  %v11158_v56 = vld [vmem:[%s15020_s1 + $0x1288] ss:$40 sps:$4 sm:$0xff]   ;;  %v11163_v57 = vld [vmem:[%s15020_s1 + $0x12d4] ss:$40 sps:$4 sm:$0xff]  }
  0xc1   : > { %3039 = vmatprep.subr.bf16.mxu1 %v11088_v58  ;;  %v11166_v58 = vld [vmem:[%s15020_s1 + $0x12dc] ss:$40 sps:$4 sm:$0xff]  }
  0xc3   : > { %2938 = vmatpush1.bf16.msra.mxu0 %v11083_v60  ;;  %v11161_v60 = vld [vmem:[%s15020_s1 + $0x12d0] ss:$40 sps:$4 sm:$0xff]  }
  0xc4   : > { %3040 = vmatpush1.bf16.msra.mxu1 %v11086_v61  ;;  %2958 = vmatprep.subr.bf16.mxu0 %v11091_v62  ;;  %v11164_v61 = vld [vmem:[%s15020_s1 + $0x12d8] ss:$40 sps:$4 sm:$0xff]   ;;  %v11169_v62 = vld [vmem:[%s15020_s1 + $0x1324] ss:$40 sps:$4 sm:$0xff]  }
  0xc5   : > { %3060 = vmatprep.subr.bf16.mxu1 %v11094_v63  ;;  %v11172_v63 = vld [vmem:[%s15020_s1 + $0x132c] ss:$40 sps:$4 sm:$0xff]  }
  0xc6   : > { %2940 = vmatmul.mubr.bf16.vlgmr.msra.gmra.mrb[8].mxu0 %v12282_v22 }
  0xc7   : > { %3042 = vmatmul.mubr.bf16.vlgmr.msra.gmra.mrb[8].mxu1 %v12282_v22  ;;  %2959 = vmatpush1.bf16.msra.mxu0 %v11089_v0  ;;  %v11167_v0 = vld [vmem:[%s15020_s1 + $0x1320] ss:$40 sps:$4 sm:$0xff]  }
  0xc8   : > { %3061 = vmatpush1.bf16.msra.mxu1 %v11092_v2  ;;  %2960 = vmatprep.subr.bf16.mxu0 %v11097_v3  ;;  %v11170_v2 = vld [vmem:[%s15020_s1 + $0x1328] ss:$40 sps:$4 sm:$0xff]   ;;  %v11175_v3 = vld [vmem:[%s15020_s1 + $0x1374] ss:$40 sps:$4 sm:$0xff]  }
  0xc9   : > { %3062 = vmatprep.subr.bf16.mxu1 %v11100_v6  ;;  %2949 = vmatprep.mubr.bf16.mxu0 %v12291_v25  ;;  %v11178_v6 = vld [vmem:[%s15020_s1 + $0x137c] ss:$40 sps:$4 sm:$0xff]  }
  0xca   : > { %3051 = vmatprep.mubr.bf16.mxu1 %v12291_v25 }
  0xcb   : > { %2961 = vmatpush1.bf16.msra.mxu0 %v11095_v7  ;;  %v11173_v7 = vld [vmem:[%s15020_s1 + $0x1370] ss:$40 sps:$4 sm:$0xff]  }
  0xcc   : > { %3063 = vmatpush1.bf16.msra.mxu1 %v11098_v8  ;;  %2962 = vmatprep.subr.bf16.mxu0 %v11103_v9  ;;  %v11176_v8 = vld [vmem:[%s15020_s1 + $0x1378] ss:$40 sps:$4 sm:$0xff]   ;;  %v11181_v9 = vld [vmem:[%s15020_s1 + $0x13c4] ss:$40 sps:$4 sm:$0xff]  }
  0xcd   : > { %3064 = vmatprep.subr.bf16.mxu1 %v11106_v10  ;;  %v11184_v10 = vld [vmem:[%s15020_s1 + $0x13cc] ss:$40 sps:$4 sm:$0xff]  }
  0xce   : > { %2950 = vmatmul.mubr.bf16.gmra.mrb[12].mxu0 %v12313_v31 }
  0xcf   : > { %3052 = vmatmul.mubr.bf16.gmra.mrb[12].mxu1 %v12313_v31  ;;  %2963 = vmatpush1.bf16.msra.mxu0 %v11101_v11  ;;  %v11179_v11 = vld [vmem:[%s15020_s1 + $0x13c0] ss:$40 sps:$4 sm:$0xff]  }
  0xd0   : > { %3065 = vmatpush1.bf16.msra.mxu1 %v11104_v12  ;;  %2964 = vmatprep.subr.bf16.mxu0 %v11109_v13  ;;  %v11182_v12 = vld [vmem:[%s15020_s1 + $0x13c8] ss:$40 sps:$4 sm:$0xff]   ;;  %v11187_v13 = vld [vmem:[%s15020_s1 + $0xa24] ss:$40 sps:$4 sm:$0xff]  }
  0xd1   : > { %3066 = vmatprep.subr.bf16.mxu1 %v11112_v14  ;;  %2990 = vmatprep.mubr.bf16.mxu0 %v12402_v5  ;;  %v11190_v14 = vld [vmem:[%s15020_s1 + $0xc] ss:$40 sps:$4 sm:$0xff]  }
  0xd2   : > { %3092 = vmatprep.mubr.bf16.mxu1 %v12402_v5 }
  0xd3   : > { %2965 = vmatpush1.bf16.msra.mxu0 %v11107_v15  ;;  %v11185_v15 = vld [vmem:[%s15020_s1 + $0xa20] ss:$40 sps:$4 sm:$0xff]  }
  0xd4   : > { %3067 = vmatpush1.bf16.msra.mxu1 %v11110_v16  ;;  %2966 = vmatprep.subr.bf16.mxu0 %v11115_v17  ;;  %v11188_v16 = vld [vmem:[%s15020_s1 + $0x8] ss:$40 sps:$4 sm:$0xff]   ;;  %v11193_v17 = vld [vmem:[%s15020_s1 + $0xa74] ss:$40 sps:$4 sm:$0xff]  }
  0xd5   : > { %3068 = vmatprep.subr.bf16.mxu1 %v11118_v18  ;;  %v11196_v18 = vld [vmem:[%s15020_s1 + $0x5c] ss:$40 sps:$4 sm:$0xff]  }
  0xd7   : > { %2967 = vmatpush1.bf16.msra.mxu0 %v11113_v19  ;;  %v11191_v19 = vld [vmem:[%s15020_s1 + $0xa70] ss:$40 sps:$4 sm:$0xff]  }
  0xd8   : > { %3069 = vmatpush1.bf16.msra.mxu1 %v11116_v20  ;;  %2968 = vmatprep.subr.bf16.mxu0 %v11121_v21  ;;  %v11194_v20 = vld [vmem:[%s15020_s1 + $0x58] ss:$40 sps:$4 sm:$0xff]   ;;  %v11199_v21 = vld [vmem:[%s15020_s1 + $0xac4] ss:$40 sps:$4 sm:$0xff]  }
  0xd9   : > { %3070 = vmatprep.subr.bf16.mxu1 %v11124_v23  ;;  %v11202_v23 = vld [vmem:[%s15020_s1 + $0xac] ss:$40 sps:$4 sm:$0xff]  }
  0xdb   : > { %2969 = vmatpush1.bf16.msra.mxu0 %v11119_v24  ;;  %v11197_v24 = vld [vmem:[%s15020_s1 + $0xac0] ss:$40 sps:$4 sm:$0xff]  }
  0xdc   : > { %3071 = vmatpush1.bf16.msra.mxu1 %v11122_v26  ;;  %2970 = vmatprep.subr.bf16.mxu0 %v11127_v27  ;;  %v11200_v26 = vld [vmem:[%s15020_s1 + $0xa8] ss:$40 sps:$4 sm:$0xff]   ;;  %v11205_v27 = vld [vmem:[%s15020_s1 + $0xb14] ss:$40 sps:$4 sm:$0xff]  }
  0xdd   : > { %3072 = vmatprep.subr.bf16.mxu1 %v11130_v28  ;;  %v11208_v28 = vld [vmem:[%s15020_s1 + $0xfc] ss:$40 sps:$4 sm:$0xff]  }
  0xdf   : > { %2971 = vmatpush1.bf16.msra.mxu0 %v11125_v30  ;;  %v11203_v30 = vld [vmem:[%s15020_s1 + $0xb10] ss:$40 sps:$4 sm:$0xff]  }
  0xe0   : > { %3073 = vmatpush1.bf16.msra.mxu1 %v11128_v32  ;;  %2972 = vmatprep.subr.bf16.mxu0 %v11133_v33  ;;  %v11206_v32 = vld [vmem:[%s15020_s1 + $0xf8] ss:$40 sps:$4 sm:$0xff]   ;;  %v11211_v33 = vld [vmem:[%s15020_s1 + $0xb64] ss:$40 sps:$4 sm:$0xff]  }
  0xe1   : > { %3074 = vmatprep.subr.bf16.mxu1 %v11136_v34  ;;  %v11214_v34 = vld [vmem:[%s15020_s1 + $0x14c] ss:$40 sps:$4 sm:$0xff]  }
  0xe3   : > { %2973 = vmatpush1.bf16.msra.mxu0 %v11131_v35  ;;  %v11971_v35 = vld [vmem:[%s12196_s28 + $0x4] ss:$16 sps:$4 sm:$0xff]  }
  0xe4   : > { %3075 = vmatpush1.bf16.msra.mxu1 %v11134_v36  ;;  %2974 = vmatprep.subr.bf16.mxu0 %v11139_v37  ;;  %v11209_v36 = vld [vmem:[%s15020_s1 + $0xb60] ss:$40 sps:$4 sm:$0xff]  }
  0xe5   : > { %3076 = vmatprep.subr.bf16.mxu1 %v11142_v38  ;;  %v11212_v37 = vld [vmem:[%s15020_s1 + $0x148] ss:$40 sps:$4 sm:$0xff]   ;;  %v11217_v38 = vld [vmem:[%s15020_s1 + $0xbb4] ss:$40 sps:$4 sm:$0xff]  }
  0xe7   : > { %2975 = vmatpush1.bf16.msra.mxu0 %v11137_v39  ;;  %v11215_v39 = vld [vmem:[%s15020_s1 + $0xbb0] ss:$40 sps:$4 sm:$0xff]  }
  0xe8   : > { %3077 = vmatpush1.bf16.msra.mxu1 %v11140_v40  ;;  %2976 = vmatprep.subr.bf16.mxu0 %v11145_v41  ;;  %v11218_v40 = vld [vmem:[%s15020_s1 + $0x198] ss:$40 sps:$4 sm:$0xff]   ;;  %v11223_v41 = vld [vmem:[%s15020_s1 + $0xc04] ss:$40 sps:$4 sm:$0xff]  }
  0xe9   : > { %3078 = vmatprep.subr.bf16.mxu1 %v11148_v42  ;;  %v11226_v42 = vld [vmem:[%s15020_s1 + $0x1ec] ss:$40 sps:$4 sm:$0xff]  }
  0xeb   : > { %2977 = vmatpush1.bf16.msra.mxu0 %v11143_v43  ;;  %v11221_v43 = vld [vmem:[%s15020_s1 + $0xc00] ss:$40 sps:$4 sm:$0xff]  }
  0xec   : > { %3079 = vmatpush1.bf16.msra.mxu1 %v11146_v44  ;;  %2978 = vmatprep.subr.bf16.mxu0 %v11151_v45  ;;  %v11224_v44 = vld [vmem:[%s15020_s1 + $0x1e8] ss:$40 sps:$4 sm:$0xff]   ;;  %v11229_v45 = vld [vmem:[%s15020_s1 + $0xc54] ss:$40 sps:$4 sm:$0xff]  }
  0xed   : > { %3080 = vmatprep.subr.bf16.mxu1 %v11154_v46  ;;  %v11232_v46 = vld [vmem:[%s15020_s1 + $0x23c] ss:$40 sps:$4 sm:$0xff]  }
  0xef   : > { %2979 = vmatpush1.bf16.msra.mxu0 %v11149_v47  ;;  %v11227_v47 = vld [vmem:[%s15020_s1 + $0xc50] ss:$40 sps:$4 sm:$0xff]  }
  0xf0   : > { %3081 = vmatpush1.bf16.msra.mxu1 %v11152_v48  ;;  %2980 = vmatprep.subr.bf16.mxu0 %v11157_v50  ;;  %v11230_v48 = vld [vmem:[%s15020_s1 + $0x238] ss:$40 sps:$4 sm:$0xff]   ;;  %v11235_v50 = vld [vmem:[%s15020_s1 + $0xca4] ss:$40 sps:$4 sm:$0xff]  }
  0xf1   : > { %3082 = vmatprep.subr.bf16.mxu1 %v11160_v52  ;;  %v11238_v52 = vld [vmem:[%s15020_s1 + $0x28c] ss:$40 sps:$4 sm:$0xff]  }
  0xf3   : > { %2981 = vmatpush1.bf16.msra.mxu0 %v11155_v55  ;;  %v11233_v55 = vld [vmem:[%s15020_s1 + $0xca0] ss:$40 sps:$4 sm:$0xff]  }
  0xf4   : > { %3083 = vmatpush1.bf16.msra.mxu1 %v11158_v56  ;;  %2982 = vmatprep.subr.bf16.mxu0 %v11163_v57  ;;  %v11236_v56 = vld [vmem:[%s15020_s1 + $0x288] ss:$40 sps:$4 sm:$0xff]   ;;  %v11241_v57 = vld [vmem:[%s15020_s1 + $0xcf4] ss:$40 sps:$4 sm:$0xff]  }
  0xf5   : > { %3084 = vmatprep.subr.bf16.mxu1 %v11166_v58  ;;  %v11244_v58 = vld [vmem:[%s15020_s1 + $0x2dc] ss:$40 sps:$4 sm:$0xff]  }
  0xf7   : > { %2983 = vmatpush1.bf16.msra.mxu0 %v11161_v60  ;;  %v11239_v60 = vld [vmem:[%s15020_s1 + $0xcf0] ss:$40 sps:$4 sm:$0xff]  }
  0xf8   : > { %3085 = vmatpush1.bf16.msra.mxu1 %v11164_v61  ;;  %2984 = vmatprep.subr.bf16.mxu0 %v11169_v62  ;;  %v11242_v61 = vld [vmem:[%s15020_s1 + $0x2d8] ss:$40 sps:$4 sm:$0xff]   ;;  %v11247_v62 = vld [vmem:[%s15020_s1 + $0xd44] ss:$40 sps:$4 sm:$0xff]  }
  0xf9   : > { %3086 = vmatprep.subr.bf16.mxu1 %v11172_v63  ;;  %v11250_v63 = vld [vmem:[%s15020_s1 + $0x32c] ss:$40 sps:$4 sm:$0xff]  }
  0xfb   : > { %2985 = vmatpush1.bf16.msra.mxu0 %v11167_v0  ;;  %v11245_v0 = vld [vmem:[%s15020_s1 + $0xd40] ss:$40 sps:$4 sm:$0xff]  }
  0xfc   : > { %3087 = vmatpush1.bf16.msra.mxu1 %v11170_v2  ;;  %2986 = vmatprep.subr.bf16.mxu0 %v11175_v3  ;;  %v11248_v2 = vld [vmem:[%s15020_s1 + $0x328] ss:$40 sps:$4 sm:$0xff]   ;;  %v11253_v3 = vld [vmem:[%s15020_s1 + $0xd94] ss:$40 sps:$4 sm:$0xff]  }
  0xfd   : > { %3088 = vmatprep.subr.bf16.mxu1 %v11178_v6  ;;  %v11256_v6 = vld [vmem:[%s15020_s1 + $0x37c] ss:$40 sps:$4 sm:$0xff]  }
  0xff   : > { %2987 = vmatpush1.bf16.msra.mxu0 %v11173_v7  ;;  %v11251_v7 = vld [vmem:[%s15020_s1 + $0xd90] ss:$40 sps:$4 sm:$0xff]  }
 0x100   : > { %3089 = vmatpush1.bf16.msra.mxu1 %v11176_v8  ;;  %2988 = vmatprep.subr.bf16.mxu0 %v11181_v9  ;;  %v11254_v8 = vld [vmem:[%s15020_s1 + $0x378] ss:$40 sps:$4 sm:$0xff]   ;;  %v11259_v9 = vld [vmem:[%s15020_s1 + $0xde4] ss:$40 sps:$4 sm:$0xff]  }
 0x101   : > { %3090 = vmatprep.subr.bf16.mxu1 %v11184_v10  ;;  %v11262_v10 = vld [vmem:[%s15020_s1 + $0x3cc] ss:$40 sps:$4 sm:$0xff]  }
 0x103   : > { %2989 = vmatpush1.bf16.msra.mxu0 %v11179_v11  ;;  %v11257_v11 = vld [vmem:[%s15020_s1 + $0xde0] ss:$40 sps:$4 sm:$0xff]  }
 0x104   : > { %3091 = vmatpush1.bf16.msra.mxu1 %v11182_v12  ;;  %3111 = vmatprep.subr.bf16.mxu0 %v11187_v13  ;;  %v11260_v12 = vld [vmem:[%s15020_s1 + $0x3c8] ss:$40 sps:$4 sm:$0xff]   ;;  %v11265_v13 = vld [vmem:[%s15020_s1 + $0xe34] ss:$40 sps:$4 sm:$0xff]  }
 0x105   : > { %4923 = vmatprep.subr.bf16.mxu1 %v11190_v14  ;;  %v11268_v14 = vld [vmem:[%s15020_s1 + $0x41c] ss:$40 sps:$4 sm:$0xff]  }
 0x106   : > { %2991 = vmatmul.mubr.bf16.vlgmr.msra.gmra.mrb[8].mxu0 %v12509_v49 }
 0x107   : > { %3093 = vmatmul.mubr.bf16.vlgmr.msra.gmra.mrb[8].mxu1 %v12509_v49  ;;  %3112 = vmatpush1.bf16.msra.mxu0 %v11185_v15  ;;  %v11263_v15 = vld [vmem:[%s15020_s1 + $0xe30] ss:$40 sps:$4 sm:$0xff]  }
 0x108   : > { %4924 = vmatpush1.bf16.msra.mxu1 %v11188_v16  ;;  %3113 = vmatprep.subr.bf16.mxu0 %v11193_v17  ;;  %v11266_v16 = vld [vmem:[%s15020_s1 + $0x418] ss:$40 sps:$4 sm:$0xff]   ;;  %v11271_v17 = vld [vmem:[%s15020_s1 + $0xe84] ss:$40 sps:$4 sm:$0xff]  }
 0x109   : > { %4925 = vmatprep.subr.bf16.mxu1 %v11196_v18  ;;  %3000 = vmatprep.mubr.bf16.mxu0 %v12518_v53  ;;  %v11274_v18 = vld [vmem:[%s15020_s1 + $0x46c] ss:$40 sps:$4 sm:$0xff]  }
 0x10a   : > { %3102 = vmatprep.mubr.bf16.mxu1 %v12518_v53 }
 0x10b   : > { %3114 = vmatpush1.bf16.msra.mxu0 %v11191_v19  ;;  %v11269_v19 = vld [vmem:[%s15020_s1 + $0xe80] ss:$40 sps:$4 sm:$0xff]  }
 0x10c   : > { %4926 = vmatpush1.bf16.msra.mxu1 %v11194_v20  ;;  %3115 = vmatprep.subr.bf16.mxu0 %v11199_v21  ;;  %v11272_v20 = vld [vmem:[%s15020_s1 + $0x468] ss:$40 sps:$4 sm:$0xff]   ;;  %v11277_v21 = vld [vmem:[%s15020_s1 + $0xed4] ss:$40 sps:$4 sm:$0xff]  }
 0x10d   : > { %4927 = vmatprep.subr.bf16.mxu1 %v11202_v23  ;;  %v11280_v23 = vld [vmem:[%s15020_s1 + $0x4bc] ss:$40 sps:$4 sm:$0xff]  }
 0x10e   : > { %3001 = vmatmul.mubr.bf16.gmra.mrb[12].mxu0 %v12537_v59 }
 0x10f   : > { %3103 = vmatmul.mubr.bf16.gmra.mrb[12].mxu1 %v12537_v59  ;;  %3116 = vmatpush1.bf16.msra.mxu0 %v11197_v24  ;;  %v11275_v24 = vld [vmem:[%s15020_s1 + $0xed0] ss:$40 sps:$4 sm:$0xff]  }
 0x110   : > { %4928 = vmatpush1.bf16.msra.mxu1 %v11200_v26  ;;  %3117 = vmatprep.subr.bf16.mxu0 %v11205_v27  ;;  %v11278_v26 = vld [vmem:[%s15020_s1 + $0x4b8] ss:$40 sps:$4 sm:$0xff]   ;;  %v11283_v27 = vld [vmem:[%s15020_s1 + $0xf24] ss:$40 sps:$4 sm:$0xff]  }
 0x111   : > { %4929 = vmatprep.subr.bf16.mxu1 %v11208_v28  ;;  %3143 = vmatprep.mubr.bf16.mxu0 %v12235_v1  ;;  %v11220_v1 = vld [vmem:[%s15020_s1 + $0x19c] ss:$40 sps:$4 sm:$0xff]   ;;  %v11286_v28 = vld [vmem:[%s15020_s1 + $0x50c] ss:$40 sps:$4 sm:$0xff]  }
 0x112   : > { %4955 = vmatprep.mubr.bf16.mxu1 %v11971_v35  ;;  %v11972_v35 = vld [vmem:[%s12196_s28] ss:$16 sps:$4 sm:$0xff]  }
 0x113   : > { %3118 = vmatpush1.bf16.msra.mxu0 %v11203_v30  ;;  %v11281_v30 = vld [vmem:[%s15020_s1 + $0xf20] ss:$40 sps:$4 sm:$0xff]  }
 0x114   : > { %4930 = vmatpush1.bf16.msra.mxu1 %v11206_v32  ;;  %3119 = vmatprep.subr.bf16.mxu0 %v11211_v33  ;;  %v11284_v32 = vld [vmem:[%s15020_s1 + $0x508] ss:$40 sps:$4 sm:$0xff]   ;;  %v11289_v33 = vld [vmem:[%s15020_s1 + $0xf74] ss:$40 sps:$4 sm:$0xff]  }
 0x115   : > { %4931 = vmatprep.subr.bf16.mxu1 %v11214_v34  ;;  %v11292_v34 = vld [vmem:[%s15020_s1 + $0x55c] ss:$40 sps:$4 sm:$0xff]  }
 0x117   : > { %3120 = vmatpush1.bf16.msra.mxu0 %v11209_v36  ;;  %v11287_v36 = vld [vmem:[%s15020_s1 + $0xf70] ss:$40 sps:$4 sm:$0xff]  }
 0x118   : > { %4932 = vmatpush1.bf16.msra.mxu1 %v11212_v37  ;;  %3121 = vmatprep.subr.bf16.mxu0 %v11217_v38  ;;  %v11290_v37 = vld [vmem:[%s15020_s1 + $0x558] ss:$40 sps:$4 sm:$0xff]   ;;  %v11295_v38 = vld [vmem:[%s15020_s1 + $0xfc4] ss:$40 sps:$4 sm:$0xff]  }
 0x119   : > { %4933 = vmatprep.subr.bf16.mxu1 %v11220_v1  ;;  %v11293_v1 = vld [vmem:[%s15020_s1 + $0xfc0] ss:$40 sps:$4 sm:$0xff]  }
 0x11b   : > { %3122 = vmatpush1.bf16.msra.mxu0 %v11215_v39  ;;  %v11296_v39 = vld [vmem:[%s15020_s1 + $0x5a8] ss:$40 sps:$4 sm:$0xff]  }
 0x11c   : > { %4934 = vmatpush1.bf16.msra.mxu1 %v11218_v40  ;;  %3123 = vmatprep.subr.bf16.mxu0 %v11223_v41  ;;  %v11301_v40 = vld [vmem:[%s15020_s1 + $0x1014] ss:$40 sps:$4 sm:$0xff]   ;;  %v11299_v41 = vld [vmem:[%s15020_s1 + $0x1010] ss:$40 sps:$4 sm:$0xff]  }
 0x11d   : > { %4935 = vmatprep.subr.bf16.mxu1 %v11226_v42  ;;  %v11302_v42 = vld [vmem:[%s15020_s1 + $0x5f8] ss:$40 sps:$4 sm:$0xff]  }
 0x11f   : > { %3124 = vmatpush1.bf16.msra.mxu0 %v11221_v43  ;;  %v11307_v43 = vld [vmem:[%s15020_s1 + $0x1064] ss:$40 sps:$4 sm:$0xff]  }
 0x120   : > { %4936 = vmatpush1.bf16.msra.mxu1 %v11224_v44  ;;  %3125 = vmatprep.subr.bf16.mxu0 %v11229_v45  ;;  %v11973_v44 = vld [vmem:[%s12196_s28 + $0xc] ss:$16 sps:$4 sm:$0xff]   ;;  %v11305_v45 = vld [vmem:[%s15020_s1 + $0x1060] ss:$40 sps:$4 sm:$0xff]  }
 0x121   : > { %4937 = vmatprep.subr.bf16.mxu1 %v11232_v46  ;;  %v11308_v46 = vld [vmem:[%s15020_s1 + $0x648] ss:$40 sps:$4 sm:$0xff]  }
 0x123   : > { %3126 = vmatpush1.bf16.msra.mxu0 %v11227_v47  ;;  %v11313_v47 = vld [vmem:[%s15020_s1 + $0x10b4] ss:$40 sps:$4 sm:$0xff]  }
 0x124   : > { %4938 = vmatpush1.bf16.msra.mxu1 %v11230_v48  ;;  %3127 = vmatprep.subr.bf16.mxu0 %v11235_v50  ;;  %v11311_v48 = vld [vmem:[%s15020_s1 + $0x10b0] ss:$40 sps:$4 sm:$0xff]  }
 0x125   : > { %4939 = vmatprep.subr.bf16.mxu1 %v11238_v52  ;;  %v11314_v50 = vld [vmem:[%s15020_s1 + $0x698] ss:$40 sps:$4 sm:$0xff]   ;;  %v11319_v52 = vld [vmem:[%s15020_s1 + $0x1104] ss:$40 sps:$4 sm:$0xff]  }
 0x127   : > { %3128 = vmatpush1.bf16.msra.mxu0 %v11233_v55  ;;  %v11322_v55 = vld [vmem:[%s15020_s1 + $0x6ec] ss:$40 sps:$4 sm:$0xff]  }
 0x128   : > { %4940 = vmatpush1.bf16.msra.mxu1 %v11236_v56  ;;  %3129 = vmatprep.subr.bf16.mxu0 %v11241_v57  ;;  %v11317_v56 = vld [vmem:[%s15020_s1 + $0x1100] ss:$40 sps:$4 sm:$0xff]  }
 0x129   : > { %4941 = vmatprep.subr.bf16.mxu1 %v11244_v58  ;;  %v11320_v57 = vld [vmem:[%s15020_s1 + $0x6e8] ss:$40 sps:$4 sm:$0xff]   ;;  %v11325_v58 = vld [vmem:[%s15020_s1 + $0x1154] ss:$40 sps:$4 sm:$0xff]  }
 0x12b   : > { %3130 = vmatpush1.bf16.msra.mxu0 %v11239_v60  ;;  %v11328_v60 = vld [vmem:[%s15020_s1 + $0x73c] ss:$40 sps:$4 sm:$0xff]  }
 0x12c   : > { %4942 = vmatpush1.bf16.msra.mxu1 %v11242_v61  ;;  %3131 = vmatprep.subr.bf16.mxu0 %v11247_v62  ;;  %v11323_v61 = vld [vmem:[%s15020_s1 + $0x1150] ss:$40 sps:$4 sm:$0xff]  }
 0x12d   : > { %4943 = vmatprep.subr.bf16.mxu1 %v11250_v63  ;;  %v11326_v62 = vld [vmem:[%s15020_s1 + $0x738] ss:$40 sps:$4 sm:$0xff]   ;;  %v11331_v63 = vld [vmem:[%s15020_s1 + $0x11a4] ss:$40 sps:$4 sm:$0xff]  }
 0x12f   : > { %3132 = vmatpush1.bf16.msra.mxu0 %v11245_v0  ;;  %v11334_v0 = vld [vmem:[%s15020_s1 + $0x78c] ss:$40 sps:$4 sm:$0xff]  }
 0x130   : > { %4944 = vmatpush1.bf16.msra.mxu1 %v11248_v2  ;;  %3133 = vmatprep.subr.bf16.mxu0 %v11253_v3  ;;  %v11329_v2 = vld [vmem:[%s15020_s1 + $0x11a0] ss:$40 sps:$4 sm:$0xff]  }
 0x131   : > { %4945 = vmatprep.subr.bf16.mxu1 %v11256_v6  ;;  %v11332_v3 = vld [vmem:[%s15020_s1 + $0x788] ss:$40 sps:$4 sm:$0xff]   ;;  %v11337_v6 = vld [vmem:[%s15020_s1 + $0x11f4] ss:$40 sps:$4 sm:$0xff]  }
 0x133   : > { %3134 = vmatpush1.bf16.msra.mxu0 %v11251_v7  ;;  %v11340_v7 = vld [vmem:[%s15020_s1 + $0x7dc] ss:$40 sps:$4 sm:$0xff]  }
 0x134   : > { %4946 = vmatpush1.bf16.msra.mxu1 %v11254_v8  ;;  %3135 = vmatprep.subr.bf16.mxu0 %v11259_v9  ;;  %v11335_v8 = vld [vmem:[%s15020_s1 + $0x11f0] ss:$40 sps:$4 sm:$0xff]  }
 0x135   : > { %4947 = vmatprep.subr.bf16.mxu1 %v11262_v10  ;;  %v11338_v9 = vld [vmem:[%s15020_s1 + $0x7d8] ss:$40 sps:$4 sm:$0xff]   ;;  %v11343_v10 = vld [vmem:[%s15020_s1 + $0x1244] ss:$40 sps:$4 sm:$0xff]  }
 0x137   : > { %3136 = vmatpush1.bf16.msra.mxu0 %v11257_v11  ;;  %v11346_v11 = vld [vmem:[%s15020_s1 + $0x82c] ss:$40 sps:$4 sm:$0xff]  }
 0x138   : > { %4948 = vmatpush1.bf16.msra.mxu1 %v11260_v12  ;;  %3137 = vmatprep.subr.bf16.mxu0 %v11265_v13  ;;  %v11341_v12 = vld [vmem:[%s15020_s1 + $0x1240] ss:$40 sps:$4 sm:$0xff]  }
 0x139   : > { %4949 = vmatprep.subr.bf16.mxu1 %v11268_v14  ;;  %v11344_v13 = vld [vmem:[%s15020_s1 + $0x828] ss:$40 sps:$4 sm:$0xff]   ;;  %v11349_v14 = vld [vmem:[%s15020_s1 + $0x1294] ss:$40 sps:$4 sm:$0xff]  }
 0x13b   : > { %3138 = vmatpush1.bf16.msra.mxu0 %v11263_v15  ;;  %v11352_v15 = vld [vmem:[%s15020_s1 + $0x87c] ss:$40 sps:$4 sm:$0xff]  }
 0x13c   : > { %4950 = vmatpush1.bf16.msra.mxu1 %v11266_v16  ;;  %3139 = vmatprep.subr.bf16.mxu0 %v11271_v17  ;;  %v11347_v16 = vld [vmem:[%s15020_s1 + $0x1290] ss:$40 sps:$4 sm:$0xff]  }
 0x13d   : > { %4951 = vmatprep.subr.bf16.mxu1 %v11274_v18  ;;  %v11350_v17 = vld [vmem:[%s15020_s1 + $0x878] ss:$40 sps:$4 sm:$0xff]   ;;  %v11355_v18 = vld [vmem:[%s15020_s1 + $0x12e4] ss:$40 sps:$4 sm:$0xff]  }
 0x13f   : > { %3140 = vmatpush1.bf16.msra.mxu0 %v11269_v19  ;;  %v11358_v19 = vld [vmem:[%s15020_s1 + $0x8cc] ss:$40 sps:$4 sm:$0xff]  }
 0x140   : > { %4952 = vmatpush1.bf16.msra.mxu1 %v11272_v20  ;;  %3141 = vmatprep.subr.bf16.mxu0 %v11277_v21  ;;  %v11353_v20 = vld [vmem:[%s15020_s1 + $0x12e0] ss:$40 sps:$4 sm:$0xff]  }
 0x141   : > { %4953 = vmatprep.subr.bf16.mxu1 %v11280_v23  ;;  %v11356_v21 = vld [vmem:[%s15020_s1 + $0x8c8] ss:$40 sps:$4 sm:$0xff]   ;;  %v11361_v23 = vld [vmem:[%s15020_s1 + $0x1334] ss:$40 sps:$4 sm:$0xff]  }
 0x143   : > { %3142 = vmatpush1.bf16.msra.mxu0 %v11275_v24  ;;  %v11364_v24 = vld [vmem:[%s15020_s1 + $0x91c] ss:$40 sps:$4 sm:$0xff]  }
 0x144   : > { %4954 = vmatpush1.bf16.msra.mxu1 %v11278_v26  ;;  %3162 = vmatprep.subr.bf16.mxu0 %v11283_v27  ;;  %v11359_v26 = vld [vmem:[%s15020_s1 + $0x1330] ss:$40 sps:$4 sm:$0xff]  }
 0x145   : > { %4974 = vmatprep.subr.bf16.mxu1 %v11286_v28  ;;  %v11362_v27 = vld [vmem:[%s15020_s1 + $0x918] ss:$40 sps:$4 sm:$0xff]   ;;  %v11367_v28 = vld [vmem:[%s15020_s1 + $0x1384] ss:$40 sps:$4 sm:$0xff]  }
 0x146   : > { %3144 = vmatmul.mubr.bf16.vlgmr.msra.gmra.mrb[16].mxu0 %v12282_v22  ;;  %v11298_v22 = vld [vmem:[%s15020_s1 + $0x5ac] ss:$40 sps:$4 sm:$0xff]  }
 0x147   : > { %4956 = vmatmul.mubr.bf16.vlgmr.msra.gmra.mrb[0].mxu1 %v11972_v35  ;;  %3163 = vmatpush1.bf16.msra.mxu0 %v11281_v30  ;;  %v11370_v30 = vld [vmem:[%s15020_s1 + $0x96c] ss:$40 sps:$4 sm:$0xff]   ;;  %v11376_v35 = vld [vmem:[%s15020_s1 + $0x9bc] ss:$40 sps:$4 sm:$0xff]  }
 0x148   : > { %4975 = vmatpush1.bf16.msra.mxu1 %v11284_v32  ;;  %3164 = vmatprep.subr.bf16.mxu0 %v11289_v33  ;;  %v11365_v32 = vld [vmem:[%s15020_s1 + $0x1380] ss:$40 sps:$4 sm:$0xff]  }
 0x149   : > { %4976 = vmatprep.subr.bf16.mxu1 %v11292_v34  ;;  %4965 = vmatprep.mubr.bf16.mxu1 %v12212_v51  ;;  %v11368_v33 = vld [vmem:[%s15020_s1 + $0x968] ss:$40 sps:$4 sm:$0xff]   ;;  %v11373_v34 = vld [vmem:[%s15020_s1 + $0x13d4] ss:$40 sps:$4 sm:$0xff]  }
 0x14a   : > { %3153 = vmatprep.mubr.bf16.mxu0 %v12291_v25  ;;  %v11304_v25 = vld [vmem:[%s15020_s1 + $0x5fc] ss:$40 sps:$4 sm:$0xff]  }
 0x14b   : > { %3165 = vmatpush1.bf16.msra.mxu0 %v11287_v36  ;;  %v11371_v36 = vld [vmem:[%s15020_s1 + $0x13d0] ss:$40 sps:$4 sm:$0xff]  }
 0x14c   : > { %4977 = vmatpush1.bf16.msra.mxu1 %v11290_v37  ;;  %3166 = vmatprep.subr.bf16.mxu0 %v11295_v38  ;;  %v11374_v37 = vld [vmem:[%s15020_s1 + $0x9b8] ss:$40 sps:$4 sm:$0xff]   ;;  %v11379_v38 = vld [vmem:[%s15020_s1 + $0x4] ss:$40 sps:$4 sm:$0xff]  }
 0x14d   : > { %4978 = vmatprep.subr.bf16.mxu1 %v11298_v22  ;;  %v11382_v22 = vld [vmem:[%s15020_s1 + $0x1c] ss:$40 sps:$4 sm:$0xff]  }
 0x14e   : > { %3154 = vmatmul.mubr.bf16.gmra.mrb[20].mxu0 %v12313_v31  ;;  %v11310_v31 = vld [vmem:[%s15020_s1 + $0x64c] ss:$40 sps:$4 sm:$0xff]  }
 0x14f   : > { %4966 = vmatmul.mubr.bf16.gmra.mrb[4].mxu1 %v12243_v4  ;;  %3167 = vmatpush1.bf16.msra.mxu0 %v11293_v1  ;;  %v11377_v1 = vld [vmem:[%s15020_s1] ss:$40 sps:$4 sm:$0xff]  }
 0x150   : > { %4979 = vmatpush1.bf16.msra.mxu1 %v11296_v39  ;;  %3168 = vmatprep.subr.bf16.mxu0 %v11301_v40  ;;  %v11380_v39 = vld [vmem:[%s15020_s1 + $0x18] ss:$40 sps:$4 sm:$0xff]   ;;  %v11385_v40 = vld [vmem:[%s15020_s1 + $0x54] ss:$40 sps:$4 sm:$0xff]  }
 0x151   : > { %4980 = vmatprep.subr.bf16.mxu1 %v11304_v25  ;;  %5006 = vmatprep.mubr.bf16.mxu1 %v11973_v44  ;;  %v11388_v25 = vld [vmem:[%s15020_s1 + $0x6c] ss:$40 sps:$4 sm:$0xff]   ;;  %v11394_v44 = vld [vmem:[%s15020_s1 + $0xbc] ss:$40 sps:$4 sm:$0xff]  }
 0x152   : > { %3194 = vmatprep.mubr.bf16.mxu0 %v12402_v5  ;;  %v11316_v5 = vld [vmem:[%s15020_s1 + $0x69c] ss:$40 sps:$4 sm:$0xff]  }
 0x153   : > { %3169 = vmatpush1.bf16.msra.mxu0 %v11299_v41  ;;  %v11383_v41 = vld [vmem:[%s15020_s1 + $0x50] ss:$40 sps:$4 sm:$0xff]  }
 0x154   : > { %4981 = vmatpush1.bf16.msra.mxu1 %v11302_v42  ;;  %3170 = vmatprep.subr.bf16.mxu0 %v11307_v43  ;;  %v11386_v42 = vld [vmem:[%s15020_s1 + $0x68] ss:$40 sps:$4 sm:$0xff]  }
 0x155   : > { %4982 = vmatprep.subr.bf16.mxu1 %v11310_v31  ;;  %v11974_v43 = vld [vmem:[%s12196_s28 + $0x8] ss:$16 sps:$4 sm:$0xff]   ;;  %v11391_v31 = vld [vmem:[%s15020_s1 + $0xa4] ss:$40 sps:$4 sm:$0xff]  }
 0x157   : > { %3171 = vmatpush1.bf16.msra.mxu0 %v11305_v45  ;;  %v11389_v45 = vld [vmem:[%s15020_s1 + $0xa0] ss:$40 sps:$4 sm:$0xff]  }
 0x158   : > { %4983 = vmatpush1.bf16.msra.mxu1 %v11308_v46  ;;  %3172 = vmatprep.subr.bf16.mxu0 %v11313_v47  ;;  %v11397_v46 = vld [vmem:[%s15020_s1 + $0xf4] ss:$40 sps:$4 sm:$0xff]  }
 0x159   : > { %4984 = vmatprep.subr.bf16.mxu1 %v11316_v5  ;;  %v11400_v47 = vld [vmem:[%s15020_s1 + $0x10c] ss:$40 sps:$4 sm:$0xff]   ;;  %v11395_v5 = vld [vmem:[%s15020_s1 + $0xf0] ss:$40 sps:$4 sm:$0xff]  }
 0x15b   : > { %3173 = vmatpush1.bf16.msra.mxu0 %v11311_v48  ;;  %v11403_v48 = vld [vmem:[%s15020_s1 + $0x144] ss:$40 sps:$4 sm:$0xff]  }
 0x15c   : > { %4985 = vmatpush1.bf16.msra.mxu1 %v11314_v50  ;;  %3174 = vmatprep.subr.bf16.mxu0 %v11319_v52  ;;  %v11406_v50 = vld [vmem:[%s15020_s1 + $0x15c] ss:$40 sps:$4 sm:$0xff]   ;;  %v11401_v52 = vld [vmem:[%s15020_s1 + $0x140] ss:$40 sps:$4 sm:$0xff]  }
 0x15d   : > { %4986 = vmatprep.subr.bf16.mxu1 %v11322_v55  ;;  %v11975_v55 = vld [vmem:[%s12196_s28 + $0x4] ss:$16 sps:$4 sm:$0xff]  }
 0x15f   : > { %3175 = vmatpush1.bf16.msra.mxu0 %v11317_v56  ;;  %v11409_v56 = vld [vmem:[%s15020_s1 + $0x194] ss:$40 sps:$4 sm:$0xff]  }
 0x160   : > { %4987 = vmatpush1.bf16.msra.mxu1 %v11320_v57  ;;  %3176 = vmatprep.subr.bf16.mxu0 %v11325_v58  ;;  %v11412_v57 = vld [vmem:[%s15020_s1 + $0x1ac] ss:$40 sps:$4 sm:$0xff]   ;;  %v11407_v58 = vld [vmem:[%s15020_s1 + $0x190] ss:$40 sps:$4 sm:$0xff]  }
 0x161   : > { %4988 = vmatprep.subr.bf16.mxu1 %v11328_v60  ;;  %v11410_v60 = vld [vmem:[%s15020_s1 + $0x1a8] ss:$40 sps:$4 sm:$0xff]  }
 0x163   : > { %3177 = vmatpush1.bf16.msra.mxu0 %v11323_v61  ;;  %v11415_v61 = vld [vmem:[%s15020_s1 + $0x1e4] ss:$40 sps:$4 sm:$0xff]  }
 0x164   : > { %4989 = vmatpush1.bf16.msra.mxu1 %v11326_v62  ;;  %3178 = vmatprep.subr.bf16.mxu0 %v11331_v63  ;;  %v11418_v62 = vld [vmem:[%s15020_s1 + $0x1fc] ss:$40 sps:$4 sm:$0xff]   ;;  %v11413_v63 = vld [vmem:[%s15020_s1 + $0x1e0] ss:$40 sps:$4 sm:$0xff]  }
 0x165   : > { %4990 = vmatprep.subr.bf16.mxu1 %v11334_v0  ;;  %v11416_v0 = vld [vmem:[%s15020_s1 + $0x1f8] ss:$40 sps:$4 sm:$0xff]  }
 0x167   : > { %3179 = vmatpush1.bf16.msra.mxu0 %v11329_v2  ;;  %v11421_v2 = vld [vmem:[%s15020_s1 + $0x234] ss:$40 sps:$4 sm:$0xff]  }
 0x168   : > { %4991 = vmatpush1.bf16.msra.mxu1 %v11332_v3  ;;  %3180 = vmatprep.subr.bf16.mxu0 %v11337_v6  ;;  %v11424_v3 = vld [vmem:[%s15020_s1 + $0x24c] ss:$40 sps:$4 sm:$0xff]   ;;  %v11419_v6 = vld [vmem:[%s15020_s1 + $0x230] ss:$40 sps:$4 sm:$0xff]  }
 0x169   : > { %4992 = vmatprep.subr.bf16.mxu1 %v11340_v7  ;;  %v11422_v7 = vld [vmem:[%s15020_s1 + $0x248] ss:$40 sps:$4 sm:$0xff]  }
 0x16b   : > { %3181 = vmatpush1.bf16.msra.mxu0 %v11335_v8  ;;  %v11427_v8 = vld [vmem:[%s15020_s1 + $0x284] ss:$40 sps:$4 sm:$0xff]  }
 0x16c   : > { %4993 = vmatpush1.bf16.msra.mxu1 %v11338_v9  ;;  %3182 = vmatprep.subr.bf16.mxu0 %v11343_v10  ;;  %v11430_v9 = vld [vmem:[%s15020_s1 + $0x29c] ss:$40 sps:$4 sm:$0xff]   ;;  %v11425_v10 = vld [vmem:[%s15020_s1 + $0x280] ss:$40 sps:$4 sm:$0xff]  }
 0x16d   : > { %4994 = vmatprep.subr.bf16.mxu1 %v11346_v11  ;;  %v11428_v11 = vld [vmem:[%s15020_s1 + $0x298] ss:$40 sps:$4 sm:$0xff]  }
 0x16f   : > { %3183 = vmatpush1.bf16.msra.mxu0 %v11341_v12  ;;  %v11433_v12 = vld [vmem:[%s15020_s1 + $0x2d4] ss:$40 sps:$4 sm:$0xff]  }
 0x170   : > { %4995 = vmatpush1.bf16.msra.mxu1 %v11344_v13  ;;  %3184 = vmatprep.subr.bf16.mxu0 %v11349_v14  ;;  %v11436_v13 = vld [vmem:[%s15020_s1 + $0x2ec] ss:$40 sps:$4 sm:$0xff]   ;;  %v11431_v14 = vld [vmem:[%s15020_s1 + $0x2d0] ss:$40 sps:$4 sm:$0xff]  }
 0x171   : > { %4996 = vmatprep.subr.bf16.mxu1 %v11352_v15  ;;  %v11434_v15 = vld [vmem:[%s15020_s1 + $0x2e8] ss:$40 sps:$4 sm:$0xff]  }
 0x173   : > { %3185 = vmatpush1.bf16.msra.mxu0 %v11347_v16  ;;  %v11439_v16 = vld [vmem:[%s15020_s1 + $0x324] ss:$40 sps:$4 sm:$0xff]  }
 0x174   : > { %4997 = vmatpush1.bf16.msra.mxu1 %v11350_v17  ;;  %3186 = vmatprep.subr.bf16.mxu0 %v11355_v18  ;;  %v11442_v17 = vld [vmem:[%s15020_s1 + $0x33c] ss:$40 sps:$4 sm:$0xff]   ;;  %v11437_v18 = vld [vmem:[%s15020_s1 + $0x320] ss:$40 sps:$4 sm:$0xff]  }
 0x175   : > { %4998 = vmatprep.subr.bf16.mxu1 %v11358_v19  ;;  %v11440_v19 = vld [vmem:[%s15020_s1 + $0x338] ss:$40 sps:$4 sm:$0xff]  }
 0x177   : > { %3187 = vmatpush1.bf16.msra.mxu0 %v11353_v20  ;;  %v11445_v20 = vld [vmem:[%s15020_s1 + $0x374] ss:$40 sps:$4 sm:$0xff]  }
 0x178   : > { %4999 = vmatpush1.bf16.msra.mxu1 %v11356_v21  ;;  %3188 = vmatprep.subr.bf16.mxu0 %v11361_v23  ;;  %v11448_v21 = vld [vmem:[%s15020_s1 + $0x38c] ss:$40 sps:$4 sm:$0xff]   ;;  %v11443_v23 = vld [vmem:[%s15020_s1 + $0x370] ss:$40 sps:$4 sm:$0xff]  }
 0x179   : > { %5000 = vmatprep.subr.bf16.mxu1 %v11364_v24  ;;  %v11446_v24 = vld [vmem:[%s15020_s1 + $0x388] ss:$40 sps:$4 sm:$0xff]  }
 0x17b   : > { %3189 = vmatpush1.bf16.msra.mxu0 %v11359_v26  ;;  %v11451_v26 = vld [vmem:[%s15020_s1 + $0x3c4] ss:$40 sps:$4 sm:$0xff]  }
 0x17c   : > { %5001 = vmatpush1.bf16.msra.mxu1 %v11362_v27  ;;  %3190 = vmatprep.subr.bf16.mxu0 %v11367_v28  ;;  %v11454_v27 = vld [vmem:[%s15020_s1 + $0x3dc] ss:$40 sps:$4 sm:$0xff]   ;;  %v11449_v28 = vld [vmem:[%s15020_s1 + $0x3c0] ss:$40 sps:$4 sm:$0xff]  }
 0x17d   : > { %5002 = vmatprep.subr.bf16.mxu1 %v11370_v30  ;;  %v11452_v30 = vld [vmem:[%s15020_s1 + $0x3d8] ss:$40 sps:$4 sm:$0xff]  }
 0x17f   : > { %3191 = vmatpush1.bf16.msra.mxu0 %v11365_v32  ;;  %v11457_v32 = vld [vmem:[%s15020_s1 + $0x414] ss:$40 sps:$4 sm:$0xff]  }
 0x180   : > { %5003 = vmatpush1.bf16.msra.mxu1 %v11368_v33  ;;  %3192 = vmatprep.subr.bf16.mxu0 %v11373_v34  ;;  %v11460_v33 = vld [vmem:[%s15020_s1 + $0x42c] ss:$40 sps:$4 sm:$0xff]   ;;  %v11455_v34 = vld [vmem:[%s15020_s1 + $0x410] ss:$40 sps:$4 sm:$0xff]  }
 0x181   : > { %5004 = vmatprep.subr.bf16.mxu1 %v11376_v35  ;;  %v11458_v35 = vld [vmem:[%s15020_s1 + $0x428] ss:$40 sps:$4 sm:$0xff]  }
 0x183   : > { %3193 = vmatpush1.bf16.msra.mxu0 %v11371_v36  ;;  %v11463_v36 = vld [vmem:[%s15020_s1 + $0x464] ss:$40 sps:$4 sm:$0xff]  }
 0x184   : > { %5005 = vmatpush1.bf16.msra.mxu1 %v11374_v37  ;;  %4821 = vmatprep.subr.bf16.mxu0 %v11379_v38  ;;  %v11466_v37 = vld [vmem:[%s15020_s1 + $0x47c] ss:$40 sps:$4 sm:$0xff]   ;;  %v11461_v38 = vld [vmem:[%s15020_s1 + $0x460] ss:$40 sps:$4 sm:$0xff]  }
 0x185   : > { %5127 = vmatprep.subr.bf16.mxu1 %v11382_v22  ;;  %v11464_v22 = vld [vmem:[%s15020_s1 + $0x478] ss:$40 sps:$4 sm:$0xff]  }
 0x186   : > { %3195 = vmatmul.mubr.bf16.vlgmr.msra.gmra.mrb[16].mxu0 %v12509_v49  ;;  %v11392_v49 = vld [vmem:[%s15020_s1 + $0xb8] ss:$40 sps:$4 sm:$0xff]  }
 0x187   : > { %5007 = vmatmul.mubr.bf16.vlgmr.msra.gmra.mrb[0].mxu1 %v11974_v43  ;;  %4822 = vmatpush1.bf16.msra.mxu0 %v11377_v1  ;;  %v11469_v1 = vld [vmem:[%s15020_s1 + $0x4b4] ss:$40 sps:$4 sm:$0xff]   ;;  %v11473_v43 = vld [vmem:[%s15020_s1 + $0x500] ss:$40 sps:$4 sm:$0xff]  }
 0x188   : > { %5128 = vmatpush1.bf16.msra.mxu1 %v11380_v39  ;;  %4823 = vmatprep.subr.bf16.mxu0 %v11385_v40  ;;  %v11472_v39 = vld [vmem:[%s15020_s1 + $0x4cc] ss:$40 sps:$4 sm:$0xff]   ;;  %v11467_v40 = vld [vmem:[%s15020_s1 + $0x4b0] ss:$40 sps:$4 sm:$0xff]  }
 0x189   : > { %5129 = vmatprep.subr.bf16.mxu1 %v11388_v25  ;;  %5016 = vmatprep.mubr.bf16.mxu1 %v12380_v54  ;;  %v11470_v25 = vld [vmem:[%s15020_s1 + $0x4c8] ss:$40 sps:$4 sm:$0xff]  }
 0x18a   : > { %3204 = vmatprep.mubr.bf16.mxu0 %v12518_v53  ;;  %v11398_v53 = vld [vmem:[%s15020_s1 + $0x108] ss:$40 sps:$4 sm:$0xff]  }
 0x18b   : > { %4824 = vmatpush1.bf16.msra.mxu0 %v11383_v41  ;;  %v11475_v41 = vld [vmem:[%s15020_s1 + $0x504] ss:$40 sps:$4 sm:$0xff]  }
 0x18c   : > { %5130 = vmatpush1.bf16.msra.mxu1 %v11386_v42  ;;  %4825 = vmatprep.subr.bf16.mxu0 %v11391_v31  ;;  %v11478_v42 = vld [vmem:[%s15020_s1 + $0x51c] ss:$40 sps:$4 sm:$0xff]   ;;  %v11476_v31 = vld [vmem:[%s15020_s1 + $0x518] ss:$40 sps:$4 sm:$0xff]  }
 0x18d   : > { %5131 = vmatprep.subr.bf16.mxu1 %v11394_v44  ;;  %v11481_v44 = vld [vmem:[%s15020_s1 + $0x554] ss:$40 sps:$4 sm:$0xff]  }
 0x18e   : > { %3205 = vmatmul.mubr.bf16.gmra.mrb[20].mxu0 %v12537_v59  ;;  %v11404_v59 = vld [vmem:[%s15020_s1 + $0x158] ss:$40 sps:$4 sm:$0xff]  }
 0x18f   : > { %5017 = vmatmul.mubr.bf16.gmra.mrb[4].mxu1 %v12469_v29  ;;  %4826 = vmatpush1.bf16.msra.mxu0 %v11389_v45  ;;  %v11484_v45 = vld [vmem:[%s15020_s1 + $0x56c] ss:$40 sps:$4 sm:$0xff]  }
 0x190   : > { %5132 = vmatpush1.bf16.msra.mxu1 %v11392_v49  ;;  %4827 = vmatprep.subr.bf16.mxu0 %v11397_v46  ;;  %v11479_v49 = vld [vmem:[%s15020_s1 + $0x550] ss:$40 sps:$4 sm:$0xff]  }
 0x191   : > { %5133 = vmatprep.subr.bf16.mxu1 %v11400_v47  ;;  %4853 = vmatprep.mubr.bf16.mxu0 %v11975_v55  ;;  %v11482_v46 = vld [vmem:[%s15020_s1 + $0x568] ss:$40 sps:$4 sm:$0xff]  }
 0x192   : > { %5159 = vmatprep.mubr.bf16.mxu1 %v11975_v55  ;;  %v13529_v47 = vld [vmem:[%s12196_s28] ss:$16 sps:$4 sm:$0xff]  }
 0x193   : > { %4828 = vmatpush1.bf16.msra.mxu0 %v11395_v5  ;;  %v11487_v5 = vld [vmem:[%s15020_s1 + $0x5a4] ss:$40 sps:$4 sm:$0xff]   ;;  %v11491_v55 = vld [vmem:[%s15020_s1 + $0x5f0] ss:$40 sps:$4 sm:$0xff]  }
 0x194   : > { %5134 = vmatpush1.bf16.msra.mxu1 %v11398_v53  ;;  %4829 = vmatprep.subr.bf16.mxu0 %v11403_v48  ;;  %v11490_v53 = vld [vmem:[%s15020_s1 + $0x5bc] ss:$40 sps:$4 sm:$0xff]   ;;  %v11485_v48 = vld [vmem:[%s15020_s1 + $0x5a0] ss:$40 sps:$4 sm:$0xff]  }
 0x195   : > { %5135 = vmatprep.subr.bf16.mxu1 %v11406_v50  ;;  %v11488_v50 = vld [vmem:[%s15020_s1 + $0x5b8] ss:$40 sps:$4 sm:$0xff]  }
 0x197   : > { %4830 = vmatpush1.bf16.msra.mxu0 %v11401_v52  ;;  %v11493_v52 = vld [vmem:[%s15020_s1 + $0x5f4] ss:$40 sps:$4 sm:$0xff]  }
 0x198   : > { %5136 = vmatpush1.bf16.msra.mxu1 %v11404_v59  ;;  %4831 = vmatprep.subr.bf16.mxu0 %v11409_v56  ;;  %v11496_v59 = vld [vmem:[%s15020_s1 + $0x60c] ss:$40 sps:$4 sm:$0xff]   ;;  %v11494_v56 = vld [vmem:[%s15020_s1 + $0x608] ss:$40 sps:$4 sm:$0xff]  }
 0x199   : > { %5137 = vmatprep.subr.bf16.mxu1 %v11412_v57  ;;  %v11499_v57 = vld [vmem:[%s15020_s1 + $0x644] ss:$40 sps:$4 sm:$0xff]  }
 0x19b   : > { %4832 = vmatpush1.bf16.msra.mxu0 %v11407_v58  ;;  %v11502_v58 = vld [vmem:[%s15020_s1 + $0x65c] ss:$40 sps:$4 sm:$0xff]  }
 0x19c   : > { %5138 = vmatpush1.bf16.msra.mxu1 %v11410_v60  ;;  %4833 = vmatprep.subr.bf16.mxu0 %v11415_v61  ;;  %v11497_v60 = vld [vmem:[%s15020_s1 + $0x640] ss:$40 sps:$4 sm:$0xff]  }
 0x19d   : > { %5139 = vmatprep.subr.bf16.mxu1 %v11418_v62  ;;  %v11500_v61 = vld [vmem:[%s15020_s1 + $0x658] ss:$40 sps:$4 sm:$0xff]   ;;  %v13574_v62 = vld [vmem:[%s12196_s28 + $0xc] ss:$16 sps:$4 sm:$0xff]  }
 0x19f   : > { %4834 = vmatpush1.bf16.msra.mxu0 %v11413_v63  ;;  %v11505_v63 = vld [vmem:[%s15020_s1 + $0x694] ss:$40 sps:$4 sm:$0xff]  }
 0x1a0   : > { %5140 = vmatpush1.bf16.msra.mxu1 %v11416_v0  ;;  %4835 = vmatprep.subr.bf16.mxu0 %v11421_v2  ;;  %v11508_v0 = vld [vmem:[%s15020_s1 + $0x6ac] ss:$40 sps:$4 sm:$0xff]   ;;  %v11503_v2 = vld [vmem:[%s15020_s1 + $0x690] ss:$40 sps:$4 sm:$0xff]  }
 0x1a1   : > { %5141 = vmatprep.subr.bf16.mxu1 %v11424_v3  ;;  %v11506_v3 = vld [vmem:[%s15020_s1 + $0x6a8] ss:$40 sps:$4 sm:$0xff]  }
 0x1a3   : > { %4836 = vmatpush1.bf16.msra.mxu0 %v11419_v6  ;;  %v11511_v6 = vld [vmem:[%s15020_s1 + $0x6e4] ss:$40 sps:$4 sm:$0xff]  }
 0x1a4   : > { %5142 = vmatpush1.bf16.msra.mxu1 %v11422_v7  ;;  %4837 = vmatprep.subr.bf16.mxu0 %v11427_v8  ;;  %v11514_v7 = vld [vmem:[%s15020_s1 + $0x6fc] ss:$40 sps:$4 sm:$0xff]   ;;  %v11509_v8 = vld [vmem:[%s15020_s1 + $0x6e0] ss:$40 sps:$4 sm:$0xff]  }
 0x1a5   : > { %5143 = vmatprep.subr.bf16.mxu1 %v11430_v9  ;;  %v11512_v9 = vld [vmem:[%s15020_s1 + $0x6f8] ss:$40 sps:$4 sm:$0xff]  }
 0x1a7   : > { %4838 = vmatpush1.bf16.msra.mxu0 %v11425_v10  ;;  %v11517_v10 = vld [vmem:[%s15020_s1 + $0x734] ss:$40 sps:$4 sm:$0xff]  }
 0x1a8   : > { %5144 = vmatpush1.bf16.msra.mxu1 %v11428_v11  ;;  %4839 = vmatprep.subr.bf16.mxu0 %v11433_v12  ;;  %v11520_v11 = vld [vmem:[%s15020_s1 + $0x74c] ss:$40 sps:$4 sm:$0xff]   ;;  %v11515_v12 = vld [vmem:[%s15020_s1 + $0x730] ss:$40 sps:$4 sm:$0xff]  }
 0x1a9   : > { %5145 = vmatprep.subr.bf16.mxu1 %v11436_v13  ;;  %v11518_v13 = vld [vmem:[%s15020_s1 + $0x748] ss:$40 sps:$4 sm:$0xff]  }
 0x1ab   : > { %4840 = vmatpush1.bf16.msra.mxu0 %v11431_v14  ;;  %v11523_v14 = vld [vmem:[%s15020_s1 + $0x784] ss:$40 sps:$4 sm:$0xff]  }
 0x1ac   : > { %5146 = vmatpush1.bf16.msra.mxu1 %v11434_v15  ;;  %4841 = vmatprep.subr.bf16.mxu0 %v11439_v16  ;;  %v11526_v15 = vld [vmem:[%s15020_s1 + $0x79c] ss:$40 sps:$4 sm:$0xff]   ;;  %v11521_v16 = vld [vmem:[%s15020_s1 + $0x780] ss:$40 sps:$4 sm:$0xff]  }
 0x1ad   : > { %5147 = vmatprep.subr.bf16.mxu1 %v11442_v17  ;;  %v11524_v17 = vld [vmem:[%s15020_s1 + $0x798] ss:$40 sps:$4 sm:$0xff]  }
 0x1af   : > { %4842 = vmatpush1.bf16.msra.mxu0 %v11437_v18  ;;  %v11529_v18 = vld [vmem:[%s15020_s1 + $0x7d4] ss:$40 sps:$4 sm:$0xff]  }
 0x1b0   : > { %5148 = vmatpush1.bf16.msra.mxu1 %v11440_v19  ;;  %4843 = vmatprep.subr.bf16.mxu0 %v11445_v20  ;;  %v11532_v19 = vld [vmem:[%s15020_s1 + $0x7ec] ss:$40 sps:$4 sm:$0xff]   ;;  %v11527_v20 = vld [vmem:[%s15020_s1 + $0x7d0] ss:$40 sps:$4 sm:$0xff]  }
 0x1b1   : > { %5149 = vmatprep.subr.bf16.mxu1 %v11448_v21  ;;  %v11530_v21 = vld [vmem:[%s15020_s1 + $0x7e8] ss:$40 sps:$4 sm:$0xff]  }
 0x1b3   : > { %4844 = vmatpush1.bf16.msra.mxu0 %v11443_v23  ;;  %v11535_v23 = vld [vmem:[%s15020_s1 + $0x824] ss:$40 sps:$4 sm:$0xff]  }
 0x1b4   : > { %5150 = vmatpush1.bf16.msra.mxu1 %v11446_v24  ;;  %4845 = vmatprep.subr.bf16.mxu0 %v11451_v26  ;;  %v11538_v24 = vld [vmem:[%s15020_s1 + $0x83c] ss:$40 sps:$4 sm:$0xff]   ;;  %v11533_v26 = vld [vmem:[%s15020_s1 + $0x820] ss:$40 sps:$4 sm:$0xff]  }
 0x1b5   : > { %5151 = vmatprep.subr.bf16.mxu1 %v11454_v27  ;;  %v11536_v27 = vld [vmem:[%s15020_s1 + $0x838] ss:$40 sps:$4 sm:$0xff]  }
 0x1b7   : > { %4846 = vmatpush1.bf16.msra.mxu0 %v11449_v28  ;;  %v11541_v28 = vld [vmem:[%s15020_s1 + $0x874] ss:$40 sps:$4 sm:$0xff]  }
 0x1b8   : > { %5152 = vmatpush1.bf16.msra.mxu1 %v11452_v30  ;;  %4847 = vmatprep.subr.bf16.mxu0 %v11457_v32  ;;  %v11544_v30 = vld [vmem:[%s15020_s1 + $0x88c] ss:$40 sps:$4 sm:$0xff]   ;;  %v11539_v32 = vld [vmem:[%s15020_s1 + $0x870] ss:$40 sps:$4 sm:$0xff]  }
 0x1b9   : > { %5153 = vmatprep.subr.bf16.mxu1 %v11460_v33  ;;  %v11542_v33 = vld [vmem:[%s15020_s1 + $0x888] ss:$40 sps:$4 sm:$0xff]  }
 0x1bb   : > { %4848 = vmatpush1.bf16.msra.mxu0 %v11455_v34  ;;  %v11547_v34 = vld [vmem:[%s15020_s1 + $0x8c4] ss:$40 sps:$4 sm:$0xff]  }
 0x1bc   : > { %5154 = vmatpush1.bf16.msra.mxu1 %v11458_v35  ;;  %4849 = vmatprep.subr.bf16.mxu0 %v11463_v36  ;;  %v11550_v35 = vld [vmem:[%s15020_s1 + $0x8dc] ss:$40 sps:$4 sm:$0xff]   ;;  %v11545_v36 = vld [vmem:[%s15020_s1 + $0x8c0] ss:$40 sps:$4 sm:$0xff]  }
 0x1bd   : > { %5155 = vmatprep.subr.bf16.mxu1 %v11466_v37  ;;  %v11548_v37 = vld [vmem:[%s15020_s1 + $0x8d8] ss:$40 sps:$4 sm:$0xff]  }
 0x1bf   : > { %4850 = vmatpush1.bf16.msra.mxu0 %v11461_v38  ;;  %v11553_v38 = vld [vmem:[%s15020_s1 + $0x914] ss:$40 sps:$4 sm:$0xff]  }
 0x1c0   : > { %5156 = vmatpush1.bf16.msra.mxu1 %v11464_v22  ;;  %4851 = vmatprep.subr.bf16.mxu0 %v11469_v1  ;;  %v11556_v22 = vld [vmem:[%s15020_s1 + $0x92c] ss:$40 sps:$4 sm:$0xff]   ;;  %v11551_v1 = vld [vmem:[%s15020_s1 + $0x910] ss:$40 sps:$4 sm:$0xff]  }
 0x1c1   : > { %5157 = vmatprep.subr.bf16.mxu1 %v11472_v39  ;;  %v11554_v39 = vld [vmem:[%s15020_s1 + $0x928] ss:$40 sps:$4 sm:$0xff]  }
 0x1c3   : > { %4852 = vmatpush1.bf16.msra.mxu0 %v11467_v40  ;;  %v11559_v40 = vld [vmem:[%s15020_s1 + $0x964] ss:$40 sps:$4 sm:$0xff]  }
 0x1c4   : > { %5158 = vmatpush1.bf16.msra.mxu1 %v11470_v25  ;;  %4872 = vmatprep.subr.bf16.mxu0 %v11475_v41  ;;  %v11562_v25 = vld [vmem:[%s15020_s1 + $0x97c] ss:$40 sps:$4 sm:$0xff]   ;;  %v11557_v41 = vld [vmem:[%s15020_s1 + $0x960] ss:$40 sps:$4 sm:$0xff]  }
 0x1c5   : > { %5178 = vmatprep.subr.bf16.mxu1 %v11478_v42  ;;  %v11560_v42 = vld [vmem:[%s15020_s1 + $0x978] ss:$40 sps:$4 sm:$0xff]  }
 0x1c6   : > { %4854 = vmatmul.mubr.bf16.vlgmr.msra.gmra.mrb[0].mxu0 %v13529_v47 }
 0x1c7   : > { %5160 = vmatmul.mubr.bf16.vlgmr.msra.gmra.mrb[8].mxu1 %v13529_v47  ;;  %4873 = vmatpush1.bf16.msra.mxu0 %v11473_v43  ;;  %v11565_v43 = vld [vmem:[%s15020_s1 + $0x9b4] ss:$40 sps:$4 sm:$0xff]  }
 0x1c8   : > { %5179 = vmatpush1.bf16.msra.mxu1 %v11476_v31  ;;  %4874 = vmatprep.subr.bf16.mxu0 %v11481_v44  ;;  %v11568_v31 = vld [vmem:[%s15020_s1 + $0x9cc] ss:$40 sps:$4 sm:$0xff]   ;;  %v11563_v44 = vld [vmem:[%s15020_s1 + $0x9b0] ss:$40 sps:$4 sm:$0xff]  }
 0x1c9   : > { %5180 = vmatprep.subr.bf16.mxu1 %v11484_v45  ;;  %4863 = vmatprep.mubr.bf16.mxu0 %v12212_v51  ;;  %v11566_v45 = vld [vmem:[%s15020_s1 + $0x9c8] ss:$40 sps:$4 sm:$0xff]  }
 0x1ca   : > { %5169 = vmatprep.mubr.bf16.mxu1 %v12212_v51 }
 0x1cb   : > { %4875 = vmatpush1.bf16.msra.mxu0 %v11479_v49  ;;  %v11571_v49 = vld [vmem:[%s15020_s1 + $0x14] ss:$40 sps:$4 sm:$0xff]  }
 0x1cc   : > { %5181 = vmatpush1.bf16.msra.mxu1 %v11482_v46  ;;  %4876 = vmatprep.subr.bf16.mxu0 %v11487_v5  ;;  %v11569_v46 = vld [vmem:[%s15020_s1 + $0x10] ss:$40 sps:$4 sm:$0xff]   ;;  %v11574_v5 = vld [vmem:[%s15020_s1 + $0x64] ss:$40 sps:$4 sm:$0xff]  }
 0x1cd   : > { %5182 = vmatprep.subr.bf16.mxu1 %v11490_v53  ;;  %v13720_v53 = vld [vmem:[%s12196_s28 + $0x8] ss:$16 sps:$4 sm:$0xff]  }
 0x1ce   : > { %4864 = vmatmul.mubr.bf16.gmra.mrb[4].mxu0 %v12243_v4 }
 0x1cf   : > { %5170 = vmatmul.mubr.bf16.gmra.mrb[12].mxu1 %v12243_v4  ;;  %4877 = vmatpush1.bf16.msra.mxu0 %v11485_v48  ;;  %v11572_v48 = vld [vmem:[%s15020_s1 + $0x60] ss:$40 sps:$4 sm:$0xff]  }
 0x1d0   : > { %5183 = vmatpush1.bf16.msra.mxu1 %v11488_v50  ;;  %4878 = vmatprep.subr.bf16.mxu0 %v11493_v52  ;;  %v11577_v50 = vld [vmem:[%s15020_s1 + $0xb4] ss:$40 sps:$4 sm:$0xff]   ;;  %v11575_v52 = vld [vmem:[%s15020_s1 + $0xb0] ss:$40 sps:$4 sm:$0xff]  }
 0x1d1   : > { %5184 = vmatprep.subr.bf16.mxu1 %v11496_v59  ;;  %4904 = vmatprep.mubr.bf16.mxu0 %v13574_v62  ;;  %v11580_v59 = vld [vmem:[%s15020_s1 + $0x104] ss:$40 sps:$4 sm:$0xff]  }
 0x1d2   : > { %5210 = vmatprep.mubr.bf16.mxu1 %v13574_v62 }
 0x1d3   : > { %4879 = vmatpush1.bf16.msra.mxu0 %v11491_v55  ;;  %v11578_v55 = vld [vmem:[%s15020_s1 + $0x100] ss:$40 sps:$4 sm:$0xff]  }
 0x1d4   : > { %5185 = vmatpush1.bf16.msra.mxu1 %v11494_v56  ;;  %4880 = vmatprep.subr.bf16.mxu0 %v11499_v57  ;;  %v11583_v56 = vld [vmem:[%s15020_s1 + $0x154] ss:$40 sps:$4 sm:$0xff]  }
 0x1d5   : > { %5186 = vmatprep.subr.bf16.mxu1 %v11502_v58  ;;  %v13747_v57 = vld [vmem:[%s12196_s28 + $0x4] ss:$16 sps:$4 sm:$0xff]   ;;  %v11581_v58 = vld [vmem:[%s15020_s1 + $0x150] ss:$40 sps:$4 sm:$0xff]  }
 0x1d7   : > { %4881 = vmatpush1.bf16.msra.mxu0 %v11497_v60  ;;  %v11586_v60 = vld [vmem:[%s15020_s1 + $0x1a4] ss:$40 sps:$4 sm:$0xff]  }
 0x1d8   : > { %5187 = vmatpush1.bf16.msra.mxu1 %v11500_v61  ;;  %4882 = vmatprep.subr.bf16.mxu0 %v11505_v63  ;;  %v11584_v61 = vld [vmem:[%s15020_s1 + $0x1a0] ss:$40 sps:$4 sm:$0xff]   ;;  %v11589_v63 = vld [vmem:[%s15020_s1 + $0x1f4] ss:$40 sps:$4 sm:$0xff]  }
 0x1d9   : > { %5188 = vmatprep.subr.bf16.mxu1 %v11508_v0  ;;  %v11587_v0 = vld [vmem:[%s15020_s1 + $0x1f0] ss:$40 sps:$4 sm:$0xff]  }
 0x1db   : > { %4883 = vmatpush1.bf16.msra.mxu0 %v11503_v2  ;;  %v11592_v2 = vld [vmem:[%s15020_s1 + $0x244] ss:$40 sps:$4 sm:$0xff]  }
 0x1dc   : > { %5189 = vmatpush1.bf16.msra.mxu1 %v11506_v3  ;;  %4884 = vmatprep.subr.bf16.mxu0 %v11511_v6  ;;  %v11590_v3 = vld [vmem:[%s15020_s1 + $0x240] ss:$40 sps:$4 sm:$0xff]   ;;  %v11595_v6 = vld [vmem:[%s15020_s1 + $0x294] ss:$40 sps:$4 sm:$0xff]  }
 0x1dd   : > { %5190 = vmatprep.subr.bf16.mxu1 %v11514_v7  ;;  %v11593_v7 = vld [vmem:[%s15020_s1 + $0x290] ss:$40 sps:$4 sm:$0xff]  }
 0x1df   : > { %4885 = vmatpush1.bf16.msra.mxu0 %v11509_v8  ;;  %v11598_v8 = vld [vmem:[%s15020_s1 + $0x2e4] ss:$40 sps:$4 sm:$0xff]  }
 0x1e0   : > { %5191 = vmatpush1.bf16.msra.mxu1 %v11512_v9  ;;  %4886 = vmatprep.subr.bf16.mxu0 %v11517_v10  ;;  %v11596_v9 = vld [vmem:[%s15020_s1 + $0x2e0] ss:$40 sps:$4 sm:$0xff]   ;;  %v11601_v10 = vld [vmem:[%s15020_s1 + $0x334] ss:$40 sps:$4 sm:$0xff]  }
 0x1e1   : > { %5192 = vmatprep.subr.bf16.mxu1 %v11520_v11  ;;  %v11599_v11 = vld [vmem:[%s15020_s1 + $0x330] ss:$40 sps:$4 sm:$0xff]  }
 0x1e3   : > { %4887 = vmatpush1.bf16.msra.mxu0 %v11515_v12  ;;  %v11604_v12 = vld [vmem:[%s15020_s1 + $0x384] ss:$40 sps:$4 sm:$0xff]  }
 0x1e4   : > { %5193 = vmatpush1.bf16.msra.mxu1 %v11518_v13  ;;  %4888 = vmatprep.subr.bf16.mxu0 %v11523_v14  ;;  %v11602_v13 = vld [vmem:[%s15020_s1 + $0x380] ss:$40 sps:$4 sm:$0xff]   ;;  %v11607_v14 = vld [vmem:[%s15020_s1 + $0x3d4] ss:$40 sps:$4 sm:$0xff]  }
 0x1e5   : > { %5194 = vmatprep.subr.bf16.mxu1 %v11526_v15  ;;  %v11605_v15 = vld [vmem:[%s15020_s1 + $0x3d0] ss:$40 sps:$4 sm:$0xff]  }
 0x1e7   : > { %4889 = vmatpush1.bf16.msra.mxu0 %v11521_v16  ;;  %v11610_v16 = vld [vmem:[%s15020_s1 + $0x424] ss:$40 sps:$4 sm:$0xff]  }
 0x1e8   : > { %5195 = vmatpush1.bf16.msra.mxu1 %v11524_v17  ;;  %4890 = vmatprep.subr.bf16.mxu0 %v11529_v18  ;;  %v11608_v17 = vld [vmem:[%s15020_s1 + $0x420] ss:$40 sps:$4 sm:$0xff]   ;;  %v11613_v18 = vld [vmem:[%s15020_s1 + $0x474] ss:$40 sps:$4 sm:$0xff]  }
 0x1e9   : > { %5196 = vmatprep.subr.bf16.mxu1 %v11532_v19  ;;  %v11611_v19 = vld [vmem:[%s15020_s1 + $0x470] ss:$40 sps:$4 sm:$0xff]  }
 0x1eb   : > { %4891 = vmatpush1.bf16.msra.mxu0 %v11527_v20  ;;  %v11616_v20 = vld [vmem:[%s15020_s1 + $0x4c4] ss:$40 sps:$4 sm:$0xff]  }
 0x1ec   : > { %5197 = vmatpush1.bf16.msra.mxu1 %v11530_v21  ;;  %4892 = vmatprep.subr.bf16.mxu0 %v11535_v23  ;;  %v11614_v21 = vld [vmem:[%s15020_s1 + $0x4c0] ss:$40 sps:$4 sm:$0xff]   ;;  %v11619_v23 = vld [vmem:[%s15020_s1 + $0x514] ss:$40 sps:$4 sm:$0xff]  }
 0x1ed   : > { %5198 = vmatprep.subr.bf16.mxu1 %v11538_v24  ;;  %v11617_v24 = vld [vmem:[%s15020_s1 + $0x510] ss:$40 sps:$4 sm:$0xff]  }
 0x1ef   : > { %4893 = vmatpush1.bf16.msra.mxu0 %v11533_v26  ;;  %v11622_v26 = vld [vmem:[%s15020_s1 + $0x564] ss:$40 sps:$4 sm:$0xff]  }
 0x1f0   : > { %5199 = vmatpush1.bf16.msra.mxu1 %v11536_v27  ;;  %4894 = vmatprep.subr.bf16.mxu0 %v11541_v28  ;;  %v11620_v27 = vld [vmem:[%s15020_s1 + $0x560] ss:$40 sps:$4 sm:$0xff]   ;;  %v11625_v28 = vld [vmem:[%s15020_s1 + $0x5b4] ss:$40 sps:$4 sm:$0xff]  }
 0x1f1   : > { %5200 = vmatprep.subr.bf16.mxu1 %v11544_v30  ;;  %v11623_v30 = vld [vmem:[%s15020_s1 + $0x5b0] ss:$40 sps:$4 sm:$0xff]  }
 0x1f3   : > { %4895 = vmatpush1.bf16.msra.mxu0 %v11539_v32  ;;  %v11626_v32 = vld [vmem:[%s15020_s1 + $0x600] ss:$40 sps:$4 sm:$0xff]  }
 0x1f4   : > { %5201 = vmatpush1.bf16.msra.mxu1 %v11542_v33  ;;  %4896 = vmatprep.subr.bf16.mxu0 %v11547_v34  ;;  %v11631_v33 = vld [vmem:[%s15020_s1 + $0x654] ss:$40 sps:$4 sm:$0xff]   ;;  %v11629_v34 = vld [vmem:[%s15020_s1 + $0x650] ss:$40 sps:$4 sm:$0xff]  }
 0x1f5   : > { %5202 = vmatprep.subr.bf16.mxu1 %v11550_v35  ;;  %v11634_v35 = vld [vmem:[%s15020_s1 + $0x6a4] ss:$40 sps:$4 sm:$0xff]  }
 0x1f7   : > { %4897 = vmatpush1.bf16.msra.mxu0 %v11545_v36  ;;  %v11637_v36 = vld [vmem:[%s15020_s1 + $0x6f4] ss:$40 sps:$4 sm:$0xff]  }
 0x1f8   : > { %5203 = vmatpush1.bf16.msra.mxu1 %v11548_v37  ;;  %4898 = vmatprep.subr.bf16.mxu0 %v11553_v38 }
 0x1f9   : > { %5204 = vmatprep.subr.bf16.mxu1 %v11556_v22 }
 0x1fb   : > { %4899 = vmatpush1.bf16.msra.mxu0 %v11551_v1  ;;  %v11635_v1 = vld [vmem:[%s15020_s1 + $0x6f0] ss:$40 sps:$4 sm:$0xff]  }
 0x1fc   : > { %5205 = vmatpush1.bf16.msra.mxu1 %v11554_v39  ;;  %4900 = vmatprep.subr.bf16.mxu0 %v11559_v40  ;;  %v11640_v40 = vld [vmem:[%s15020_s1 + $0x744] ss:$40 sps:$4 sm:$0xff]  }
 0x1fd   : > { %5206 = vmatprep.subr.bf16.mxu1 %v11562_v25  ;;  %v11638_v25 = vld [vmem:[%s15020_s1 + $0x740] ss:$40 sps:$4 sm:$0xff]  }
 0x1ff   : > { %4901 = vmatpush1.bf16.msra.mxu0 %v11557_v41  ;;  %v11643_v41 = vld [vmem:[%s15020_s1 + $0x794] ss:$40 sps:$4 sm:$0xff]  }
 0x200   : > { %5207 = vmatpush1.bf16.msra.mxu1 %v11560_v42  ;;  %4902 = vmatprep.subr.bf16.mxu0 %v11565_v43 }
 0x201   : > { %5208 = vmatprep.subr.bf16.mxu1 %v11568_v31 }
 0x203   : > { %4903 = vmatpush1.bf16.msra.mxu0 %v11563_v44  ;;  %v11641_v44 = vld [vmem:[%s15020_s1 + $0x790] ss:$40 sps:$4 sm:$0xff]  }
 0x204   : > { %5209 = vmatpush1.bf16.msra.mxu1 %v11566_v45  ;;  %5025 = vmatprep.subr.bf16.mxu0 %v11571_v49  ;;  %v11646_v49 = vld [vmem:[%s15020_s1 + $0x7e4] ss:$40 sps:$4 sm:$0xff]  }
 0x206   : > { %4905 = vmatmul.mubr.bf16.vlgmr.msra.gmra.mrb[0].mxu0 %v13720_v53 }
 0x207   : > { %5211 = vmatmul.mubr.bf16.vlgmr.msra.gmra.mrb[8].mxu1 %v13720_v53  ;;  %5026 = vmatpush1.bf16.msra.mxu0 %v11569_v46  ;;  %v11644_v46 = vld [vmem:[%s15020_s1 + $0x7e0] ss:$40 sps:$4 sm:$0xff]  }
 0x208   : > { %4914 = vmatprep.mubr.bf16.mxu0 %v12380_v54  ;;  %5027 = vmatprep.subr.bf16.mxu0 %v11574_v5  ;;  %v11649_v5 = vld [vmem:[%s15020_s1 + $0x834] ss:$40 sps:$4 sm:$0xff]  }
 0x209   : > { %5220 = vmatprep.mubr.bf16.mxu1 %v12380_v54 }
 0x20b   : > { %5028 = vmatpush1.bf16.msra.mxu0 %v11572_v48  ;;  %v11647_v48 = vld [vmem:[%s15020_s1 + $0x830] ss:$40 sps:$4 sm:$0xff]  }
 0x20c   : > { %5029 = vmatprep.subr.bf16.mxu0 %v11577_v50  ;;  %v11652_v50 = vld [vmem:[%s15020_s1 + $0x884] ss:$40 sps:$4 sm:$0xff]  }
 0x20e   : > { %4915 = vmatmul.mubr.bf16.gmra.mrb[4].mxu0 %v12469_v29 }
 0x20f   : > { %5221 = vmatmul.mubr.bf16.gmra.mrb[12].mxu1 %v12469_v29  ;;  %5030 = vmatpush1.bf16.msra.mxu0 %v11575_v52  ;;  %v11650_v52 = vld [vmem:[%s15020_s1 + $0x880] ss:$40 sps:$4 sm:$0xff]  }
 0x210   : > { %5057 = vmatprep.mubr.bf16.mxu0 %v13747_v57  ;;  %5031 = vmatprep.subr.bf16.mxu0 %v11580_v59  ;;  %v11655_v59 = vld [vmem:[%s15020_s1 + $0x8d4] ss:$40 sps:$4 sm:$0xff]  }
 0x213   : > { %5032 = vmatpush1.bf16.msra.mxu0 %v11578_v55  ;;  %v11653_v55 = vld [vmem:[%s15020_s1 + $0x8d0] ss:$40 sps:$4 sm:$0xff]  }
 0x214   : > { %5033 = vmatprep.subr.bf16.mxu0 %v11583_v56  ;;  %v11658_v56 = vld [vmem:[%s15020_s1 + $0x924] ss:$40 sps:$4 sm:$0xff]  }
 0x217   : > { %5034 = vmatpush1.bf16.msra.mxu0 %v11581_v58  ;;  %v11656_v58 = vld [vmem:[%s15020_s1 + $0x920] ss:$40 sps:$4 sm:$0xff]  }
 0x218   : > { %5035 = vmatprep.subr.bf16.mxu0 %v11586_v60  ;;  %v11661_v60 = vld [vmem:[%s15020_s1 + $0x974] ss:$40 sps:$4 sm:$0xff]  }
 0x21b   : > { %5036 = vmatpush1.bf16.msra.mxu0 %v11584_v61  ;;  %v11659_v61 = vld [vmem:[%s15020_s1 + $0x970] ss:$40 sps:$4 sm:$0xff]  }
 0x21c   : > { %5037 = vmatprep.subr.bf16.mxu0 %v11589_v63  ;;  %v11664_v63 = vld [vmem:[%s15020_s1 + $0x9c4] ss:$40 sps:$4 sm:$0xff]  }
 0x21f   : > { %5038 = vmatpush1.bf16.msra.mxu0 %v11587_v0  ;;  %v11662_v0 = vld [vmem:[%s15020_s1 + $0x9c0] ss:$40 sps:$4 sm:$0xff]  }
 0x220   : > { %5039 = vmatprep.subr.bf16.mxu0 %v11592_v2  ;;  %v11667_v2 = vld [vmem:[%s15020_s1 + $0x24] ss:$40 sps:$4 sm:$0xff]  }
 0x223   : > { %5040 = vmatpush1.bf16.msra.mxu0 %v11590_v3  ;;  %v11665_v3 = vld [vmem:[%s15020_s1 + $0x20] ss:$40 sps:$4 sm:$0xff]  }
 0x224   : > { %5041 = vmatprep.subr.bf16.mxu0 %v11595_v6  ;;  %v11670_v6 = vld [vmem:[%s15020_s1 + $0x74] ss:$40 sps:$4 sm:$0xff]  }
 0x227   : > { %5042 = vmatpush1.bf16.msra.mxu0 %v11593_v7  ;;  %v11668_v7 = vld [vmem:[%s15020_s1 + $0x70] ss:$40 sps:$4 sm:$0xff]  }
 0x228   : > { %5043 = vmatprep.subr.bf16.mxu0 %v11598_v8  ;;  %v11673_v8 = vld [vmem:[%s15020_s1 + $0xc4] ss:$40 sps:$4 sm:$0xff]  }
 0x22b   : > { %5044 = vmatpush1.bf16.msra.mxu0 %v11596_v9  ;;  %v11671_v9 = vld [vmem:[%s15020_s1 + $0xc0] ss:$40 sps:$4 sm:$0xff]  }
 0x22c   : > { %5045 = vmatprep.subr.bf16.mxu0 %v11601_v10  ;;  %v11676_v10 = vld [vmem:[%s15020_s1 + $0x114] ss:$40 sps:$4 sm:$0xff]  }
 0x22f   : > { %5046 = vmatpush1.bf16.msra.mxu0 %v11599_v11  ;;  %v11761_v11 = vld [vmem:[%s15021_s2 + $0x40] sm:$0xff]  }
 0x230   : > { %5047 = vmatprep.subr.bf16.mxu0 %v11604_v12  ;;  %v11762_v12 = vld [vmem:[%s15021_s2] sm:$0xff]   ;;  %9957 = vmatprep.subr.bf16.mxu1 %v11761_v11 }
 0x231   : > { %9958 = vmatpush3.bf16.msra.mxu1 %v11762_v12 }
 0x233   : > { %5048 = vmatpush1.bf16.msra.mxu0 %v11602_v13  ;;  %v11763_v13 = vld [vmem:[%s15021_s2 + $0x48] sm:$0xff]  }
 0x234   : > { %5049 = vmatprep.subr.bf16.mxu0 %v11607_v14  ;;  %v11674_v14 = vld [vmem:[%s15020_s1 + $0x110] ss:$40 sps:$4 sm:$0xff]   ;;  %9959 = vmatprep.subr.bf16.mxu1 %v11763_v13 }
 0x237   : > { %5050 = vmatpush1.bf16.msra.mxu0 %v11605_v15  ;;  %v11679_v15 = vld [vmem:[%s15020_s1 + $0x164] ss:$40 sps:$4 sm:$0xff]  }
 0x238   : > { %5051 = vmatprep.subr.bf16.mxu0 %v11610_v16  ;;  %v11764_v16 = vld [vmem:[%s15021_s2 + $0x8] sm:$0xff]  }
 0x239   : > { %9960 = vmatpush3.bf16.msra.mxu1 %v11764_v16 }
 0x23b   : > { %5052 = vmatpush1.bf16.msra.mxu0 %v11608_v17  ;;  %v11765_v17 = vld [vmem:[%s15021_s2 + $0x50] sm:$0xff]  }
 0x23c   : > { %5053 = vmatprep.subr.bf16.mxu0 %v11613_v18  ;;  %v11682_v18 = vld [vmem:[%s15020_s1 + $0x1b4] ss:$40 sps:$4 sm:$0xff]   ;;  %9961 = vmatprep.subr.bf16.mxu1 %v11765_v17 }
 0x23f   : > { %5054 = vmatpush1.bf16.msra.mxu0 %v11611_v19  ;;  %v11766_v19 = vld [vmem:[%s15021_s2 + $0x10] sm:$0xff]  }
 0x240   : > { %5055 = vmatprep.subr.bf16.mxu0 %v11616_v20  ;;  %v11767_v20 = vld [vmem:[%s15021_s2 + $0x58] sm:$0xff]   ;;  %9962 = vmatpush3.bf16.msra.mxu1 %v11766_v19  ;;  %v11731_v19 = vld [vmem:[%s15020_s1 + $0x700] ss:$40 sps:$4 sm:$0xff]  }
 0x241   : > { %9963 = vmatprep.subr.bf16.mxu1 %v11767_v20 }
 0x243   : > { %5056 = vmatpush1.bf16.msra.mxu0 %v11614_v21  ;;  %v11680_v21 = vld [vmem:[%s15020_s1 + $0x1b0] ss:$40 sps:$4 sm:$0xff]  }
 0x244   : > { %5076 = vmatprep.subr.bf16.mxu0 %v11619_v23  ;;  %v11685_v23 = vld [vmem:[%s15020_s1 + $0x204] ss:$40 sps:$4 sm:$0xff]  }
 0x246   : > { %5058 = vmatmul.mubr.bf16.vlgmr.msra.gmra.mrb[8].mxu0 %v13529_v47  ;;  %v11628_v47 = vld [vmem:[%s15020_s1 + $0x604] ss:$40 sps:$4 sm:$0xff]  }
 0x247   : > { %5077 = vmatpush1.bf16.msra.mxu0 %v11617_v24  ;;  %5067 = vmatprep.mubr.bf16.mxu0 %v12212_v51  ;;  %v11768_v24 = vld [vmem:[%s15021_s2 + $0x18] sm:$0xff]  }
 0x248   : > { %5078 = vmatprep.subr.bf16.mxu0 %v11622_v26  ;;  %v11769_v26 = vld [vmem:[%s15021_s2 + $0x60] sm:$0xff]   ;;  %9964 = vmatpush3.bf16.msra.mxu1 %v11768_v24 }
 0x249   : > { %9965 = vmatprep.subr.bf16.mxu1 %v11769_v26 }
 0x24b   : > { %5079 = vmatpush1.bf16.msra.mxu0 %v11620_v27  ;;  %v11683_v27 = vld [vmem:[%s15020_s1 + $0x200] ss:$40 sps:$4 sm:$0xff]  }
 0x24c   : > { %5080 = vmatprep.subr.bf16.mxu0 %v11625_v28  ;;  %v11688_v28 = vld [vmem:[%s15020_s1 + $0x254] ss:$40 sps:$4 sm:$0xff]  }
 0x24e   : > { %5068 = vmatmul.mubr.bf16.gmra.mrb[12].mxu0 %v12243_v4 }
 0x24f   : > { %5081 = vmatpush1.bf16.msra.mxu0 %v11623_v30  ;;  %5108 = vmatprep.mubr.bf16.mxu0 %v13574_v62  ;;  %v11632_v62 = vld [vmem:[%s15020_s1 + $0x6a0] ss:$40 sps:$4 sm:$0xff]  }
 0x250   : > { %5082 = vmatprep.subr.bf16.mxu0 %v11628_v47  ;;  %v11770_v30 = vld [vmem:[%s15021_s2 + $0x20] sm:$0xff]   ;;  %v11771_v47 = vld [vmem:[%s15021_s2 + $0x68] sm:$0xff]  }
 0x251   : > { %9966 = vmatpush3.bf16.msra.mxu1 %v11770_v30 }
 0x252   : > { %9967 = vmatprep.subr.bf16.mxu1 %v11771_v47  ;;  %v11775_v47 = vld [vmem:[%s15021_s2 + $0x78] sm:$0xff]  }
 0x253   : > { %5083 = vmatpush1.bf16.msra.mxu0 %v11626_v32  ;;  %v11686_v32 = vld [vmem:[%s15020_s1 + $0x250] ss:$40 sps:$4 sm:$0xff]  }
 0x254   : > { %5084 = vmatprep.subr.bf16.mxu0 %v11631_v33  ;;  %v11691_v33 = vld [vmem:[%s15020_s1 + $0x2a4] ss:$40 sps:$4 sm:$0xff]  }
 0x257   : > { %5085 = vmatpush1.bf16.msra.mxu0 %v11629_v34  ;;  %v11772_v34 = vld [vmem:[%s15021_s2 + $0x28] sm:$0xff]  }
 0x258   : > { %5086 = vmatprep.subr.bf16.mxu0 %v11634_v35  ;;  %v11689_v35 = vld [vmem:[%s15020_s1 + $0x2a0] ss:$40 sps:$4 sm:$0xff]   ;;  %9968 = vmatpush3.bf16.msra.mxu1 %v11772_v34  ;;  %v11734_v34 = vld [vmem:[%s15020_s1 + $0x750] ss:$40 sps:$4 sm:$0xff]  }
 0x25a   : > { %v13862_v37 = vpop.f32.mrb[0].mxu1 }
 0x25b   : > { %v13864_v38 = vpop.f32.mrb[1].mxu1  ;;  %5087 = vmatpush1.bf16.msra.mxu0 %v11632_v62  ;;  %v11694_v62 = vld [vmem:[%s15020_s1 + $0x2f4] ss:$40 sps:$4 sm:$0xff]  }
 0x25c   : > { %v13866_v22 = vpop.f32.mrb[2].mxu1  ;;  %5088 = vmatprep.subr.bf16.mxu0 %v11637_v36  ;;  %v11692_v36 = vld [vmem:[%s15020_s1 + $0x2f0] ss:$40 sps:$4 sm:$0xff]  }
 0x25d   : > { %v13871_v39 = vpop.f32.mrb[3].mxu1  ;;  %v5338_v20 = vmul.f32 %v13866_v22, %v13866_v22  ;;  %v11776_v22 = vld [vmem:[%s15021_s2 + $0x38] sm:$0xff]  }
 0x25f   : > { %5089 = vmatpush1.bf16.msra.mxu0 %v11635_v1  ;;  %v11697_v1 = vld [vmem:[%s15020_s1 + $0x344] ss:$40 sps:$4 sm:$0xff]  }
 0x260   : > { %5090 = vmatprep.subr.bf16.mxu0 %v11640_v40  ;;  %v11695_v40 = vld [vmem:[%s15020_s1 + $0x340] ss:$40 sps:$4 sm:$0xff]  }
 0x262   : > { %v13882_v42 = vpop.f32.mrb[4].mxu1 }
 0x263   : > { %v13884_v43 = vpop.f32.mrb[5].mxu1  ;;  %5091 = vmatpush1.bf16.msra.mxu0 %v11638_v25  ;;  %v11700_v25 = vld [vmem:[%s15020_s1 + $0x394] ss:$40 sps:$4 sm:$0xff]  }
 0x264   : > { %v5022_v31 = vpop.f32.mrb[6].mxu1  ;;  %5092 = vmatprep.subr.bf16.mxu0 %v11643_v41  ;;  %v11698_v41 = vld [vmem:[%s15020_s1 + $0x390] ss:$40 sps:$4 sm:$0xff]  }
 0x265   : > { %v5023_v45 = vpop.f32.mrb[7].mxu1  ;;  %v11703_v31 = vld [vmem:[%s15020_s1 + $0x3e4] ss:$40 sps:$4 sm:$0xff]  }
 0x266   : > { %v11706_v45 = vld [vmem:[%s15020_s1 + $0x434] ss:$40 sps:$4 sm:$0xff]  }
 0x267   : > { %5093 = vmatpush1.bf16.msra.mxu0 %v11641_v44  ;;  %v11701_v44 = vld [vmem:[%s15020_s1 + $0x3e0] ss:$40 sps:$4 sm:$0xff]  }
 0x268   : > { %5094 = vmatprep.subr.bf16.mxu0 %v11646_v49  ;;  %v11704_v49 = vld [vmem:[%s15020_s1 + $0x430] ss:$40 sps:$4 sm:$0xff]  }
 0x26b   : > { %5095 = vmatpush1.bf16.msra.mxu0 %v11644_v46  ;;  %v11709_v46 = vld [vmem:[%s15020_s1 + $0x484] ss:$40 sps:$4 sm:$0xff]  }
 0x26c   : > { %5096 = vmatprep.subr.bf16.mxu0 %v11649_v5  ;;  %v11707_v5 = vld [vmem:[%s15020_s1 + $0x480] ss:$40 sps:$4 sm:$0xff]  }
 0x26f   : > { %5097 = vmatpush1.bf16.msra.mxu0 %v11647_v48  ;;  %v11712_v48 = vld [vmem:[%s15020_s1 + $0x4d4] ss:$40 sps:$4 sm:$0xff]  }
 0x270   : > { %5098 = vmatprep.subr.bf16.mxu0 %v11652_v50  ;;  %v11710_v50 = vld [vmem:[%s15020_s1 + $0x4d0] ss:$40 sps:$4 sm:$0xff]  }
 0x273   : > { %5099 = vmatpush1.bf16.msra.mxu0 %v11650_v52  ;;  %v11715_v52 = vld [vmem:[%s15020_s1 + $0x524] ss:$40 sps:$4 sm:$0xff]  }
 0x274   : > { %5100 = vmatprep.subr.bf16.mxu0 %v11655_v59  ;;  %v11713_v59 = vld [vmem:[%s15020_s1 + $0x520] ss:$40 sps:$4 sm:$0xff]  }
 0x277   : > { %5101 = vmatpush1.bf16.msra.mxu0 %v11653_v55  ;;  %v11718_v55 = vld [vmem:[%s15020_s1 + $0x574] ss:$40 sps:$4 sm:$0xff]  }
 0x278   : > { %5102 = vmatprep.subr.bf16.mxu0 %v11658_v56  ;;  %v11980_v56 = vld [vmem:[%s12196_s28] ss:$16 sps:$4 sm:$0xff]  }
 0x27b   : > { %5103 = vmatpush1.bf16.msra.mxu0 %v11656_v58  ;;  %v11716_v58 = vld [vmem:[%s15020_s1 + $0x570] ss:$40 sps:$4 sm:$0xff]  }
 0x27c   : > { %5104 = vmatprep.subr.bf16.mxu0 %v11661_v60  ;;  %v11721_v60 = vld [vmem:[%s15020_s1 + $0x5c4] ss:$40 sps:$4 sm:$0xff]  }
 0x27f   : > { %5105 = vmatpush1.bf16.msra.mxu0 %v11659_v61  ;;  %v11719_v61 = vld [vmem:[%s15020_s1 + $0x5c0] ss:$40 sps:$4 sm:$0xff]  }
 0x280   : > { %5106 = vmatprep.subr.bf16.mxu0 %v11664_v63  ;;  %v11724_v63 = vld [vmem:[%s15020_s1 + $0x614] ss:$40 sps:$4 sm:$0xff]  }
 0x283   : > { %5107 = vmatpush1.bf16.msra.mxu0 %v11662_v0  ;;  %v11981_v0 = vld [vmem:[%s12196_s28 + $0xc] ss:$16 sps:$4 sm:$0xff]  }
 0x284   : > { %5229 = vmatprep.subr.bf16.mxu0 %v11667_v2  ;;  %v11727_v2 = vld [vmem:[%s15020_s1 + $0x664] ss:$40 sps:$4 sm:$0xff]  }
 0x286   : > { %5109 = vmatmul.mubr.bf16.vlgmr.msra.gmra.mrb[8].mxu0 %v13720_v53 }
 0x287   : > { %5230 = vmatpush1.bf16.msra.mxu0 %v11665_v3  ;;  %5118 = vmatprep.mubr.bf16.mxu0 %v12380_v54  ;;  %v11725_v3 = vld [vmem:[%s15020_s1 + $0x660] ss:$40 sps:$4 sm:$0xff]  }
 0x288   : > { %5231 = vmatprep.subr.bf16.mxu0 %v11670_v6  ;;  %v11728_v6 = vld [vmem:[%s15020_s1 + $0x6b0] ss:$40 sps:$4 sm:$0xff]  }
 0x28b   : > { %5232 = vmatpush1.bf16.msra.mxu0 %v11668_v7  ;;  %v11733_v7 = vld [vmem:[%s15020_s1 + $0x704] ss:$40 sps:$4 sm:$0xff]  }
 0x28c   : > { %5233 = vmatprep.subr.bf16.mxu0 %v11673_v8 }
 0x28e   : > { %5119 = vmatmul.mubr.bf16.gmra.mrb[12].mxu0 %v12469_v29 }
 0x28f   : > { %5234 = vmatpush1.bf16.msra.mxu0 %v11671_v9  ;;  %5261 = vmatprep.mubr.bf16.mxu0 %v13747_v57  ;;  %v11677_v57 = vld [vmem:[%s15020_s1 + $0x160] ss:$40 sps:$4 sm:$0xff]  }
 0x290   : > { %5235 = vmatprep.subr.bf16.mxu0 %v11676_v10  ;;  %v11773_v10 = vld [vmem:[%s15021_s2 + $0x70] sm:$0xff]  }
 0x291   : > { %9969 = vmatprep.subr.bf16.mxu1 %v11773_v10  ;;  %v11758_v10 = vld [vmem:[%s15020_s1 + $0x9d0] ss:$40 sps:$4 sm:$0xff]  }
 0x293   : > { %5236 = vmatpush1.bf16.msra.mxu0 %v11674_v14  ;;  %v11774_v14 = vld [vmem:[%s15021_s2 + $0x30] sm:$0xff]  }
 0x294   : > { %5237 = vmatprep.subr.bf16.mxu0 %v11679_v15  ;;  %v5333_v15 = vmul.f32 %v13862_v37, %v13862_v37  ;;  %v11736_v37 = vld [vmem:[%s15020_s1 + $0x754] ss:$40 sps:$4 sm:$0xff]   ;;  %9970 = vmatpush3.bf16.msra.mxu1 %v11774_v14 }
 0x295   : > { %9971 = vmatprep.subr.bf16.mxu1 %v11775_v47  ;;  %v11781_v47 = vld [vmem:[%s15021_s2 + $0xd0] sm:$0xff]  }
 0x297   : > { %5238 = vmatpush1.bf16.msra.mxu0 %v11677_v57 }
 0x298   : > { %5239 = vmatprep.subr.bf16.mxu0 %v11682_v18  ;;  %9972 = vmatpush3.bf16.msra.mxu1 %v11776_v22  ;;  %v11782_v22 = vld [vmem:[%s15021_s2 + $0x90] sm:$0xff]  }
 0x29b   : > { %5240 = vmatpush1.bf16.msra.mxu0 %v11680_v21 }
 0x29c   : > { %5241 = vmatprep.subr.bf16.mxu0 %v11685_v23 }
 0x29f   : > { %5242 = vmatpush1.bf16.msra.mxu0 %v11683_v27 }
 0x2a0   : > { %5243 = vmatprep.subr.bf16.mxu0 %v11688_v28 }
 0x2a3   : > { %5244 = vmatpush1.bf16.msra.mxu0 %v11686_v32 }
 0x2a4   : > { %5245 = vmatprep.subr.bf16.mxu0 %v11691_v33 }
 0x2a7   : > { %5246 = vmatpush1.bf16.msra.mxu0 %v11689_v35  ;;  %v11739_v35 = vld [vmem:[%s15020_s1 + $0x7a4] ss:$40 sps:$4 sm:$0xff]  }
 0x2a8   : > { %5247 = vmatprep.subr.bf16.mxu0 %v11694_v62 }
 0x2ab   : > { %5248 = vmatpush1.bf16.msra.mxu0 %v11692_v36 }
 0x2ac   : > { %5249 = vmatprep.subr.bf16.mxu0 %v11697_v1 }
 0x2af   : > { %5250 = vmatpush1.bf16.msra.mxu0 %v11695_v40 }
 0x2b0   : > { %5251 = vmatprep.subr.bf16.mxu0 %v11700_v25 }
 0x2b3   : > { %5252 = vmatpush1.bf16.msra.mxu0 %v11698_v41 }
 0x2b4   : > { %5253 = vmatprep.subr.bf16.mxu0 %v11703_v31 }
 0x2b7   : > { %5254 = vmatpush1.bf16.msra.mxu0 %v11701_v44  ;;  %v5343_v44 = vmul.f32 %v13882_v42, %v13882_v42  ;;  %v11740_v42 = vld [vmem:[%s15020_s1 + $0x7f0] ss:$40 sps:$4 sm:$0xff]  }
 0x2b8   : > { %5255 = vmatprep.subr.bf16.mxu0 %v11706_v45 }
 0x2bb   : > { %5256 = vmatpush1.bf16.msra.mxu0 %v11704_v49 }
 0x2bc   : > { %5257 = vmatprep.subr.bf16.mxu0 %v11709_v46 }
 0x2bf   : > { %5258 = vmatpush1.bf16.msra.mxu0 %v11707_v5 }
 0x2c0   : > { %5259 = vmatprep.subr.bf16.mxu0 %v11712_v48  ;;  %v11737_v48 = vld [vmem:[%s15020_s1 + $0x7a0] ss:$40 sps:$4 sm:$0xff]  }
 0x2c3   : > { %5260 = vmatpush1.bf16.msra.mxu0 %v11710_v50 }
 0x2c4   : > { %5280 = vmatprep.subr.bf16.mxu0 %v11715_v52 }
 0x2c6   : > { %5262 = vmatmul.mubr.bf16.vlgmr.msra.gmra.mrb[16].mxu0 %v11980_v56 }
 0x2c7   : > { %5281 = vmatpush1.bf16.msra.mxu0 %v11713_v59  ;;  %5271 = vmatprep.mubr.bf16.mxu0 %v12212_v51  ;;  %v11722_v51 = vld [vmem:[%s15020_s1 + $0x610] ss:$40 sps:$4 sm:$0xff]   ;;  %v11742_v59 = vld [vmem:[%s15020_s1 + $0x7f4] ss:$40 sps:$4 sm:$0xff]  }
 0x2c8   : > { %5282 = vmatprep.subr.bf16.mxu0 %v11718_v55 }
 0x2cb   : > { %5283 = vmatpush1.bf16.msra.mxu0 %v11716_v58  ;;  %v11745_v58 = vld [vmem:[%s15020_s1 + $0x844] ss:$40 sps:$4 sm:$0xff]  }
 0x2cc   : > { %5284 = vmatprep.subr.bf16.mxu0 %v11721_v60  ;;  %v11743_v60 = vld [vmem:[%s15020_s1 + $0x840] ss:$40 sps:$4 sm:$0xff]  }
 0x2ce   : > { %5272 = vmatmul.mubr.bf16.gmra.mrb[20].mxu0 %v12243_v4  ;;  %v11730_v4 = vld [vmem:[%s15020_s1 + $0x6b4] ss:$40 sps:$4 sm:$0xff]  }
 0x2cf   : > { %5285 = vmatpush1.bf16.msra.mxu0 %v11719_v61  ;;  %5312 = vmatprep.mubr.bf16.mxu0 %v11981_v0  ;;  %v11777_v61 = vld [vmem:[%s15021_s2 + $0xc0] sm:$0xff]  }
 0x2d0   : > { %5286 = vmatprep.subr.bf16.mxu0 %v11724_v63  ;;  %v11748_v63 = vld [vmem:[%s15020_s1 + $0x894] ss:$40 sps:$4 sm:$0xff]   ;;  %9985 = vmatprep.subr.bf16.mxu1 %v11777_v61  ;;  %v11751_v0 = vld [vmem:[%s15020_s1 + $0x8e4] ss:$40 sps:$4 sm:$0xff]  }
 0x2d3   : > { %5287 = vmatpush1.bf16.msra.mxu0 %v11722_v51  ;;  %v11746_v51 = vld [vmem:[%s15020_s1 + $0x890] ss:$40 sps:$4 sm:$0xff]  }
 0x2d4   : > { %5288 = vmatprep.subr.bf16.mxu0 %v11727_v2  ;;  %v11749_v2 = vld [vmem:[%s15020_s1 + $0x8e0] ss:$40 sps:$4 sm:$0xff]  }
 0x2d7   : > { %5289 = vmatpush1.bf16.msra.mxu0 %v11725_v3  ;;  %v11754_v3 = vld [vmem:[%s15020_s1 + $0x934] ss:$40 sps:$4 sm:$0xff]  }
 0x2d8   : > { %5290 = vmatprep.subr.bf16.mxu0 %v11730_v4  ;;  %v11752_v4 = vld [vmem:[%s15020_s1 + $0x930] ss:$40 sps:$4 sm:$0xff]  }
 0x2d9   : > { %v14110_v8 = vpop.f32.mrb[0].mxu0 }
 0x2da   : > { %v5212_v9 = vpop.f32.mrb[8].mxu1  ;;  %v4908_v12 = vpop.f32.mrb[1].mxu0 }
 0x2db   : > { %v5347_v11 = vmul.f32 %v5212_v9, %v5212_v9  ;;  %v5214_v13 = vpop.f32.mrb[9].mxu1  ;;  %v5332_v16 = vmul.f32 %v4908_v12, %v4908_v12  ;;  %v14120_v57 = vpop.f32.mrb[2].mxu0  ;;  %5291 = vmatpush1.bf16.msra.mxu0 %v11728_v6  ;;  %v11757_v6 = vld [vmem:[%s15020_s1 + $0x984] ss:$40 sps:$4 sm:$0xff]   ;;  %v11760_v9 = vld [vmem:[%s15020_s1 + $0x9d4] ss:$40 sps:$4 sm:$0xff]  }
 0x2dc   : > { %v5348_v17 = vmul.f32 %v5214_v13, %v5214_v13  ;;  %v5216_v18 = vpop.f32.mrb[10].mxu1  ;;  %v4912_v23 = vpop.f32.mrb[3].mxu0  ;;  %5292 = vmatprep.subr.bf16.mxu0 %v11733_v7  ;;  %v11755_v7 = vld [vmem:[%s15020_s1 + $0x980] ss:$40 sps:$4 sm:$0xff]   ;;  %v5331_v13 = vmul.f32 %v14110_v8, %v14110_v8 }
 0x2dd   : > { %v5352_v21 = vmul.f32 %v5216_v18, %v5216_v18  ;;  %v5218_v24 = vpop.f32.mrb[11].mxu1  ;;  %v5362_v26 = vadd.f32 %v5347_v11, %v5332_v16  ;;  %v5337_v28 = vmul.f32 %v4912_v23, %v4912_v23  ;;  %v11779_v8 = vld [vmem:[%s15021_s2 + $0xc8] sm:$0xff]  }
 0x2de   : > { %v14130_v27 = vadd.f32 %v5348_v17, %v5333_v15  ;;  %v5353_v30 = vmul.f32 %v5218_v24, %v5218_v24  ;;  %v5336_v17 = vmul.f32 %v14120_v57, %v14120_v57 }
 0x2df   : > { %v5367_v32 = vadd.f32 %v5352_v21, %v5337_v28  ;;  %5293 = vmatpush1.bf16.msra.mxu0 %v11731_v19  ;;  %v11780_v28 = vld [vmem:[%s15021_s2 + $0x88] sm:$0xff]  }
 0x2e0   : > { %v14138_v33 = vadd.f32 %v5353_v30, %v5338_v20  ;;  %5294 = vmatprep.subr.bf16.mxu0 %v11736_v37 }
 0x2e1   : > { %v14148_v36 = vpop.f32.mrb[4].mxu0  ;;  %v5377_v40 = vpack.c.bf16 %v5367_v32, %v5362_v26 }
 0x2e2   : > { %v5378_v62 = vpack.c.bf16 %v14138_v33, %v14130_v27  ;;  %v5222_v1 = vpop.f32.mrb[12].mxu1  ;;  %v4918_v41 = vpop.f32.mrb[5].mxu0  ;;  %v5341_v24 = vmul.f32 %v14148_v36, %v14148_v36  ;;  %v11785_v36 = vld [vmem:[%s15021_s2 + $0xe0] sm:$0xff]   ;;  %v11796_v27 = vld [vmem:[%s15021_s2 + $0x118] sm:$0xff]  }
 0x2e3   : > { %v5357_v25 = vmul.f32 %v5222_v1, %v5222_v1  ;;  %v5224_v31 = vpop.f32.mrb[13].mxu1  ;;  %v5342_v45 = vmul.f32 %v4918_v41, %v4918_v41  ;;  %v4920_v46 = vpop.f32.mrb[6].mxu0  ;;  %5295 = vmatpush1.bf16.msra.mxu0 %v11734_v34  ;;  %5738 = vmatprep.mubr.bf16.mxu1 %v5377_v40  ;;  %v11783_v34 = vld [vmem:[%s15021_s2 + $0xd8] sm:$0xff]   ;;  %v11786_v1 = vld [vmem:[%s15021_s2 + $0xa0] sm:$0xff]   ;;  %v11787_v40 = vld [vmem:[%s15021_s2 + $0xe8] sm:$0xff]  }
 0x2e4   : > { %v5358_v49 = vmul.f32 %v5224_v31, %v5224_v31  ;;  %v5226_v5 = vpop.f32.mrb[14].mxu1  ;;  %v4921_v50 = vpop.f32.mrb[7].mxu0  ;;  %5296 = vmatprep.subr.bf16.mxu0 %v11739_v35  ;;  %v11784_v35 = vld [vmem:[%s15021_s2 + $0x98] sm:$0xff]   ;;  %v11789_v41 = vld [vmem:[%s15021_s2 + $0xf0] sm:$0xff]   ;;  %v11797_v33 = vld [vmem:[%s15021_s2 + $0x120] sm:$0xff]  }
 0x2e5   : > { %v5227_v52 = vpop.f32.mrb[15].mxu1  ;;  %v5372_v55 = vadd.f32 %v5357_v25, %v5342_v45  ;;  %v11788_v25 = vld [vmem:[%s15021_s2 + $0xa8] sm:$0xff]   ;;  %v11790_v31 = vld [vmem:[%s15021_s2 + $0xb0] sm:$0xff]   ;;  %v11792_v45 = vld [vmem:[%s15021_s2 + $0xb8] sm:$0xff]   ;;  %v5334_v5 = vmul.f32 %v13864_v38, %v13864_v38 }
 0x2e6   : > { %v14158_v56 = vadd.f32 %v5358_v49, %v5343_v44  ;;  %v11791_v44 = vld [vmem:[%s15021_s2 + $0xf8] sm:$0xff]   ;;  %v11793_v49 = vld [vmem:[%s15021_s2 + $0x100] sm:$0xff]   ;;  %v11794_v38 = vld [vmem:[%s15021_s2 + $0x108] sm:$0xff]  }
 0x2e7   : > { %5297 = vmatpush1.bf16.msra.mxu0 %v11737_v48  ;;  %v5382_v21 = vpack.c.bf16 %v5372_v55, %v5372_v55 }
 0x2e8   : > { %5298 = vmatprep.subr.bf16.mxu0 %v11742_v59 }
 0x2eb   : > { %5299 = vmatpush1.bf16.msra.mxu0 %v11740_v42  ;;  %v5339_v42 = vmul.f32 %v13871_v39, %v13871_v39 }
 0x2ec   : > { %5300 = vmatprep.subr.bf16.mxu0 %v11745_v58 }
 0x2ef   : > { %5301 = vmatpush1.bf16.msra.mxu0 %v11743_v60 }
 0x2f0   : > { %5302 = vmatprep.subr.bf16.mxu0 %v11748_v63 }
 0x2f3   : > { %5303 = vmatpush1.bf16.msra.mxu0 %v11746_v51 }
 0x2f4   : > { %5304 = vmatprep.subr.bf16.mxu0 %v11751_v0 }
 0x2f7   : > { %5305 = vmatpush1.bf16.msra.mxu0 %v11749_v2 }
 0x2f8   : > { %5306 = vmatprep.subr.bf16.mxu0 %v11754_v3 }
 0x2fb   : > { %5307 = vmatpush1.bf16.msra.mxu0 %v11752_v4 }
 0x2fc   : > { %5308 = vmatprep.subr.bf16.mxu0 %v11757_v6 }
 0x2ff   : > { %5309 = vmatpush1.bf16.msra.mxu0 %v11755_v7 }
 0x300   : > { %5310 = vmatprep.subr.bf16.mxu0 %v11760_v9  ;;  %v5344_v9 = vmul.f32 %v13884_v43, %v13884_v43  ;;  %v11795_v43 = vld [vmem:[%s15021_s2 + $0x110] sm:$0xff]  }
 0x303   : > { %5311 = vmatpush1.bf16.msra.mxu0 %v11758_v10 }
 0x306   : > { %5313 = vmatmul.mubr.bf16.vlgmr.msra.gmra.mrb[16].mxu0 %v13720_v53 }
 0x307   : > { %5322 = vmatprep.mubr.bf16.mxu0 %v12380_v54  ;;  %v11778_v54 = vld [vmem:[%s15021_s2 + $0x80] sm:$0xff]  }
 0x30e   : > { %5323 = vmatmul.mubr.bf16.gmra.mrb[20].mxu0 %v12469_v29 }
 0x359   : > { %v5110_v11 = vpop.f32.mrb[8].mxu0 }
 0x35a   : > { %v5112_v12 = vpop.f32.mrb[9].mxu0  ;;  %v5335_v52 = vmul.f32 %v5110_v11, %v5110_v11 }
 0x35b   : > { %v5346_v14 = vmul.f32 %v5112_v12, %v5112_v12  ;;  %v5114_v15 = vpop.f32.mrb[10].mxu0 }
 0x35c   : > { %v5116_v16 = vpop.f32.mrb[11].mxu0  ;;  %v5340_v63 = vmul.f32 %v5114_v15, %v5114_v15 }
 0x35d   : > { %v5361_v18 = vadd.f32 %v5346_v14, %v5331_v13  ;;  %v5351_v19 = vmul.f32 %v5116_v16, %v5116_v16 }
 0x35f   : > { %v5366_v20 = vadd.f32 %v5351_v19, %v5336_v17  ;;  %v11800_v19 = vld [vmem:[%s15021_s2 + $0x138] sm:$0xff]  }
 0x361   : > { %v5376_v53 = vpack.c.bf16 %v5366_v20, %v5361_v18  ;;  %v14212_v29 = vpop.f32.mrb[12].mxu0  ;;  %v5383_v18 = vpack.c.bf16 %v14158_v56, %v14158_v56  ;;  %v11799_v56 = vld [vmem:[%s15021_s2 + $0x130] sm:$0xff]  }
 0x362   : > { %v5122_v23 = vpop.f32.mrb[13].mxu0  ;;  %v5345_v11 = vmul.f32 %v14212_v29, %v14212_v29 }
 0x363   : > { %v5356_v57 = vmul.f32 %v5122_v23, %v5122_v23  ;;  %v5124_v37 = vpop.f32.mrb[14].mxu0  ;;  %5739 = vmatmul.mubr.bf16.vlgmr.msra.gmra.mrb[16].mxu1 %v5376_v53 }
 0x364   : > { %v5125_v26 = vpop.f32.mrb[15].mxu0  ;;  %5746 = vmatprep.mubr.bf16.mxu1 %v5382_v21  ;;  %9986 = vmatpush3.bf16.msra.mxu1 %v11778_v54 }
 0x365   : > { %v5371_v30 = vadd.f32 %v5356_v57, %v5341_v24  ;;  %9987 = vmatprep.subr.bf16.mxu1 %v11779_v8 }
 0x367   : > { %v5381_v32 = vpack.c.bf16 %v5371_v30, %v5371_v30  ;;  %v11801_v30 = vld [vmem:[%s15022_s3 + $0x40] sm:$0xff]  }
 0x368   : > { %9988 = vmatpush3.bf16.msra.mxu1 %v11780_v28 }
 0x369   : > { %9989 = vmatprep.subr.bf16.mxu1 %v11781_v47  ;;  %v11802_v47 = vld [vmem:[%s15022_s3 + $0x48] sm:$0xff]  }
 0x36b   : > { %5747 = vmatmul.mubr.bf16.gmra.mrb[20].mxu1 %v5381_v32  ;;  %v11804_v32 = vld [vmem:[%s15022_s3 + $0x58] sm:$0xff]  }
 0x36c   : > { %9990 = vmatpush3.bf16.msra.mxu1 %v11782_v22  ;;  %v11803_v22 = vld [vmem:[%s15022_s3 + $0x50] sm:$0xff]  }
 0x36d   : > { %9991 = vmatprep.subr.bf16.mxu1 %v11783_v34  ;;  %v11805_v34 = vld [vmem:[%s15022_s3 + $0x60] sm:$0xff]  }
 0x370   : > { %9992 = vmatpush3.bf16.msra.mxu1 %v11784_v35  ;;  %v11806_v35 = vld [vmem:[%s15022_s3 + $0x68] sm:$0xff]  }
 0x371   : > { %9993 = vmatprep.subr.bf16.mxu1 %v11785_v36  ;;  %v11807_v36 = vld [vmem:[%s15022_s3 + $0x70] sm:$0xff]  }
 0x374   : > { %9994 = vmatpush3.bf16.msra.mxu1 %v11786_v1  ;;  %v11808_v1 = vld [vmem:[%s15022_s3 + $0x78] sm:$0xff]  }
 0x375   : > { %9995 = vmatprep.subr.bf16.mxu1 %v11787_v40  ;;  %v11991_v40 = vmov 0.0  }
 0x376   : > { %357 = vst [vmem:[#allocation2] sm:$0xff] %v11991_v40  ;;  %358 = vst [vmem:[#allocation2 + $0x19] sm:$0xff] %v11991_v40 }
 0x377   : > { %359 = vst [vmem:[#allocation3] sm:$0xff] %v11991_v40  ;;  %360 = vst [vmem:[#allocation3 + $0x19] sm:$0xff] %v11991_v40 }
 0x378   : > { %9996 = vmatpush3.bf16.msra.mxu1 %v11788_v25  ;;  %361 = vst [vmem:[#allocation4] sm:$0xff] %v11991_v40  ;;  %362 = vst [vmem:[#allocation4 + $0x11] sm:$0xff] %v11991_v40  ;;  %v14330_v25 = vld [vmem:[%s15022_s3] sm:$0xff]  }
 0x379   : > { %9997 = vmatprep.subr.bf16.mxu1 %v11789_v41  ;;  %363 = vst [vmem:[#allocation5] sm:$0xff] %v11991_v40  ;;  %364 = vst [vmem:[#allocation5 + $0xd] sm:$0xff] %v11991_v40 }
 0x37c   : > { %9998 = vmatpush3.bf16.msra.mxu1 %v11790_v31 }
 0x37d   : > { %9999 = vmatprep.subr.bf16.mxu1 %v11791_v44 }
 0x380   : > { %10000 = vmatpush3.bf16.msra.mxu1 %v11792_v45 }
 0x381   : > { %10219 = vmatprep.subr.bf16.mxu1 %v11793_v49 }
 0x3d9   : > { %v5314_v46 = vpop.f32.mrb[16].mxu0 }
 0x3da   : > { %v5349_v48 = vmul.f32 %v5314_v46, %v5314_v46  ;;  %v5316_v50 = vpop.f32.mrb[17].mxu0 }
 0x3db   : > { %v5350_v59 = vmul.f32 %v5316_v50, %v5316_v50  ;;  %v5318_v55 = vpop.f32.mrb[18].mxu0 }
 0x3dc   : > { %v5364_v58 = vadd.f32 %v5349_v48, %v5334_v5  ;;  %v5354_v60 = vmul.f32 %v5318_v55, %v5318_v55  ;;  %v5320_v61 = vpop.f32.mrb[19].mxu0 }
 0x3dd   : > { %v5365_v51 = vadd.f32 %v5350_v59, %v5335_v52  ;;  %v5355_v0 = vmul.f32 %v5320_v61, %v5320_v61 }
 0x3de   : > { %v5369_v2 = vadd.f32 %v5354_v60, %v5339_v42 }
 0x3df   : > { %v5370_v3 = vadd.f32 %v5355_v0, %v5340_v63 }
 0x3e0   : > { %v5379_v4 = vpack.c.bf16 %v5369_v2, %v5364_v58 }
 0x3e1   : > { %v5324_v6 = vpop.f32.mrb[20].mxu0  ;;  %v5380_v7 = vpack.c.bf16 %v5370_v3, %v5365_v51 }
 0x3e2   : > { %v5359_v10 = vmul.f32 %v5324_v6, %v5324_v6  ;;  %v5326_v39 = vpop.f32.mrb[21].mxu0  ;;  %5786 = vmatprep.mubr.bf16.mxu1 %v5379_v4 }
 0x3e3   : > { %v5360_v12 = vmul.f32 %v5326_v39, %v5326_v39  ;;  %v5328_v13 = vpop.f32.mrb[22].mxu0  ;;  %5787 = vmatmul.mubr.bf16.vlgmr.msra.gmra.mrb[24].mxu1 %v5378_v62  ;;  %v11798_v62 = vld [vmem:[%s15021_s2 + $0x128] sm:$0xff]  }
 0x3e4   : > { %v5374_v14 = vadd.f32 %v5359_v10, %v5344_v9  ;;  %10220 = vmatpush3.bf16.msra.mxu1 %v11793_v49  ;;  %v5329_v15 = vpop.f32.mrb[23].mxu0 }
 0x3e5   : > { %v5375_v16 = vadd.f32 %v5360_v12, %v5345_v11  ;;  %10221 = vmatprep.subr.bf16.mxu1 %v11794_v38 }
 0x3e6   : > { %v5384_v17 = vpack.c.bf16 %v5374_v14, %v5374_v14 }
 0x3e7   : > { %v5385_v20 = vpack.c.bf16 %v5375_v16, %v5375_v16 }
 0x3e8   : > { %10222 = vmatpush3.bf16.msra.mxu1 %v11794_v38  ;;  %5794 = vmatprep.mubr.bf16.mxu1 %v5384_v17 }
 0x3e9   : > { %10223 = vmatprep.subr.bf16.mxu1 %v11795_v43 }
 0x3eb   : > { %5795 = vmatmul.mubr.bf16.gmra.mrb[28].mxu1 %v5383_v18 }
 0x3ec   : > { %10224 = vmatpush3.bf16.msra.mxu1 %v11795_v43  ;;  %10235 = vmatprep.mubr.bf16.mxu1 %v5380_v7 }
 0x3ed   : > { %10225 = vmatprep.subr.bf16.mxu1 %v11796_v27 }
 0x3f0   : > { %10226 = vmatpush3.bf16.msra.mxu1 %v11796_v27 }
 0x3f1   : > { %10227 = vmatprep.subr.bf16.mxu1 %v11797_v33 }
 0x3f4   : > { %10228 = vmatpush3.bf16.msra.mxu1 %v11797_v33 }
 0x3f5   : > { %10229 = vmatprep.subr.bf16.mxu1 %v11798_v62 }
 0x3f8   : > { %10230 = vmatpush3.bf16.msra.mxu1 %v11798_v62 }
 0x3f9   : > { %10231 = vmatprep.subr.bf16.mxu1 %v11799_v56 }
 0x3fc   : > { %10232 = vmatpush3.bf16.msra.mxu1 %v11799_v56 }
 0x3fd   : > { %10233 = vmatprep.subr.bf16.mxu1 %v11800_v19 }
 0x400   : > { %10234 = vmatpush3.bf16.msra.mxu1 %v11800_v19 }
 0x401   : > { %10239 = vmatprep.subr.bf16.mxu1 %v11801_v30 }
 0x403   : > { %10236 = vmatmul.mubr.bf16.vlgmr.msra.gmra.mrb[32].mxu1 %v5385_v20 }
 0x404   : > { %10240 = vmatpush3.bf16.msra.mxu1 %v11801_v30 }
 0x405   : > { %10241 = vmatprep.subr.bf16.mxu1 %v11802_v47 }
 0x408   : > { %10242 = vmatpush3.bf16.msra.mxu1 %v11802_v47 }
 0x409   : > { %10243 = vmatprep.subr.bf16.mxu1 %v11803_v22 }
 0x40c   : > { %10244 = vmatpush3.bf16.msra.mxu1 %v11803_v22 }
 0x40d   : > { %10245 = vmatprep.subr.bf16.mxu1 %v11804_v32 }
 0x410   : > { %10246 = vmatpush3.bf16.msra.mxu1 %v11804_v32 }
 0x411   : > { %10247 = vmatprep.subr.bf16.mxu1 %v11805_v34 }
 0x414   : > { %10248 = vmatpush3.bf16.msra.mxu1 %v11805_v34 }
 0x415   : > { %10249 = vmatprep.subr.bf16.mxu1 %v11806_v35 }
 0x418   : > { %10250 = vmatpush3.bf16.msra.mxu1 %v11806_v35 }
 0x419   : > { %10251 = vmatprep.subr.bf16.mxu1 %v11807_v36 }
 0x41c   : > { %10252 = vmatpush3.bf16.msra.mxu1 %v11807_v36 }
 0x41d   : > { %10253 = vmatprep.subr.bf16.mxu1 %v11808_v1 }
 0x420   : > { %10254 = vmatpush3.bf16.msra.mxu1 %v11808_v1  ;;  %v11810_v1 = vld [vmem:[%s15022_s3 + $0x8] sm:$0xff]  }
 0x421   : > { %10259 = vmatprep.subr.bf16.mxu1 %v14330_v25 }
 0x436   : > { %v9973_v54 = vpop.f32.mrb[16].mxu1 }
 0x437   : > { %v9974_v53 = vpop.f32.mrb[17].mxu1 }
 0x438   : > { %v9975_v29 = vadd.f32 %v9974_v53, %v9973_v54  ;;  %v9976_v8 = vpop.f32.mrb[18].mxu1 }
 0x439   : > { %v9977_v21 = vpop.f32.mrb[19].mxu1 }
 0x43a   : > { %v9978_v23 = vadd.f32 %v9977_v21, %v9976_v8  ;;  %v5741_v44 = vadd.f32 1e-06, %v9975_v29 }
 0x43c   : > { %v5744_v5 = vadd.f32 1e-06, %v9978_v23 }
 0x43e   : > { %v9979_v24 = vpop.f32.mrb[20].mxu1 }
 0x43f   : > { %v9980_v57 = vpop.f32.mrb[21].mxu1 }
 0x440   : > { %v9981_v37 = vadd.f32 %v9980_v57, %v9979_v24  ;;  %v9982_v26 = vpop.f32.mrb[22].mxu1 }
 0x441   : > { %v9983_v28 = vpop.f32.mrb[23].mxu1 }
 0x442   : > { %v5749_v42 = vadd.f32 1e-06, %v9981_v37 }
 0x4b6   : > { %v10001_v41 = vpop.f32.mrb[24].mxu1 }
 0x4b7   : > { %v10002_v31 = vpop.f32.mrb[25].mxu1 }
 0x4b8   : > { %v10003_v45 = vadd.f32 %v10002_v31, %v10001_v41  ;;  %v10004_v49 = vpop.f32.mrb[26].mxu1  ;;  %v11811_v41 = vld [vmem:[%s15022_s3 + $0x10] sm:$0xff]   ;;  %v11812_v31 = vld [vmem:[%s15022_s3 + $0x18] sm:$0xff]  }
 0x4b9   : > { %v10005_v46 = vpop.f32.mrb[27].mxu1 }
 0x4ba   : > { %v10006_v48 = vadd.f32 %v10005_v46, %v10004_v49  ;;  %v5789_v50 = vadd.f32 %v10003_v45, %v5741_v44  ;;  %v11813_v44 = vld [vmem:[%s15022_s3 + $0x20] sm:$0xff]   ;;  %v11815_v45 = vld [vmem:[%s15022_s3 + $0x30] sm:$0xff]   ;;  %v11816_v49 = vld [vmem:[%s15022_s3 + $0x38] sm:$0xff]  }
 0x4bb   : > { %v11817_v46 = vld [vmem:[%s15022_s3 + $0x80] sm:$0xff]  }
 0x4bc   : > { %v5792_v52 = vadd.f32 %v10006_v48, %v5744_v5 }
 0x4be   : > { %v10007_v59 = vpop.f32.mrb[28].mxu1 }
 0x4bf   : > { %v10008_v55 = vpop.f32.mrb[29].mxu1 }
 0x4c0   : > { %v10009_v58 = vadd.f32 %v10008_v55, %v10007_v59  ;;  %v10010_v60 = vpop.f32.mrb[30].mxu1  ;;  %v11818_v59 = vld [vmem:[%s15022_s3 + $0x88] sm:$0xff]  }
 0x4c1   : > { %v10011_v61 = vpop.f32.mrb[31].mxu1  ;;  %v11821_v60 = vld [vmem:[%s15022_s3 + $0xa0] sm:$0xff]  }
 0x4c2   : > { %v5797_v63 = vadd.f32 %v10009_v58, %v5749_v42  ;;  %v11819_v42 = vld [vmem:[%s15022_s3 + $0x90] sm:$0xff]   ;;  %v11820_v58 = vld [vmem:[%s15022_s3 + $0x98] sm:$0xff]   ;;  %v11822_v61 = vld [vmem:[%s15022_s3 + $0xa8] sm:$0xff]  }
 0x4d6   : > { %v10237_v51 = vpop.f32.mrb[32].mxu1 }
 0x4d7   : > { %v5845_v0 = vadd.f32 %v10237_v51, %v5797_v63  ;;  %v5836_v2 = vpop.f32.mrb[33].mxu1  ;;  %v11823_v63 = vld [vmem:[%s15022_s3 + $0xb0] sm:$0xff]   ;;  %v11824_v51 = vld [vmem:[%s15022_s3 + $0xb8] sm:$0xff]  }
 0x4d8   : > { %v5837_v3 = vadd.f32 %v5836_v2, %v5789_v50  ;;  %v10238_v4 = vpop.f32.mrb[34].mxu1 }
 0x4d9   : > { %v5839_v6 = vpop.f32.mrb[35].mxu1  ;;  %v5852_v9 = vsel %vm5851_vm1, %v5845_v0, 0.0  ;;  %v11826_v4 = vld [vmem:[%s15022_s3 + $0x140] sm:$0xff]  }
 0x4da   : > { %v5840_v38 = vadd.f32 %v5839_v6, %v5792_v52  ;;  %v11827_v6 = vld [vmem:[%s15022_s3 + $0x108] sm:$0xff]   ;;  %10339 = vmatprep.subr.bf16.mxu0 %v11826_v4 }
 0x4db   : > { %10340 = vmatpush3.bf16.msra.mxu0 %v11826_v4  ;;  %v11851_v4 = vld [vmem:[%s15022_s3 + $0xe8] sm:$0xff]  }
 0x4dc   : > { %v5850_v7 = vadd.f32 %v5840_v38, %v5837_v3 }
 0x4de   : > { %v5853_v10 = vadd.f32 %v5852_v9, %v5850_v7  ;;  %v11829_v7 = vld [vmem:[%s15022_s3 + $0x110] sm:$0xff]  }
 0x4df   : > { %v11830_v9 = vld [vmem:[%s15022_s3 + $0x150] sm:$0xff]  }
 0x4e0   : > { %v5854_v39 = vrot.slane %v5853_v10, 4 }
 0x4e2   : > { %v5855_v11 = vadd.f32 %v5854_v39, %v5853_v10  ;;  %v11831_v10 = vld [vmem:[%s15022_s3 + $0x118] sm:$0xff]  }
 0x4e3   : > { %v11832_v39 = vld [vmem:[%s15022_s3 + $0x158] sm:$0xff]  }
 0x4e4   : > { %v5856_v12 = vrot.slane %v5855_v11, 2 }
 0x4e6   : > { %v5857_v13 = vadd.f32 %v5856_v12, %v5855_v11  ;;  %v11833_v11 = vld [vmem:[%s15022_s3 + $0x120] sm:$0xff]  }
 0x4e7   : > { %v11834_v12 = vld [vmem:[%s15022_s3 + $0x160] sm:$0xff]  }
 0x4e8   : > { %v5858_v14 = vrot.slane %v5857_v13, 1 }
 0x4ea   : > { %v5859_v15 = vadd.f32 %v5858_v14, %v5857_v13  ;;  %v11835_v13 = vld [vmem:[%s15022_s3 + $0x128] sm:$0xff]  }
 0x4eb   : > { %v11836_v14 = vld [vmem:[%s15022_s3 + $0x168] sm:$0xff]  }
 0x4ec   : > { %v5861_v16 = vmul.f32 0.05882353, %v5859_v15  ;;  %v11837_v15 = vld [vmem:[%s15022_s3 + $0x130] sm:$0xff]  }
 0x4ee   : > { %v5862_v43 = vsub.f32 %v5837_v3, %v5861_v16  ;;  %v5863_v17 = vsub.f32 %v5840_v38, %v5861_v16  ;;  %v5864_v18 = vsub.f32 %v5845_v0, %v5861_v16  ;;  %v6123_v0 = vld [vmem:[#allocation2 + $0x19] sm:$0x1]  ;;  %v11825_v3 = vld [vmem:[%s15022_s3 + $0x100] sm:$0xff]   ;;  %v11828_v38 = vld [vmem:[%s15022_s3 + $0x148] sm:$0xff]  }
 0x4ef   : > { %v6125_v2 = vpack.c.bf16 %v6123_v0, %v6123_v0  ;;  %10341 = vmatprep.subr.bf16.mxu0 %v11828_v38  ;;  %v11838_v16 = vld [vmem:[%s15022_s3 + $0x170] sm:$0xff]  }
 0x4f0   : > { %v5865_v27 = vmul.f32 %v5862_v43, %v5862_v43  ;;  %v5866_v33 = vmul.f32 %v5863_v17, %v5863_v17  ;;  %v5867_v62 = vmul.f32 %v5864_v18, %v5864_v18  ;;  %10342 = vmatpush3.bf16.msra.mxu0 %v11828_v38  ;;  %v11846_v0 = vld [vmem:[%s15022_s3 + $0x1d0] sm:$0xff]  }
 0x4f1   : > { %10343 = vmatprep.subr.bf16.mxu0 %v11830_v9  ;;  %v11853_v38 = vld [vmem:[%s15022_s3 + $0xf0] sm:$0xff]  }
 0x4f2   : > { %v5868_v56 = vadd.f32 %v5866_v33, %v5865_v27  ;;  %v5869_v19 = vsel %vm5851_vm1, %v5867_v62, 0.0 }
 0x4f4   : > { %v5870_v20 = vadd.f32 %v5869_v19, %v5868_v56  ;;  %10344 = vmatpush3.bf16.msra.mxu0 %v11830_v9  ;;  %v11855_v9 = vld [vmem:[%s15022_s3 + $0xf8] sm:$0xff]  }
 0x4f5   : > { %10345 = vmatprep.subr.bf16.mxu0 %v11832_v39 }
 0x4f6   : > { %v5871_v54 = vrot.slane %v5870_v20, 4 }
 0x4f8   : > { %v5872_v53 = vadd.f32 %v5871_v54, %v5870_v20  ;;  %10346 = vmatpush3.bf16.msra.mxu0 %v11832_v39 }
 0x4f9   : > { %10347 = vmatprep.subr.bf16.mxu0 %v11834_v12 }
 0x4fa   : > { %v5873_v29 = vrot.slane %v5872_v53, 2 }
 0x4fc   : > { %v5874_v8 = vadd.f32 %v5873_v29, %v5872_v53  ;;  %10348 = vmatpush3.bf16.msra.mxu0 %v11834_v12 }
 0x4fd   : > { %10349 = vmatprep.subr.bf16.mxu0 %v11836_v14 }
 0x4fe   : > { %v5875_v21 = vrot.slane %v5874_v8, 1 }
 0x500   : > { %v5876_v23 = vadd.f32 %v5875_v21, %v5874_v8  ;;  %10350 = vmatpush3.bf16.msra.mxu0 %v11836_v14 }
 0x501   : > { %10351 = vmatprep.subr.bf16.mxu0 %v11838_v16 }
 0x502   : > { %v5877_v24 = vmul.f32 0.05882353, %v5876_v23 }
 0x504   : > { %v5878_v57 = vadd.f32 1e-05, %v5877_v24  ;;  %10352 = vmatpush3.bf16.msra.mxu0 %v11838_v16  ;;  %v9556_v24 = vld [vmem:[%s15023_s4] ss:$0 sm:$0xff] }
 0x506   : > { %11969 = vrsqrt.f32 %v5878_v57 }
 0x510   : > { %v11970_v37 = vpop.eup %11969 }
 0x511   : > { %v5880_v26 = vmul.f32 %v11970_v37, %v5862_v43  ;;  %v5881_v28 = vmul.f32 %v11970_v37, %v5863_v17  ;;  %v5882_v30 = vmul.f32 %v11970_v37, %v5864_v18  ;;  %v11839_v43 = vld [vmem:[%s15022_s3 + $0x138] sm:$0xff]   ;;  %v11841_v18 = vld [vmem:[%s15022_s3 + $0xc0] sm:$0xff]  }
 0x512   : > { %v11840_v17 = vld [vmem:[%s15022_s3 + $0x178] sm:$0xff]  }
 0x513   : > { %5883 = vst [vmem:[#allocation2 + $0x8] sm:$0xff] %v5880_v26  ;;  %5884 = vst [vmem:[#allocation2 + $0x10] sm:$0xff] %v5881_v28  ;;  %v5910_v47 = vpack.c.bf16 %v5881_v28, %v5880_v26  ;;  %10353 = vmatprep.subr.bf16.mxu0 %v11840_v17 }
 0x514   : > { %5885 = vst [vmem:[#allocation2 + $0x18] sm:$0x1] %v5882_v30  ;;  %10354 = vmatpush3.bf16.msra.mxu0 %v11840_v17  ;;  %v11859_v17 = vld [vmem:[%s15022_s3 + $0x210] sm:$0xff]  }
 0x515   : > { %10255 = vmatprep.mubr.bf16.mxu1 %v5910_v47  ;;  %10379 = vmatprep.subr.bf16.mxu0 %v11991_v40 }
 0x51a   : > { %v5886_v32 = vld [vmem:[#allocation2 + $0x7] sm:$0xff]  ;;  %v5887_v34 = vld [vmem:[#allocation2 + $0xf] sm:$0xff]  ;;  %v5888_v5 = vld [vmem:[#allocation2 + $0x17] sm:$0x1] }
 0x51b   : > { %v5909_v22 = vld [vmem:[#allocation2 + $0x18] sm:$0x1]  ;;  %v5889_v36 = vpack.c.bf16 %v5887_v34, %v5886_v32  ;;  %v6121_v48 = vld [vmem:[#allocation2 + $0x9] sm:$0xff]  ;;  %v5890_v52 = vpack.c.bf16 %v5888_v5, %v5888_v5 }
 0x51c   : > { %v5911_v35 = vpack.c.bf16 %v5909_v22, %v5909_v22  ;;  %v6122_v50 = vld [vmem:[#allocation2 + $0x11] sm:$0xff]  ;;  %v11843_v5 = vld [vmem:[%s15022_s3 + $0xc8] sm:$0xff]  }
 0x51d   : > { %v6124_v55 = vpack.c.bf16 %v6122_v50, %v6121_v48 }
 0x51e   : > { %10256 = vmatmul.mubr.bf16.vlgmr.msra.gmra.mrb[36].mxu1 %v5911_v35 }
 0x51f   : > { %10260 = vmatpush3.bf16.msra.mxu1 %v14330_v25  ;;  %10275 = vmatprep.mubr.bf16.mxu1 %v5889_v36  ;;  %v11814_v25 = vld [vmem:[%s15022_s3 + $0x28] sm:$0xff]  }
 0x520   : > { %10261 = vmatprep.subr.bf16.mxu1 %v11810_v1 }
 0x523   : > { %10262 = vmatpush3.bf16.msra.mxu1 %v11810_v1 }
 0x524   : > { %10263 = vmatprep.subr.bf16.mxu1 %v11811_v41 }
 0x527   : > { %10264 = vmatpush3.bf16.msra.mxu1 %v11811_v41 }
 0x528   : > { %10265 = vmatprep.subr.bf16.mxu1 %v11812_v31 }
 0x52b   : > { %10266 = vmatpush3.bf16.msra.mxu1 %v11812_v31 }
 0x52c   : > { %10267 = vmatprep.subr.bf16.mxu1 %v11813_v44 }
 0x52f   : > { %10268 = vmatpush3.bf16.msra.mxu1 %v11813_v44 }
 0x530   : > { %10269 = vmatprep.subr.bf16.mxu1 %v11814_v25 }
 0x533   : > { %10270 = vmatpush3.bf16.msra.mxu1 %v11814_v25 }
 0x534   : > { %10271 = vmatprep.subr.bf16.mxu1 %v11815_v45 }
 0x537   : > { %10272 = vmatpush3.bf16.msra.mxu1 %v11815_v45 }
 0x538   : > { %10273 = vmatprep.subr.bf16.mxu1 %v11816_v49 }
 0x53b   : > { %10274 = vmatpush3.bf16.msra.mxu1 %v11816_v49  ;;  %v6502_v49 = vld [vmem:[#allocation3 + $0x19] sm:$0x1] }
 0x53c   : > { %10279 = vmatprep.subr.bf16.mxu1 %v11817_v46 }
 0x53e   : > { %10276 = vmatmul.mubr.bf16.vlgmr.msra.gmra.mrb[40].mxu1 %v5890_v52 }
 0x53f   : > { %10280 = vmatpush3.bf16.msra.mxu1 %v11817_v46  ;;  %10295 = vmatprep.mubr.bf16.mxu1 %v6124_v55 }
 0x540   : > { %10281 = vmatprep.subr.bf16.mxu1 %v11818_v59 }
 0x543   : > { %10282 = vmatpush3.bf16.msra.mxu1 %v11818_v59  ;;  %v6504_v59 = vpack.c.bf16 %v6502_v49, %v6502_v49 }
 0x544   : > { %10283 = vmatprep.subr.bf16.mxu1 %v11819_v42 }
 0x547   : > { %10284 = vmatpush3.bf16.msra.mxu1 %v11819_v42 }
 0x548   : > { %10285 = vmatprep.subr.bf16.mxu1 %v11820_v58 }
 0x54b   : > { %10286 = vmatpush3.bf16.msra.mxu1 %v11820_v58  ;;  %v11842_v58 = vld [vmem:[%s15022_s3 + $0x1c0] sm:$0xff]  }
 0x54c   : > { %10287 = vmatprep.subr.bf16.mxu1 %v11821_v60 }
 0x54f   : > { %10288 = vmatpush3.bf16.msra.mxu1 %v11821_v60 }
 0x550   : > { %10289 = vmatprep.subr.bf16.mxu1 %v11822_v61 }
 0x553   : > { %10290 = vmatpush3.bf16.msra.mxu1 %v11822_v61  ;;  %v11845_v61 = vld [vmem:[%s15022_s3 + $0xd0] sm:$0xff]  }
 0x554   : > { %10291 = vmatprep.subr.bf16.mxu1 %v11823_v63 }
 0x557   : > { %10292 = vmatpush3.bf16.msra.mxu1 %v11823_v63  ;;  %v11844_v63 = vld [vmem:[%s15022_s3 + $0x1c8] sm:$0xff]  }
 0x558   : > { %10293 = vmatprep.subr.bf16.mxu1 %v11824_v51 }
 0x55b   : > { %10294 = vmatpush3.bf16.msra.mxu1 %v11824_v51  ;;  %v11847_v51 = vld [vmem:[%s15022_s3 + $0xd8] sm:$0xff]  }
 0x55c   : > { %10299 = vmatprep.subr.bf16.mxu1 %v11825_v3 }
 0x55e   : > { %10296 = vmatmul.mubr.bf16.vlgmr.msra.gmra.mrb[44].mxu1 %v6125_v2  ;;  %v11849_v2 = vld [vmem:[%s15022_s3 + $0xe0] sm:$0xff]  }
 0x55f   : > { %10300 = vmatpush3.bf16.msra.mxu1 %v11825_v3  ;;  %v11848_v3 = vld [vmem:[%s15022_s3 + $0x1d8] sm:$0xff]  }
 0x560   : > { %10301 = vmatprep.subr.bf16.mxu1 %v11827_v6 }
 0x563   : > { %10302 = vmatpush3.bf16.msra.mxu1 %v11827_v6  ;;  %v11850_v6 = vld [vmem:[%s15022_s3 + $0x1e0] sm:$0xff]  }
 0x564   : > { %10303 = vmatprep.subr.bf16.mxu1 %v11829_v7 }
 0x567   : > { %10304 = vmatpush3.bf16.msra.mxu1 %v11829_v7  ;;  %v11852_v7 = vld [vmem:[%s15022_s3 + $0x1e8] sm:$0xff]  }
 0x568   : > { %10305 = vmatprep.subr.bf16.mxu1 %v11831_v10 }
 0x56b   : > { %10306 = vmatpush3.bf16.msra.mxu1 %v11831_v10  ;;  %v11854_v10 = vld [vmem:[%s15022_s3 + $0x1f0] sm:$0xff]  }
 0x56c   : > { %10307 = vmatprep.subr.bf16.mxu1 %v11833_v11 }
 0x56f   : > { %10308 = vmatpush3.bf16.msra.mxu1 %v11833_v11  ;;  %v11856_v11 = vld [vmem:[%s15022_s3 + $0x1f8] sm:$0xff]  }
 0x570   : > { %10309 = vmatprep.subr.bf16.mxu1 %v11835_v13 }
 0x573   : > { %10310 = vmatpush3.bf16.msra.mxu1 %v11835_v13 }
 0x574   : > { %10311 = vmatprep.subr.bf16.mxu1 %v11837_v15 }
 0x577   : > { %10312 = vmatpush3.bf16.msra.mxu1 %v11837_v15  ;;  %v11857_v15 = vld [vmem:[%s15022_s3 + $0x200] sm:$0xff]  }
 0x578   : > { %10313 = vmatprep.subr.bf16.mxu1 %v11839_v43 }
 0x57b   : > { %10314 = vmatpush3.bf16.msra.mxu1 %v11839_v43  ;;  %v11858_v43 = vld [vmem:[%s15022_s3 + $0x208] sm:$0xff]  }
 0x57c   : > { %10319 = vmatprep.subr.bf16.mxu1 %v11841_v18 }
 0x5f1   : > { %v10257_v27 = vpop.f32.mrb[36].mxu1 }
 0x5f2   : > { %v6011_v33 = vpop.f32.mrb[37].mxu1 }
 0x5f3   : > { %v10258_v62 = vpop.f32.mrb[38].mxu1 }
 0x5f4   : > { %v6014_v56 = vpop.f32.mrb[39].mxu1  ;;  %v11863_v62 = vld [vmem:[%s15022_s3 + $0x230] sm:$0xff]  }
 0x611   : > { %v10277_v19 = vpop.f32.mrb[40].mxu1 }
 0x612   : > { %v6116_v20 = vadd.f32 %v10277_v19, %v10257_v27  ;;  %v6107_v54 = vpop.f32.mrb[41].mxu1  ;;  %v11861_v27 = vld [vmem:[%s15022_s3 + $0x220] sm:$0xff]  }
 0x613   : > { %v6108_v53 = vadd.f32 %v6107_v54, %v6011_v33  ;;  %v10278_v29 = vpop.f32.mrb[42].mxu1  ;;  %v11862_v33 = vld [vmem:[%s15022_s3 + $0x228] sm:$0xff]  }
 0x614   : > { %v6110_v8 = vpop.f32.mrb[43].mxu1  ;;  %v11866_v29 = vld [vmem:[%s15024_s5 + $0x8] sm:$0xff]  }
 0x615   : > { %v6111_v21 = vadd.f32 %v6110_v8, %v6014_v56  ;;  %v11864_v56 = vld [vmem:[%s15022_s3 + $0x238] sm:$0xff]   ;;  %v11867_v8 = vld [vmem:[%s15024_s5 + $0x10] sm:$0xff]  }
 0x631   : > { %v10297_v23 = vpop.f32.mrb[44].mxu1 }
 0x632   : > { %v6241_v57 = vadd.f32 %v10297_v23, %v6116_v20  ;;  %v6225_v37 = vpop.f32.mrb[45].mxu1  ;;  %v6990_v20 = vld [vmem:[#allocation3 + $0x19] ss:$2 sm:$0x1] }
 0x633   : > { %v6239_v26 = vadd.f32 %v6225_v37, %v6108_v53  ;;  %v10298_v28 = vpop.f32.mrb[46].mxu1  ;;  %v11865_v53 = vld [vmem:[%s15024_s5] sm:$0xff]   ;;  %v11872_v37 = vld [vmem:[%s15024_s5 + $0x38] sm:$0xff]  }
 0x634   : > { %v6251_v30 = vadd.f32 %v9556_v24, %v6241_v57  ;;  %v6228_v47 = vpop.f32.mrb[47].mxu1  ;;  %v11869_v23 = vld [vmem:[%s15024_s5 + $0x20] sm:$0xff]   ;;  %v11871_v57 = vld [vmem:[%s15024_s5 + $0x30] sm:$0xff]  }
 0x635   : > { %v6249_v22 = vadd.f32 %v9556_v24, %v6239_v26  ;;  %v6240_v32 = vadd.f32 %v6228_v47, %v6111_v21  ;;  %v11868_v21 = vld [vmem:[%s15024_s5 + $0x18] sm:$0xff]  }
 0x636   : > { %vm6254_vm2 = vcmp.ge.f32.partialorder %v6251_v30, 0.0  ;;  %v6257_v34 = vmul.f32 0.2, %v6251_v30 }
 0x637   : > { %vm6252_vm3 = vcmp.ge.f32.partialorder %v6249_v22, 0.0  ;;  %v6255_v35 = vmul.f32 0.2, %v6249_v22  ;;  %v6250_v36 = vadd.f32 %v9556_v24, %v6240_v32  ;;  %v11870_v24 = vld [vmem:[%s15024_s5 + $0x28] sm:$0xff]  }
 0x638   : > { %v6260_v1 = vsel %vm6254_vm2, %v6251_v30, %v6257_v34 }
 0x639   : > { %6263 = vst [vmem:[#allocation3 + $0x18] sm:$0x1] %v6260_v1  ;;  %v6258_v41 = vsel %vm6252_vm3, %v6249_v22, %v6255_v35  ;;  %vm6253_vm4 = vcmp.ge.f32.partialorder %v6250_v36, 0.0  ;;  %v6256_v31 = vmul.f32 0.2, %v6250_v36 }
 0x63a   : > { %6261 = vst [vmem:[#allocation3 + $0x8] sm:$0xff] %v6258_v41 }
 0x63b   : > { %v6259_v44 = vsel %vm6253_vm4, %v6250_v36, %v6256_v31  ;;  %v9630_v31 = vld [vmem:[%s15023_s4 + $0x1] ss:$0 sm:$0xff] }
 0x63c   : > { %6262 = vst [vmem:[#allocation3 + $0x10] sm:$0xff] %v6259_v44  ;;  %v6289_v25 = vpack.c.bf16 %v6259_v44, %v6258_v41 }
 0x63e   : > { %10315 = vmatprep.mubr.bf16.mxu1 %v6289_v25 }
 0x640   : > { %v6288_v45 = vld [vmem:[#allocation3 + $0x18] sm:$0x1] }
 0x641   : > { %v6290_v46 = vpack.c.bf16 %v6288_v45, %v6288_v45  ;;  %v6264_v48 = vld [vmem:[#allocation3 + $0x7] sm:$0xff]  ;;  %v6790_v14 = vld [vmem:[#allocation3 + $0x18] ss:$2 sm:$0x1] }
 0x643   : > { %v6500_v50 = vld [vmem:[#allocation3 + $0x9] sm:$0xff]  ;;  %v6501_v52 = vld [vmem:[#allocation3 + $0x11] sm:$0xff]  ;;  %10316 = vmatmul.mubr.bf16.vlgmr.msra.gmra.mrb[48].mxu1 %v6290_v46 }
 0x644   : > { %v6265_v55 = vld [vmem:[#allocation3 + $0xf] sm:$0xff]  ;;  %v6503_v42 = vpack.c.bf16 %v6501_v52, %v6500_v50  ;;  %10320 = vmatpush3.bf16.msra.mxu1 %v11841_v18  ;;  %v6266_v39 = vld [vmem:[#allocation3 + $0x17] sm:$0x1] }
 0x645   : > { %v6267_v60 = vpack.c.bf16 %v6265_v55, %v6264_v48  ;;  %10321 = vmatprep.subr.bf16.mxu1 %v11843_v5  ;;  %v6268_v12 = vpack.c.bf16 %v6266_v39, %v6266_v39  ;;  %v6788_v13 = vld [vmem:[#allocation3 + $0x8] ss:$2 sm:$0xff]  ;;  %v6988_v19 = vld [vmem:[#allocation3 + $0x9] ss:$2 sm:$0xff]  ;;  %v11877_v39 = vld [vmem:[%s15022_s3 + $0x1a0] sm:$0xff]  }
 0x646   : > { %10355 = vmatprep.mubr.bf16.mxu0 %v6503_v42  ;;  %v6791_v16 = vpack.c.bf16 %v6790_v14, %v6788_v13  ;;  %v11860_v18 = vld [vmem:[%s15022_s3 + $0x218] sm:$0xff]   ;;  %v6991_v54 = vpack.c.bf16 %v6990_v20, %v6988_v19  ;;  %v11879_v14 = vld [vmem:[%s15022_s3 + $0x1b0] sm:$0xff]   ;;  %v11884_v19 = vld [vmem:[%s15022_s3 + $0x288] sm:$0xff]  }
 0x647   : > { %10335 = vmatprep.mubr.bf16.mxu1 %v6267_v60  ;;  %10356 = vmatmul.mubr.bf16.vlgmr.msra.gmra.mrb[24].mxu0 %v6504_v59  ;;  %v11885_v20 = vld [vmem:[%s15022_s3 + $0x250] sm:$0xff]  }
 0x648   : > { %10380 = vmatpush3.bf16.msra.mxu0 %v11842_v58  ;;  %10322 = vmatpush3.bf16.msra.mxu1 %v11843_v5 }
 0x649   : > { %10381 = vmatprep.subr.bf16.mxu0 %v11991_v40  ;;  %10323 = vmatprep.subr.bf16.mxu1 %v11845_v61 }
 0x64a   : > { %10395 = vmatprep.mubr.msk.bf16.mxu0 %vm11992_vm5, %v11991_v40 }
 0x64c   : > { %10382 = vmatpush3.bf16.msra.mxu0 %v11844_v63  ;;  %10324 = vmatpush3.bf16.msra.mxu1 %v11845_v61 }
 0x64d   : > { %10383 = vmatprep.subr.bf16.mxu0 %v11991_v40  ;;  %10325 = vmatprep.subr.bf16.mxu1 %v11847_v51 }
 0x650   : > { %10384 = vmatpush3.bf16.msra.mxu0 %v11846_v0  ;;  %10326 = vmatpush3.bf16.msra.mxu1 %v11847_v51 }
 0x651   : > { %10385 = vmatprep.subr.bf16.mxu0 %v11991_v40  ;;  %10327 = vmatprep.subr.bf16.mxu1 %v11849_v2 }
 0x654   : > { %10386 = vmatpush3.bf16.msra.mxu0 %v11848_v3  ;;  %10328 = vmatpush3.bf16.msra.mxu1 %v11849_v2 }
 0x655   : > { %10387 = vmatprep.subr.bf16.mxu0 %v11991_v40  ;;  %10329 = vmatprep.subr.bf16.mxu1 %v11851_v4 }
 0x658   : > { %10388 = vmatpush3.bf16.msra.mxu0 %v11850_v6  ;;  %10330 = vmatpush3.bf16.msra.mxu1 %v11851_v4  ;;  %v11873_v6 = vld [vmem:[%s15022_s3 + $0x180] sm:$0xff]  }
 0x659   : > { %10389 = vmatprep.subr.bf16.mxu0 %v11991_v40  ;;  %10331 = vmatprep.subr.bf16.mxu1 %v11853_v38 }
 0x65c   : > { %10390 = vmatpush3.bf16.msra.mxu0 %v11852_v7  ;;  %10332 = vmatpush3.bf16.msra.mxu1 %v11853_v38  ;;  %v11874_v7 = vld [vmem:[%s15022_s3 + $0x188] sm:$0xff]  }
 0x65d   : > { %10391 = vmatprep.subr.bf16.mxu0 %v11991_v40  ;;  %10333 = vmatprep.subr.bf16.mxu1 %v11855_v9 }
 0x660   : > { %10392 = vmatpush3.bf16.msra.mxu0 %v11854_v10  ;;  %10334 = vmatpush3.bf16.msra.mxu1 %v11855_v9  ;;  %v11875_v9 = vld [vmem:[%s15022_s3 + $0x190] sm:$0xff]   ;;  %v11876_v10 = vld [vmem:[%s15022_s3 + $0x198] sm:$0xff]  }
 0x661   : > { %10393 = vmatprep.subr.bf16.mxu0 %v11991_v40  ;;  %10359 = vmatprep.subr.bf16.mxu1 %v11865_v53 }
 0x663   : > { %10336 = vmatmul.mubr.bf16.vlgmr.msra.gmra.mrb[52].mxu1 %v6268_v12 }
 0x664   : > { %10394 = vmatpush3.bf16.msra.mxu0 %v11856_v11  ;;  %10360 = vmatpush3.bf16.msra.mxu1 %v11865_v53  ;;  %v11878_v11 = vld [vmem:[%s15022_s3 + $0x1a8] sm:$0xff]   ;;  %v11887_v53 = vld [vmem:[%s15022_s3 + $0x258] sm:$0xff]  }
 0x665   : > { %10419 = vmatprep.subr.bf16.mxu0 %v11991_v40  ;;  %10361 = vmatprep.subr.bf16.mxu1 %v11866_v29 }
 0x667   : > { %10396 = vmatmul.mubr.bf16.vlgmr.msra.gmra.mrb[28].mxu0 %v6791_v16 }
 0x668   : > { %10420 = vmatpush3.bf16.msra.mxu0 %v11857_v15  ;;  %10435 = vmatprep.mubr.msk.bf16.mxu0 %vm11992_vm5, %v11991_v40 }
 0x669   : > { %10421 = vmatprep.subr.bf16.mxu0 %v11991_v40  ;;  %10362 = vmatpush3.bf16.msra.mxu1 %v11866_v29  ;;  %v11888_v29 = vld [vmem:[%s15022_s3 + $0x298] sm:$0xff]  }
 0x66a   : > { %10363 = vmatprep.subr.bf16.mxu1 %v11867_v8 }
 0x66c   : > { %10422 = vmatpush3.bf16.msra.mxu0 %v11858_v43  ;;  %v11880_v43 = vld [vmem:[%s15022_s3 + $0x1b8] sm:$0xff]  }
 0x66d   : > { %10423 = vmatprep.subr.bf16.mxu0 %v11991_v40  ;;  %10364 = vmatpush3.bf16.msra.mxu1 %v11867_v8  ;;  %v11889_v8 = vld [vmem:[%s15022_s3 + $0x260] sm:$0xff]  }
 0x66e   : > { %10365 = vmatprep.subr.bf16.mxu1 %v11868_v21 }
 0x670   : > { %10424 = vmatpush3.bf16.msra.mxu0 %v11859_v17  ;;  %v6766_v17 = vld [vmem:[#allocation3 + $0x7] ss:$2 sm:$0xff] }
 0x671   : > { %10425 = vmatprep.subr.bf16.mxu0 %v11991_v40  ;;  %10366 = vmatpush3.bf16.msra.mxu1 %v11868_v21  ;;  %v11890_v21 = vld [vmem:[%s15022_s3 + $0x2a0] sm:$0xff]  }
 0x672   : > { %10367 = vmatprep.subr.bf16.mxu1 %v11869_v23 }
 0x674   : > { %10426 = vmatpush3.bf16.msra.mxu0 %v11860_v18  ;;  %v6768_v18 = vld [vmem:[#allocation3 + $0x17] ss:$2 sm:$0x1] }
 0x675   : > { %10427 = vmatprep.subr.bf16.mxu0 %v11991_v40  ;;  %10368 = vmatpush3.bf16.msra.mxu1 %v11869_v23  ;;  %v11891_v23 = vld [vmem:[%s15022_s3 + $0x268] sm:$0xff]  }
 0x676   : > { %10369 = vmatprep.subr.bf16.mxu1 %v11870_v24 }
 0x678   : > { %10428 = vmatpush3.bf16.msra.mxu0 %v11861_v27  ;;  %v6769_v27 = vpack.c.bf16 %v6768_v18, %v6766_v17  ;;  %v11910_v17 = vld [vmem:[%s15022_s3 + $0x368] sm:$0xff]   ;;  %v11911_v18 = vld [vmem:[%s15022_s3 + $0x370] sm:$0xff]  }
 0x679   : > { %10429 = vmatprep.subr.bf16.mxu0 %v11991_v40  ;;  %10370 = vmatpush3.bf16.msra.mxu1 %v11870_v24  ;;  %v11892_v24 = vld [vmem:[%s15022_s3 + $0x2a8] sm:$0xff]  }
 0x67a   : > { %10371 = vmatprep.subr.bf16.mxu1 %v11871_v57 }
 0x67c   : > { %10430 = vmatpush3.bf16.msra.mxu0 %v11862_v33  ;;  %v11881_v33 = vld [vmem:[%s15022_s3 + $0x240] sm:$0xff]  }
 0x67d   : > { %10431 = vmatprep.subr.bf16.mxu0 %v11991_v40  ;;  %10372 = vmatpush3.bf16.msra.mxu1 %v11871_v57  ;;  %v11893_v57 = vld [vmem:[%s15022_s3 + $0x270] sm:$0xff]  }
 0x67e   : > { %10373 = vmatprep.subr.bf16.mxu1 %v11872_v37 }
 0x680   : > { %10432 = vmatpush3.bf16.msra.mxu0 %v11863_v62  ;;  %v11882_v62 = vld [vmem:[%s15022_s3 + $0x280] sm:$0xff]  }
 0x681   : > { %10433 = vmatprep.subr.bf16.mxu0 %v11991_v40  ;;  %10374 = vmatpush3.bf16.msra.mxu1 %v11872_v37  ;;  %v11894_v37 = vld [vmem:[%s15022_s3 + $0x2b0] sm:$0xff]  }
 0x682   : > { %10399 = vmatprep.subr.bf16.mxu1 %v11991_v40 }
 0x684   : > { %10434 = vmatpush3.bf16.msra.mxu0 %v11864_v56  ;;  %v11883_v56 = vld [vmem:[%s15022_s3 + $0x248] sm:$0xff]  }
 0x685   : > { %10459 = vmatprep.subr.bf16.mxu0 %v11991_v40 }
 0x687   : > { %10436 = vmatmul.mubr.bf16.vlgmr.msra.gmra.mrb[32].mxu0 %v6991_v54  ;;  %v11886_v54 = vld [vmem:[%s15022_s3 + $0x290] sm:$0xff]  }
 0x688   : > { %10475 = vmatprep.mubr.msk.bf16.mxu0 %vm11992_vm5, %v11991_v40  ;;  %10460 = vmatpush3.bf16.msra.mxu0 %v11881_v33 }
 0x689   : > { %10461 = vmatprep.subr.bf16.mxu0 %v11991_v40 }
 0x68c   : > { %10462 = vmatpush3.bf16.msra.mxu0 %v11883_v56 }
 0x68d   : > { %10463 = vmatprep.subr.bf16.mxu0 %v11991_v40 }
 0x690   : > { %10464 = vmatpush3.bf16.msra.mxu0 %v11885_v20  ;;  %v11915_v20 = vld [vmem:[%s15022_s3 + $0x390] sm:$0xff]  }
 0x691   : > { %10465 = vmatprep.subr.bf16.mxu0 %v11991_v40 }
 0x694   : > { %10466 = vmatpush3.bf16.msra.mxu0 %v11887_v53  ;;  %v11917_v53 = vld [vmem:[%s15022_s3 + $0x3a0] sm:$0xff]  }
 0x695   : > { %10467 = vmatprep.subr.bf16.mxu0 %v11991_v40 }
 0x698   : > { %10468 = vmatpush3.bf16.msra.mxu0 %v11889_v8  ;;  %v11919_v8 = vld [vmem:[%s15022_s3 + $0x3b0] sm:$0xff]  }
 0x699   : > { %10469 = vmatprep.subr.bf16.mxu0 %v11991_v40 }
 0x69c   : > { %10470 = vmatpush3.bf16.msra.mxu0 %v11891_v23  ;;  %v11922_v23 = vld [vmem:[%s15024_s5 + $0x8] sm:$0xff]  }
 0x69d   : > { %10471 = vmatprep.subr.bf16.mxu0 %v11991_v40 }
 0x6a0   : > { %10472 = vmatpush3.bf16.msra.mxu0 %v11893_v57 }
 0x6a1   : > { %10473 = vmatprep.subr.bf16.mxu0 %v11991_v40 }
 0x716   : > { %v10317_v26 = vpop.f32.mrb[48].mxu1 }
 0x717   : > { %v6390_v28 = vpop.f32.mrb[49].mxu1 }
 0x718   : > { %v10318_v30 = vpop.f32.mrb[50].mxu1 }
 0x719   : > { %v6393_v47 = vpop.f32.mrb[51].mxu1  ;;  %v14667_v30 = vld [vmem:[%s15025_s6] ss:$0 sm:$0xff] }
 0x71a   : > { %v10357_v22 = vpop.f32.mrb[24].mxu0 }
 0x71b   : > { %v6604_v32 = vpop.f32.mrb[25].mxu0 }
 0x71c   : > { %v10358_v34 = vpop.f32.mrb[26].mxu0 }
 0x71d   : > { %v6607_v35 = vpop.f32.mrb[27].mxu0 }
 0x736   : > { %v10337_v36 = vpop.f32.mrb[52].mxu1 }
 0x737   : > { %v6495_v1 = vadd.f32 %v10337_v36, %v10317_v26  ;;  %v6486_v41 = vpop.f32.mrb[53].mxu1  ;;  %v11895_v26 = vld [vmem:[%s15022_s3 + $0x278] sm:$0xff]  }
 0x738   : > { %v6487_v44 = vadd.f32 %v6486_v41, %v6390_v28  ;;  %v10338_v25 = vpop.f32.mrb[54].mxu1  ;;  %v11896_v28 = vld [vmem:[%s15022_s3 + $0x2b8] sm:$0xff]   ;;  %10474 = vmatpush3.bf16.msra.mxu0 %v11895_v26 }
 0x739   : > { %v6620_v45 = vadd.f32 %v10357_v22, %v6495_v1  ;;  %v6489_v49 = vpop.f32.mrb[55].mxu1  ;;  %10499 = vmatprep.subr.bf16.mxu0 %v11991_v40  ;;  %v9713_v25 = vld [vmem:[%s15023_s4 + $0x2] ss:$0 sm:$0xff] }
 0x73a   : > { %v14555_v46 = vpop.f32.mrb[28].mxu0  ;;  %v6618_v5 = vadd.f32 %v6604_v32, %v6487_v44  ;;  %v6490_v48 = vadd.f32 %v6489_v49, %v6393_v47 }
 0x73b   : > { %v6631_v50 = vadd.f32 %v9630_v31, %v6620_v45  ;;  %v10397_v52 = vpop.f32.mrb[29].mxu0 }
 0x73c   : > { %v6629_v59 = vadd.f32 %v9630_v31, %v6618_v5  ;;  %v14557_v55 = vpop.f32.mrb[30].mxu0  ;;  %v6619_v42 = vadd.f32 %v6607_v35, %v6490_v48 }
 0x73d   : > { %v6637_v58 = vmul.f32 0.2, %v6631_v50  ;;  %v10398_v60 = vpop.f32.mrb[31].mxu0  ;;  %vm6634_vm6 = vcmp.ge.f32.partialorder %v6631_v50, 0.0 }
 0x73e   : > { %v6635_v61 = vmul.f32 0.2, %v6629_v59  ;;  %v6630_v63 = vadd.f32 %v9630_v31, %v6619_v42  ;;  %vm6632_vm7 = vcmp.ge.f32.partialorder %v6629_v59, 0.0 }
 0x73f   : > { %v6640_v0 = vsel %vm6634_vm6, %v6631_v50, %v6637_v58 }
 0x740   : > { %v6636_v51 = vmul.f32 0.2, %v6630_v63  ;;  %vm6633_vm8 = vcmp.ge.f32.partialorder %v6630_v63, 0.0  ;;  %v6638_v2 = vsel %vm6632_vm7, %v6629_v59, %v6635_v61  ;;  %v6642_v38 = vpack.c.bf16 %v6640_v0, %v6640_v0 }
 0x742   : > { %v6639_v3 = vsel %vm6633_vm8, %v6630_v63, %v6636_v51 }
 0x743   : > { %v6641_v4 = vpack.c.bf16 %v6639_v3, %v6638_v2  ;;  %v11898_v3 = vld [vmem:[%s15022_s3 + $0x2c8] sm:$0xff]  }
 0x745   : > { %10375 = vmatprep.mubr.bf16.mxu1 %v6641_v4  ;;  %v14690_v4 = vld [vmem:[#allocation2] sm:$0xff] }
 0x746   : > { %10376 = vmatmul.mubr.bf16.vlgmr.msra.gmra.mrb[56].mxu1 %v6642_v38  ;;  %v11901_v38 = vld [vmem:[%s15022_s3 + $0x2e0] sm:$0xff]  }
 0x747   : > { %10400 = vmatpush3.bf16.msra.mxu1 %v11873_v6  ;;  %10415 = vmatprep.mubr.msk.bf16.mxu1 %vm11992_vm5, %v11991_v40  ;;  %v11899_v6 = vld [vmem:[%s15022_s3 + $0x2d0] sm:$0xff]  }
 0x748   : > { %10401 = vmatprep.subr.bf16.mxu1 %v11991_v40 }
 0x74b   : > { %10402 = vmatpush3.bf16.msra.mxu1 %v11874_v7  ;;  %v11902_v7 = vld [vmem:[%s15022_s3 + $0x2e8] sm:$0xff]  }
 0x74c   : > { %10403 = vmatprep.subr.bf16.mxu1 %v11991_v40 }
 0x74f   : > { %10404 = vmatpush3.bf16.msra.mxu1 %v11875_v9  ;;  %v11903_v9 = vld [vmem:[%s15022_s3 + $0x2f0] sm:$0xff]  }
 0x750   : > { %10405 = vmatprep.subr.bf16.mxu1 %v11991_v40 }
 0x753   : > { %10406 = vmatpush3.bf16.msra.mxu1 %v11876_v10  ;;  %v11904_v10 = vld [vmem:[%s15022_s3 + $0x2f8] sm:$0xff]  }
 0x754   : > { %10407 = vmatprep.subr.bf16.mxu1 %v11991_v40 }
 0x757   : > { %10408 = vmatpush3.bf16.msra.mxu1 %v11877_v39 }
 0x758   : > { %10409 = vmatprep.subr.bf16.mxu1 %v11991_v40 }
 0x75a   : > { %v14584_v12 = vpop.f32.mrb[32].mxu0 }
 0x75b   : > { %v10437_v13 = vpop.f32.mrb[33].mxu0  ;;  %10410 = vmatpush3.bf16.msra.mxu1 %v11878_v11  ;;  %v7337_v11 = vld [vmem:[#allocation4 + $0x11] sm:$0x1] }
 0x75c   : > { %v14589_v15 = vpop.f32.mrb[34].mxu0  ;;  %10411 = vmatprep.subr.bf16.mxu1 %v11991_v40 }
 0x75d   : > { %v10438_v16 = vpop.f32.mrb[35].mxu0 }
 0x75e   : > { %v11908_v16 = vld [vmem:[%s15022_s3 + $0x358] sm:$0xff]  }
 0x75f   : > { %10412 = vmatpush3.bf16.msra.mxu1 %v11879_v14  ;;  %v11906_v14 = vld [vmem:[%s15022_s3 + $0x348] sm:$0xff]  }
 0x760   : > { %10413 = vmatprep.subr.bf16.mxu1 %v11991_v40 }
 0x763   : > { %10414 = vmatpush3.bf16.msra.mxu1 %v11880_v43  ;;  %v11909_v43 = vld [vmem:[%s15022_s3 + $0x360] sm:$0xff]  }
 0x764   : > { %10439 = vmatprep.subr.bf16.mxu1 %v11991_v40 }
 0x766   : > { %10416 = vmatmul.mubr.bf16.vlgmr.msra.gmra.mrb[60].mxu1 %v6769_v27  ;;  %v11912_v27 = vld [vmem:[%s15022_s3 + $0x378] sm:$0xff]  }
 0x767   : > { %10455 = vmatprep.mubr.msk.bf16.mxu1 %vm11992_vm5, %v11991_v40  ;;  %10440 = vmatpush3.bf16.msra.mxu1 %v11882_v62  ;;  %v11913_v62 = vld [vmem:[%s15022_s3 + $0x380] sm:$0xff]  }
 0x768   : > { %10441 = vmatprep.subr.bf16.mxu1 %v11991_v40 }
 0x76b   : > { %10442 = vmatpush3.bf16.msra.mxu1 %v11884_v19  ;;  %v11914_v19 = vld [vmem:[%s15022_s3 + $0x388] sm:$0xff]  }
 0x76c   : > { %10443 = vmatprep.subr.bf16.mxu1 %v11991_v40 }
 0x76f   : > { %10444 = vmatpush3.bf16.msra.mxu1 %v11886_v54  ;;  %v11916_v54 = vld [vmem:[%s15022_s3 + $0x398] sm:$0xff]  }
 0x770   : > { %10445 = vmatprep.subr.bf16.mxu1 %v11991_v40 }
 0x773   : > { %10446 = vmatpush3.bf16.msra.mxu1 %v11888_v29  ;;  %v11918_v29 = vld [vmem:[%s15022_s3 + $0x3a8] sm:$0xff]  }
 0x774   : > { %10447 = vmatprep.subr.bf16.mxu1 %v11991_v40 }
 0x777   : > { %10448 = vmatpush3.bf16.msra.mxu1 %v11890_v21  ;;  %v11921_v21 = vld [vmem:[%s15024_s5] sm:$0xff]  }
 0x778   : > { %10449 = vmatprep.subr.bf16.mxu1 %v11991_v40 }
 0x77b   : > { %10450 = vmatpush3.bf16.msra.mxu1 %v11892_v24  ;;  %v11920_v24 = vld [vmem:[%s15022_s3 + $0x3b8] sm:$0xff]  }
 0x77c   : > { %10451 = vmatprep.subr.bf16.mxu1 %v11991_v40 }
 0x77f   : > { %10452 = vmatpush3.bf16.msra.mxu1 %v11894_v37  ;;  %v11923_v37 = vld [vmem:[%s15024_s5 + $0x10] sm:$0xff]  }
 0x780   : > { %10453 = vmatprep.subr.bf16.mxu1 %v11991_v40 }
 0x783   : > { %10454 = vmatpush3.bf16.msra.mxu1 %v11896_v28  ;;  %v11924_v28 = vld [vmem:[%s15024_s5 + $0x18] sm:$0xff]  }
 0x784   : > { %10479 = vmatprep.subr.bf16.mxu1 %v11991_v40 }
 0x819   : > { %v10377_v47 = vpop.f32.mrb[56].mxu1 }
 0x81a   : > { %v6757_v22 = vadd.f32 %v10377_v47, %v14667_v30  ;;  %v6748_v32 = vpop.f32.mrb[57].mxu1  ;;  %v11925_v47 = vld [vmem:[%s15024_s5 + $0x20] sm:$0xff]  }
 0x81b   : > { %v6749_v34 = vadd.f32 %v14667_v30, %v6748_v32  ;;  %v10378_v35 = vpop.f32.mrb[58].mxu1  ;;  %v11927_v32 = vld [vmem:[%s15024_s5 + $0x30] sm:$0xff]  }
 0x81c   : > { %6764 = vst [vmem:[%s346_s25 + $0x10] sm:$0x1] %v6757_v22  ;;  %v6751_v36 = vpop.f32.mrb[59].mxu1  ;;  %v11926_v22 = vld [vmem:[%s15024_s5 + $0x28] sm:$0xff]  }
 0x81d   : > { %6762 = vst [vmem:[%s346_s25] sm:$0xff] %v6749_v34  ;;  %v6752_v1 = vadd.f32 %v14667_v30, %v6751_v36  ;;  %v11928_v34 = vld [vmem:[%s15024_s5 + $0x38] sm:$0xff]  }
 0x81f   : > { %6763 = vst [vmem:[%s346_s25 + $0x8] sm:$0xff] %v6752_v1 }
 0x839   : > { %v6980_v41 = vpop.f32.mrb[60].mxu1 }
 0x83a   : > { %v6981_v31 = vadd.f32 %v6980_v41, %v14555_v46  ;;  %v10417_v44 = vpop.f32.mrb[61].mxu1 }
 0x83b   : > { %v6983_v45 = vpop.f32.mrb[62].mxu1 }
 0x83c   : > { %v7098_v49 = vadd.f32 %v14584_v12, %v6981_v31  ;;  %v6984_v5 = vadd.f32 %v6983_v45, %v14557_v55  ;;  %v10418_v48 = vpop.f32.mrb[63].mxu1  ;;  %v11897_v55 = vld [vmem:[%s15022_s3 + $0x2c0] sm:$0xff]  }
 0x83d   : > { %v11905_v12 = vld [vmem:[%s15022_s3 + $0x340] sm:$0xff]  }
 0x83e   : > { %v7108_v50 = vadd.f32 %v9713_v25, %v7098_v49  ;;  %v7099_v52 = vadd.f32 %v14589_v15, %v6984_v5  ;;  %v11907_v15 = vld [vmem:[%s15022_s3 + $0x350] sm:$0xff]  }
 0x840   : > { %vm7110_vm9 = vcmp.ge.f32.partialorder %v7108_v50, 0.0  ;;  %v7112_v59 = vmul.f32 0.2, %v7108_v50  ;;  %v7109_v42 = vadd.f32 %v9713_v25, %v7099_v52 }
 0x842   : > { %v7114_v58 = vsel %vm7110_vm9, %v7108_v50, %v7112_v59  ;;  %vm7111_vm10 = vcmp.ge.f32.partialorder %v7109_v42, 0.0  ;;  %v7113_v46 = vmul.f32 0.2, %v7109_v42  ;;  %v9787_v50 = vld [vmem:[%s15023_s4 + $0x3] ss:$0 sm:$0xff] }
 0x843   : > { %7116 = vst [vmem:[#allocation4 + $0x8] sm:$0xff] %v7114_v58 }
 0x844   : > { %v7115_v60 = vsel %vm7111_vm10, %v7109_v42, %v7113_v46 }
 0x845   : > { %7117 = vst [vmem:[#allocation4 + $0x10] sm:$0x1] %v7115_v60 }
 0x84a   : > { %v7118_v61 = vld [vmem:[#allocation4 + $0x7] sm:$0xff]  ;;  %v7119_v63 = vld [vmem:[#allocation4 + $0xf] sm:$0x1] }
 0x84b   : > { %v7120_v51 = vpack.c.bf16 %v7119_v63, %v7118_v61  ;;  %v7795_v57 = vld [vmem:[#allocation4 + $0x9] ss:$2 sm:$0x1f] }
 0x84c   : > { %v7139_v0 = vld [vmem:[#allocation4 + $0x10] sm:$0x1]  ;;  %v7796_v26 = vpack.c.bf16 %v7795_v57, %v7795_v57  ;;  %v11949_v57 = vld [vmem:[%s15022_s3 + $0x430] sm:$0xff]  }
 0x84d   : > { %10476 = vmatmul.mubr.bf16.vlgmr.msra.gmra.mrb[36].mxu0 %v7120_v51  ;;  %v7140_v2 = vpack.c.bf16 %v7139_v0, %v7114_v58  ;;  %v7336_v39 = vld [vmem:[#allocation4 + $0x9] sm:$0xff] }
 0x84e   : > { %10515 = vmatprep.mubr.msk.bf16.mxu0 %vm11992_vm5, %v11991_v40  ;;  %v11900_v40 = vld [vmem:[%s15022_s3 + $0x2d8] sm:$0xff]   ;;  %v7338_v13 = vpack.c.bf16 %v7337_v11, %v7336_v39  ;;  %10500 = vmatpush3.bf16.msra.mxu0 %v11921_v21  ;;  %v11935_v11 = vld [vmem:[%s15022_s3 + $0x330] sm:$0xff]   ;;  %v11946_v21 = vld [vmem:[%s15022_s3 + $0x3e0] sm:$0xff]  }
 0x84f   : > { %10456 = vmatmul.mubr.bf16.vlgmr.msra.gmra.mrb[64].mxu1 %v7140_v2  ;;  %v7599_v33 = vld [vmem:[#allocation4 + $0x8] ss:$2 sm:$0x1f]  ;;  %10501 = vmatprep.subr.bf16.mxu0 %v14690_v4 }
 0x850   : > { %10480 = vmatpush3.bf16.msra.mxu1 %v11897_v55  ;;  %10495 = vmatprep.mubr.msk.bf16.mxu1 %vm11992_vm5, %v14690_v4  ;;  %v7600_v56 = vpack.c.bf16 %v7599_v33, %v7599_v33  ;;  %v11929_v2 = vld [vmem:[%s15022_s3 + $0x300] sm:$0xff]  }
 0x851   : > { %10481 = vmatprep.subr.bf16.mxu1 %v14690_v4  ;;  %v11937_v33 = vld [vmem:[%s15022_s3 + $0x400] sm:$0xff]  }
 0x852   : > { %10502 = vmatpush3.bf16.msra.mxu0 %v11922_v23  ;;  %v11947_v23 = vld [vmem:[%s15022_s3 + $0x428] sm:$0xff]  }
 0x853   : > { %10503 = vmatprep.subr.bf16.mxu0 %v14690_v4 }
 0x854   : > { %10482 = vmatpush3.bf16.msra.mxu1 %v11898_v3 }
 0x855   : > { %10483 = vmatprep.subr.bf16.mxu1 %v14690_v4 }
 0x856   : > { %10504 = vmatpush3.bf16.msra.mxu0 %v11923_v37  ;;  %v11950_v37 = vld [vmem:[%s15022_s3 + $0x3f0] sm:$0xff]  }
 0x857   : > { %10505 = vmatprep.subr.bf16.mxu0 %v14690_v4 }
 0x858   : > { %10484 = vmatpush3.bf16.msra.mxu1 %v11899_v6  ;;  %v11930_v6 = vld [vmem:[%s15022_s3 + $0x308] sm:$0xff]  }
 0x859   : > { %10485 = vmatprep.subr.bf16.mxu1 %v14690_v4 }
 0x85a   : > { %10506 = vmatpush3.bf16.msra.mxu0 %v11924_v28  ;;  %v11952_v28 = vld [vmem:[%s15022_s3 + $0x3f8] sm:$0xff]  }
 0x85b   : > { %10507 = vmatprep.subr.bf16.mxu0 %v14690_v4 }
 0x85c   : > { %10486 = vmatpush3.bf16.msra.mxu1 %v11900_v40  ;;  %v11931_v40 = vld [vmem:[%s15022_s3 + $0x310] sm:$0xff]  }
 0x85d   : > { %10487 = vmatprep.subr.bf16.mxu1 %v14690_v4 }
 0x85e   : > { %10508 = vmatpush3.bf16.msra.mxu0 %v11925_v47 }
 0x85f   : > { %10509 = vmatprep.subr.bf16.mxu0 %v14690_v4 }
 0x860   : > { %10488 = vmatpush3.bf16.msra.mxu1 %v11901_v38  ;;  %v11932_v38 = vld [vmem:[%s15022_s3 + $0x318] sm:$0xff]  }
 0x861   : > { %10489 = vmatprep.subr.bf16.mxu1 %v14690_v4 }
 0x862   : > { %10510 = vmatpush3.bf16.msra.mxu0 %v11926_v22 }
 0x863   : > { %10511 = vmatprep.subr.bf16.mxu0 %v14690_v4 }
 0x864   : > { %10490 = vmatpush3.bf16.msra.mxu1 %v11902_v7  ;;  %v11933_v7 = vld [vmem:[%s15022_s3 + $0x320] sm:$0xff]  }
 0x865   : > { %10491 = vmatprep.subr.bf16.mxu1 %v14690_v4 }
 0x866   : > { %10512 = vmatpush3.bf16.msra.mxu0 %v11927_v32 }
 0x867   : > { %10513 = vmatprep.subr.bf16.mxu0 %v14690_v4 }
 0x868   : > { %10492 = vmatpush3.bf16.msra.mxu1 %v11903_v9  ;;  %v11934_v9 = vld [vmem:[%s15022_s3 + $0x328] sm:$0xff]  }
 0x869   : > { %10493 = vmatprep.subr.bf16.mxu1 %v14690_v4 }
 0x86a   : > { %10514 = vmatpush3.bf16.msra.mxu0 %v11928_v34 }
 0x86b   : > { %10539 = vmatprep.subr.bf16.mxu0 %v14690_v4 }
 0x86c   : > { %10494 = vmatpush3.bf16.msra.mxu1 %v11904_v10 }
 0x86d   : > { %10519 = vmatprep.subr.bf16.mxu1 %v14690_v4 }
 0x86f   : > { %10496 = vmatmul.mubr.bf16.vlgmr.msra.gmra.mrb[68].mxu1 %v7338_v13 }
 0x870   : > { %10520 = vmatpush3.bf16.msra.mxu1 %v11905_v12  ;;  %10535 = vmatprep.mubr.msk.bf16.mxu1 %vm11992_vm5, %v14690_v4 }
 0x871   : > { %10521 = vmatprep.subr.bf16.mxu1 %v14690_v4 }
 0x874   : > { %10522 = vmatpush3.bf16.msra.mxu1 %v11906_v14  ;;  %v11936_v14 = vld [vmem:[%s15022_s3 + $0x338] sm:$0xff]  }
 0x875   : > { %10523 = vmatprep.subr.bf16.mxu1 %v14690_v4 }
 0x878   : > { %10524 = vmatpush3.bf16.msra.mxu1 %v11907_v15  ;;  %v7579_v15 = vld [vmem:[#allocation4 + $0x7] ss:$2 sm:$0x1f] }
 0x879   : > { %10525 = vmatprep.subr.bf16.mxu1 %v14690_v4 }
 0x87c   : > { %10526 = vmatpush3.bf16.msra.mxu1 %v11908_v16  ;;  %v7580_v16 = vpack.c.bf16 %v7579_v15, %v7579_v15 }
 0x87d   : > { %10527 = vmatprep.subr.bf16.mxu1 %v14690_v4 }
 0x880   : > { %10528 = vmatpush3.bf16.msra.mxu1 %v11909_v43 }
 0x881   : > { %10529 = vmatprep.subr.bf16.mxu1 %v14690_v4 }
 0x884   : > { %10530 = vmatpush3.bf16.msra.mxu1 %v11910_v17 }
 0x885   : > { %10531 = vmatprep.subr.bf16.mxu1 %v14690_v4 }
 0x888   : > { %10532 = vmatpush3.bf16.msra.mxu1 %v11911_v18 }
 0x889   : > { %10533 = vmatprep.subr.bf16.mxu1 %v14690_v4 }
 0x88c   : > { %10534 = vmatpush3.bf16.msra.mxu1 %v11912_v27 }
 0x88d   : > { %10559 = vmatprep.subr.bf16.mxu1 %v14690_v4 }
 0x88f   : > { %10536 = vmatmul.mubr.bf16.vlgmr.msra.gmra.mrb[72].mxu1 %v7600_v56  ;;  %v11939_v56 = vld [vmem:[%s15022_s3 + $0x408] sm:$0xff]  }
 0x890   : > { %10560 = vmatpush3.bf16.msra.mxu1 %v11913_v62  ;;  %10575 = vmatprep.mubr.msk.bf16.mxu1 %vm11992_vm5, %v14690_v4  ;;  %v11938_v62 = vld [vmem:[%s15022_s3 + $0x3c0] sm:$0xff]  }
 0x891   : > { %10561 = vmatprep.subr.bf16.mxu1 %v14690_v4 }
 0x894   : > { %10562 = vmatpush3.bf16.msra.mxu1 %v11914_v19  ;;  %v11940_v19 = vld [vmem:[%s15022_s3 + $0x3c8] sm:$0xff]  }
 0x895   : > { %10563 = vmatprep.subr.bf16.mxu1 %v14690_v4 }
 0x898   : > { %10564 = vmatpush3.bf16.msra.mxu1 %v11915_v20  ;;  %v11941_v20 = vld [vmem:[%s15022_s3 + $0x410] sm:$0xff]  }
 0x899   : > { %10565 = vmatprep.subr.bf16.mxu1 %v14690_v4 }
 0x89c   : > { %10566 = vmatpush3.bf16.msra.mxu1 %v11916_v54  ;;  %v11942_v54 = vld [vmem:[%s15022_s3 + $0x3d0] sm:$0xff]  }
 0x89d   : > { %10567 = vmatprep.subr.bf16.mxu1 %v14690_v4 }
 0x8a0   : > { %10568 = vmatpush3.bf16.msra.mxu1 %v11917_v53  ;;  %v11943_v53 = vld [vmem:[%s15022_s3 + $0x418] sm:$0xff]  }
 0x8a1   : > { %10569 = vmatprep.subr.bf16.mxu1 %v14690_v4 }
 0x8a4   : > { %10570 = vmatpush3.bf16.msra.mxu1 %v11918_v29  ;;  %v11944_v29 = vld [vmem:[%s15022_s3 + $0x3d8] sm:$0xff]  }
 0x8a5   : > { %10571 = vmatprep.subr.bf16.mxu1 %v14690_v4 }
 0x8a8   : > { %10572 = vmatpush3.bf16.msra.mxu1 %v11919_v8  ;;  %v11945_v8 = vld [vmem:[%s15022_s3 + $0x420] sm:$0xff]  }
 0x8a9   : > { %10573 = vmatprep.subr.bf16.mxu1 %v14690_v4 }
 0x8ac   : > { %10574 = vmatpush3.bf16.msra.mxu1 %v11920_v24  ;;  %v11948_v24 = vld [vmem:[%s15022_s3 + $0x3e8] sm:$0xff]  }
 0x8ad   : > { %10599 = vmatprep.subr.bf16.mxu1 %v14690_v4 }
 0x8af   : > { %10576 = vmatmul.mubr.bf16.vlgmr.msra.gmra.mrb[76].mxu1 %v7796_v26  ;;  %v11951_v26 = vld [vmem:[%s15022_s3 + $0x438] sm:$0xff]  }
 0x8b0   : > { %10615 = vmatprep.mubr.msk.bf16.mxu1 %vm11992_vm5, %v14690_v4  ;;  %10600 = vmatpush3.bf16.msra.mxu1 %v11938_v62 }
 0x8b1   : > { %10601 = vmatprep.subr.bf16.mxu1 %v14690_v4 }
 0x8b4   : > { %10602 = vmatpush3.bf16.msra.mxu1 %v11940_v19 }
 0x8b5   : > { %10603 = vmatprep.subr.bf16.mxu1 %v14690_v4 }
 0x8b8   : > { %10604 = vmatpush3.bf16.msra.mxu1 %v11942_v54 }
 0x8b9   : > { %10605 = vmatprep.subr.bf16.mxu1 %v14690_v4 }
 0x8bc   : > { %10606 = vmatpush3.bf16.msra.mxu1 %v11944_v29 }
 0x8bd   : > { %10607 = vmatprep.subr.bf16.mxu1 %v14690_v4 }
 0x8c0   : > { %10608 = vmatpush3.bf16.msra.mxu1 %v11946_v21  ;;  %v9945_v21 = vld [vmem:[%s15025_s6] ss:$0 sm:$0xff] }
 0x8c1   : > { %10609 = vmatprep.subr.bf16.mxu1 %v14690_v4 }
 0x8c4   : > { %10610 = vmatpush3.bf16.msra.mxu1 %v11948_v24 }
 0x8c5   : > { %10611 = vmatprep.subr.bf16.mxu1 %v14690_v4 }
 0x8c8   : > { %10612 = vmatpush3.bf16.msra.mxu1 %v11950_v37 }
 0x8c9   : > { %10613 = vmatprep.subr.bf16.mxu1 %v14690_v4 }
 0x8cc   : > { %10614 = vmatpush3.bf16.msra.mxu1 %v11952_v28 }
 0x8cd   : > { %10639 = vmatprep.subr.bf16.mxu1 %v14690_v4 }
 0x920   : > { %v7329_v35 = vpop.f32.mrb[36].mxu0 }
 0x921   : > { %v10477_v36 = vpop.f32.mrb[37].mxu0 }
 0x922   : > { %v7240_v1 = vpop.f32.mrb[64].mxu1  ;;  %v7332_v41 = vpop.f32.mrb[38].mxu0 }
 0x923   : > { %v7330_v31 = vadd.f32 %v7329_v35, %v7240_v1  ;;  %v10457_v44 = vpop.f32.mrb[65].mxu1  ;;  %v10478_v25 = vpop.f32.mrb[39].mxu0 }
 0x924   : > { %v7243_v45 = vpop.f32.mrb[66].mxu1  ;;  %v9870_v44 = vld [vmem:[%s15023_s4 + $0x4] ss:$0 sm:$0xff] }
 0x925   : > { %v7333_v49 = vadd.f32 %v7332_v41, %v7243_v45  ;;  %v10458_v5 = vpop.f32.mrb[67].mxu1 }
 0x942   : > { %v7438_v48 = vpop.f32.mrb[68].mxu1 }
 0x943   : > { %v7445_v52 = vadd.f32 %v7438_v48, %v7330_v31  ;;  %v10497_v59 = vpop.f32.mrb[69].mxu1 }
 0x944   : > { %v7441_v42 = vpop.f32.mrb[70].mxu1  ;;  %v11953_v59 = vld [vmem:[%s15022_s3 + $0x440] sm:$0xff]  }
 0x945   : > { %v7455_v58 = vadd.f32 %v9787_v50, %v7445_v52  ;;  %v7446_v46 = vadd.f32 %v7441_v42, %v7333_v49  ;;  %v10498_v60 = vpop.f32.mrb[71].mxu1 }
 0x946   : > { %v11955_v60 = vld [vmem:[%s15022_s3 + $0x450] sm:$0xff]  }
 0x947   : > { %v7459_v61 = vmul.f32 0.2, %v7455_v58  ;;  %v7456_v63 = vadd.f32 %v9787_v50, %v7446_v46  ;;  %vm7457_vm11 = vcmp.ge.f32.partialorder %v7455_v58, 0.0  ;;  %v11954_v46 = vld [vmem:[%s15022_s3 + $0x448] sm:$0xff]  }
 0x949   : > { %vm7458_vm12 = vcmp.ge.f32.partialorder %v7456_v63, 0.0  ;;  %v7460_v51 = vmul.f32 0.2, %v7456_v63  ;;  %v7461_v0 = vsel %vm7457_vm11, %v7455_v58, %v7459_v61  ;;  %v11956_v61 = vld [vmem:[%s15022_s3 + $0x458] sm:$0xff]  }
 0x94b   : > { %v7462_v55 = vsel %vm7458_vm12, %v7456_v63, %v7460_v51  ;;  %v11957_v63 = vld [vmem:[%s15022_s3 + $0x460] sm:$0xff]   ;;  %v11958_v51 = vld [vmem:[%s15022_s3 + $0x468] sm:$0xff]  }
 0x94c   : > { %v7463_v3 = vpack.c.bf16 %v7462_v55, %v7461_v0  ;;  %v11959_v0 = vld [vmem:[%s15022_s3 + $0x470] sm:$0xff]   ;;  %v11960_v55 = vld [vmem:[%s15022_s3 + $0x478] sm:$0xff]  }
 0x94e   : > { %10516 = vmatmul.mubr.bf16.vlgmr.msra.gmra.mrb[40].mxu0 %v7463_v3 }
 0x94f   : > { %10540 = vmatpush3.bf16.msra.mxu0 %v11929_v2  ;;  %10555 = vmatprep.mubr.msk.bf16.mxu0 %vm11992_vm5, %v14690_v4 }
 0x950   : > { %10541 = vmatprep.subr.bf16.mxu0 %v14690_v4 }
 0x953   : > { %10542 = vmatpush3.bf16.msra.mxu0 %v11930_v6  ;;  %v11961_v6 = vld [vmem:[%s15024_s5] sm:$0xff]  }
 0x954   : > { %10543 = vmatprep.subr.bf16.mxu0 %v14690_v4 }
 0x957   : > { %10544 = vmatpush3.bf16.msra.mxu0 %v11931_v40  ;;  %v11962_v40 = vld [vmem:[%s15024_s5 + $0x8] sm:$0xff]  }
 0x958   : > { %10545 = vmatprep.subr.bf16.mxu0 %v14690_v4 }
 0x95b   : > { %10546 = vmatpush3.bf16.msra.mxu0 %v11932_v38  ;;  %v11963_v38 = vld [vmem:[%s15024_s5 + $0x10] sm:$0xff]  }
 0x95c   : > { %10547 = vmatprep.subr.bf16.mxu0 %v14690_v4 }
 0x95f   : > { %10548 = vmatpush3.bf16.msra.mxu0 %v11933_v7  ;;  %v11964_v7 = vld [vmem:[%s15024_s5 + $0x18] sm:$0xff]  }
 0x960   : > { %10549 = vmatprep.subr.bf16.mxu0 %v14690_v4 }
 0x962   : > { %v14850_v10 = vpop.f32.mrb[72].mxu1 }
 0x963   : > { %10550 = vmatpush3.bf16.msra.mxu0 %v11934_v9  ;;  %v10537_v39 = vpop.f32.mrb[73].mxu1  ;;  %v11965_v9 = vld [vmem:[%s15024_s5 + $0x20] sm:$0xff]  }
 0x964   : > { %v7703_v12 = vpop.f32.mrb[74].mxu1  ;;  %10551 = vmatprep.subr.bf16.mxu0 %v14690_v4  ;;  %v11967_v39 = vld [vmem:[%s15024_s5 + $0x30] sm:$0xff]  }
 0x965   : > { %v10538_v13 = vpop.f32.mrb[75].mxu1 }
 0x967   : > { %10552 = vmatpush3.bf16.msra.mxu0 %v11935_v11  ;;  %v11968_v11 = vld [vmem:[%s15024_s5 + $0x38] sm:$0xff]  }
 0x968   : > { %10553 = vmatprep.subr.bf16.mxu0 %v14690_v4 }
 0x96b   : > { %10554 = vmatpush3.bf16.msra.mxu0 %v11936_v14 }
 0x96c   : > { %10579 = vmatprep.subr.bf16.mxu0 %v14690_v4 }
 0x96e   : > { %10556 = vmatmul.mubr.bf16.vlgmr.msra.gmra.mrb[44].mxu0 %v7580_v16 }
 0x96f   : > { %10595 = vmatprep.mubr.msk.bf16.mxu0 %vm11992_vm5, %v14690_v4  ;;  %10580 = vmatpush3.bf16.msra.mxu0 %v11937_v33 }
 0x970   : > { %10581 = vmatprep.subr.bf16.mxu0 %v14690_v4 }
 0x973   : > { %10582 = vmatpush3.bf16.msra.mxu0 %v11939_v56 }
 0x974   : > { %10583 = vmatprep.subr.bf16.mxu0 %v14690_v4 }
 0x977   : > { %10584 = vmatpush3.bf16.msra.mxu0 %v11941_v20 }
 0x978   : > { %10585 = vmatprep.subr.bf16.mxu0 %v14690_v4 }
 0x97b   : > { %10586 = vmatpush3.bf16.msra.mxu0 %v11943_v53 }
 0x97c   : > { %10587 = vmatprep.subr.bf16.mxu0 %v14690_v4 }
 0x97f   : > { %10588 = vmatpush3.bf16.msra.mxu0 %v11945_v8 }
 0x980   : > { %10589 = vmatprep.subr.bf16.mxu0 %v14690_v4 }
 0x982   : > { %v14863_v43 = vpop.f32.mrb[76].mxu1 }
 0x983   : > { %v10577_v17 = vpop.f32.mrb[77].mxu1  ;;  %10590 = vmatpush3.bf16.msra.mxu0 %v11947_v23 }
 0x984   : > { %v7899_v18 = vpop.f32.mrb[78].mxu1  ;;  %10591 = vmatprep.subr.bf16.mxu0 %v14690_v4 }
 0x985   : > { %v10578_v27 = vpop.f32.mrb[79].mxu1 }
 0x987   : > { %10592 = vmatpush3.bf16.msra.mxu0 %v11949_v57 }
 0x988   : > { %10593 = vmatprep.subr.bf16.mxu0 %v14690_v4 }
 0x98b   : > { %10594 = vmatpush3.bf16.msra.mxu0 %v11951_v26 }
 0x98c   : > { %10619 = vmatprep.subr.bf16.mxu0 %v14690_v4 }
 0xa21   : > { %v7569_v47 = vpop.f32.mrb[40].mxu0 }
 0xa22   : > { %v7570_v22 = vadd.f32 %v14667_v30, %v7569_v47  ;;  %v10517_v32 = vpop.f32.mrb[41].mxu0 }
 0xa23   : > { %v7572_v34 = vpop.f32.mrb[42].mxu0 }
 0xa24   : > { %7576 = vst [vmem:[%s351_s13] sm:$0xff] %v7570_v22  ;;  %v7573_v35 = vadd.f32 %v14667_v30, %v7572_v34  ;;  %v10518_v36 = vpop.f32.mrb[43].mxu0 }
 0xa26   : > { %7577 = vst [vmem:[%s351_s13 + $0x8] sm:$0x1] %v7573_v35 }
 0xa41   : > { %v7788_v1 = vpop.f32.mrb[44].mxu0 }
 0xa42   : > { %v7789_v41 = vadd.f32 %v7788_v1, %v14850_v10  ;;  %v10557_v31 = vpop.f32.mrb[45].mxu0  ;;  %v11966_v10 = vld [vmem:[%s15024_s5 + $0x28] sm:$0xff]  }
 0xa43   : > { %v7791_v25 = vpop.f32.mrb[46].mxu0 }
 0xa44   : > { %v7902_v45 = vadd.f32 %v14863_v43, %v7789_v41  ;;  %v10558_v49 = vpop.f32.mrb[47].mxu0 }
 0xa46   : > { %v7911_v5 = vadd.f32 %v9870_v44, %v7902_v45 }
 0xa48   : > { %vm7912_vm13 = vcmp.ge.f32.partialorder %v7911_v5, 0.0  ;;  %v7913_v48 = vmul.f32 0.2, %v7911_v5 }
 0xa4a   : > { %v7914_v50 = vsel %vm7912_vm13, %v7911_v5, %v7913_v48 }
 0xa4b   : > { %7915 = vst [vmem:[#allocation5 + $0x8] sm:$0x1f] %v7914_v50 }
 0xa52   : > { %v7935_v30 = vld [vmem:[#allocation5 + $0x8] sm:$0x1f] }
 0xa53   : > { %v7916_v52 = vld [vmem:[#allocation5 + $0x7] sm:$0x1f]  ;;  %v7936_v42 = vpack.c.bf16 %v7935_v30, %v7935_v30 }
 0xa54   : > { %v7917_v58 = vpack.c.bf16 %v7916_v52, %v7916_v52  ;;  %v8130_v2 = vld [vmem:[#allocation5 + $0x9] sm:$0x1f] }
 0xa55   : > { %10596 = vmatmul.mubr.bf16.vlgmr.msra.gmra.mrb[48].mxu0 %v7936_v42  ;;  %v8131_v3 = vpack.c.bf16 %v8130_v2, %v8130_v2 }
 0xa56   : > { %10616 = vmatmul.mubr.bf16.vlgmr.msra.gmra.mrb[80].mxu1 %v7917_v58  ;;  %10620 = vmatpush3.bf16.msra.mxu0 %v11953_v59 }
 0xa57   : > { %10635 = vmatprep.mubr.msk.bf16.mxu0 %vm11992_vm5, %v14690_v4  ;;  %10621 = vmatprep.subr.bf16.mxu0 %v14690_v4 }
 0xa58   : > { %10655 = vmatprep.mubr.msk.bf16.mxu1 %vm11992_vm5, %v14690_v4  ;;  %10640 = vmatpush3.bf16.msra.mxu1 %v11961_v6 }
 0xa59   : > { %10641 = vmatprep.subr.bf16.mxu1 %v14690_v4 }
 0xa5a   : > { %10622 = vmatpush3.bf16.msra.mxu0 %v11954_v46 }
 0xa5b   : > { %10623 = vmatprep.subr.bf16.mxu0 %v14690_v4 }
 0xa5c   : > { %10642 = vmatpush3.bf16.msra.mxu1 %v11962_v40 }
 0xa5d   : > { %10643 = vmatprep.subr.bf16.mxu1 %v14690_v4 }
 0xa5e   : > { %10624 = vmatpush3.bf16.msra.mxu0 %v11955_v60 }
 0xa5f   : > { %10625 = vmatprep.subr.bf16.mxu0 %v14690_v4 }
 0xa60   : > { %10644 = vmatpush3.bf16.msra.mxu1 %v11963_v38 }
 0xa61   : > { %10645 = vmatprep.subr.bf16.mxu1 %v14690_v4 }
 0xa62   : > { %10626 = vmatpush3.bf16.msra.mxu0 %v11956_v61 }
 0xa63   : > { %10627 = vmatprep.subr.bf16.mxu0 %v14690_v4 }
 0xa64   : > { %10646 = vmatpush3.bf16.msra.mxu1 %v11964_v7 }
 0xa65   : > { %10647 = vmatprep.subr.bf16.mxu1 %v14690_v4 }
 0xa66   : > { %10628 = vmatpush3.bf16.msra.mxu0 %v11957_v63 }
 0xa67   : > { %10629 = vmatprep.subr.bf16.mxu0 %v14690_v4 }
 0xa68   : > { %10648 = vmatpush3.bf16.msra.mxu1 %v11965_v9 }
 0xa69   : > { %10649 = vmatprep.subr.bf16.mxu1 %v14690_v4 }
 0xa6a   : > { %10630 = vmatpush3.bf16.msra.mxu0 %v11958_v51 }
 0xa6b   : > { %10631 = vmatprep.subr.bf16.mxu0 %v14690_v4 }
 0xa6c   : > { %10650 = vmatpush3.bf16.msra.mxu1 %v11966_v10 }
 0xa6d   : > { %10651 = vmatprep.subr.bf16.mxu1 %v14690_v4 }
 0xa6e   : > { %10632 = vmatpush3.bf16.msra.mxu0 %v11959_v0 }
 0xa6f   : > { %10633 = vmatprep.subr.bf16.mxu0 %v14690_v4 }
 0xa70   : > { %10652 = vmatpush3.bf16.msra.mxu1 %v11967_v39 }
 0xa71   : > { %10653 = vmatprep.subr.bf16.mxu1 %v14690_v4  ;;  %v9944_v4 = vld [vmem:[%s15023_s4 + $0x5] ss:$0 sm:$0xff] }
 0xa72   : > { %10634 = vmatpush3.bf16.msra.mxu0 %v11960_v55 }
 0xa74   : > { %10654 = vmatpush3.bf16.msra.mxu1 %v11968_v11 }
 0xa75   : > { %10636 = vmatmul.mubr.bf16.vlgmr.msra.gmra.mrb[52].mxu0 %v8131_v3 }
 0xb28   : > { %v8036_v12 = vpop.f32.mrb[48].mxu0 }
 0xb29   : > { %v8124_v13 = vpop.f32.mrb[80].mxu1  ;;  %v10597_v15 = vpop.f32.mrb[49].mxu0 }
 0xb2a   : > { %v8125_v14 = vadd.f32 %v8124_v13, %v8036_v12  ;;  %v10617_v16 = vpop.f32.mrb[81].mxu1  ;;  %v8039_v43 = vpop.f32.mrb[50].mxu0 }
 0xb2b   : > { %v8127_v17 = vpop.f32.mrb[82].mxu1  ;;  %v10598_v18 = vpop.f32.mrb[51].mxu0 }
 0xb2c   : > { %v10618_v27 = vpop.f32.mrb[83].mxu1 }
 0xb48   : > { %v8231_v33 = vpop.f32.mrb[52].mxu0 }
 0xb49   : > { %v8237_v62 = vadd.f32 %v8231_v33, %v8125_v14  ;;  %v10637_v56 = vpop.f32.mrb[53].mxu0 }
 0xb4a   : > { %v8234_v19 = vpop.f32.mrb[54].mxu0 }
 0xb4b   : > { %v8246_v20 = vadd.f32 %v9944_v4, %v8237_v62  ;;  %v10638_v54 = vpop.f32.mrb[55].mxu0 }
 0xb4d   : > { %vm8247_vm14 = vcmp.ge.f32.partialorder %v8246_v20, 0.0  ;;  %v8248_v53 = vmul.f32 0.2, %v8246_v20 }
 0xb4f   : > { %v8249_v29 = vsel %vm8247_vm14, %v8246_v20, %v8248_v53 }
 0xb50   : > { %v8250_v8 = vpack.c.bf16 %v8249_v29, %v8249_v29 }
 0xb52   : > { %10656 = vmatmul.mubr.bf16.vlgmr.msra.gmra.mrb[84].mxu1 %v8250_v8 }
 0xc25   : > { %v8356_v23 = vpop.f32.mrb[84].mxu1 }
 0xc26   : > { %v8357_v24 = vadd.f32 %v9945_v21, %v8356_v23  ;;  %v10657_v57 = vpop.f32.mrb[85].mxu1 }
 0xc27   : > { %v8359_v37 = vpop.f32.mrb[86].mxu1 }
 0xc28   : > { %8362 = vst [vmem:[%s355_s16] sm:$0x1f] %v8357_v24  ;;  %v10658_v26 = vpop.f32.mrb[87].mxu1 }
 0xc29 PF: > { %s20_s30 = sadd.s32 1, %s11989_s30  }
 0xc2a   : > { %p17_p4 = scmp.ge.s32.totalorder %s20_s30, 4  }
 0xc2c   :  { %19 = sbr.rel (!%p17_p4) target bundleno = 1 (0x1), region = 134 }

</bundles_post_ra>
